<compile_context>
chip_gen: v7x
topology: tpu7x:2x2x1
jax: 0.10.0
libtpu: 0.0.40
codegen_flags: <defaults>
</compile_context>

<pallas_src>
import functools

import jax
import jax.numpy as jnp
import numpy as np
from jax import lax
from jax.experimental import pallas as pl
from jax.experimental.pallas import tpu as pltpu


# --------------------------------------------------------------------------
# Host-side (trace-time) weight re-packing
# --------------------------------------------------------------------------
def _conv_pool_weights(w, wi_size):
    """Pack a (Cout, Cin, 5, 5) conv weight into per-(parity, kh) GEMM blocks.

    Returns T of shape (2*5, Win*Cin, (Wout//2)*Cout) such that, with the
    activation slab X[h, wi*Cin + ci] (rows = image rows, cols = (col, chan)):

        sum_kh  X[h+kh, :] @ T[parity*5 + kh]
          = conv output rows h, columns (wo1, co) for wo = 2*wo1 + parity.

    The max over the two parities is exactly the 2x max-pool along W.
    """
    cout, cin, ksz, _ = w.shape
    wo_half = (wi_size - ksz + 1) // 2
    wp = jnp.transpose(w, (2, 3, 1, 0))                    # (kh, kw, ci, co)
    wi = np.arange(wi_size)[:, None, None]
    par = np.arange(2)[None, :, None]
    wo1 = np.arange(wo_half)[None, None, :]
    kw = wi - (2 * wo1 + par)                              # (wi, 2, wo_half)
    valid = ((kw >= 0) & (kw < ksz)).astype(np.float32)
    kw_c = np.clip(kw, 0, ksz - 1)
    # gather -> (kh, wi, par, wo1, ci, co), zero out-of-window taps
    t = wp[:, kw_c, :, :] * valid[None, :, :, :, None, None]
    t = jnp.transpose(t, (2, 0, 1, 4, 3, 5))               # (par, kh, wi, ci, wo1, co)
    return t.reshape(2 * ksz, wi_size * cin, wo_half * cout)


# --------------------------------------------------------------------------
# Fused forward kernel
# --------------------------------------------------------------------------
def _lenet_kernel(x_ref, w1_ref, b1_ref, w2_ref, b2_ref,
                  wf1_ref, bf1_ref, wf2_ref, bf2_ref, wf3_ref, bf3_ref,
                  out_ref, p1_s, p2_s, fcin_s, *, batch_tile):
    f32 = jnp.float32

    def pool_rows(v, out_rows):
        """2x max-pool over rows via one-hot selection matmuls (exact)."""
        in_rows = v.shape[0]
        r = lax.broadcasted_iota(jnp.int32, (out_rows, in_rows), 0)
        c = lax.broadcasted_iota(jnp.int32, (out_rows, in_rows), 1)
        sel_e = (c == 2 * r).astype(f32)
        sel_o = (c == 2 * r + 1).astype(f32)
        return jnp.maximum(jnp.dot(sel_e, v, preferred_element_type=f32),
                           jnp.dot(sel_o, v, preferred_element_type=f32))

    b1 = b1_ref[...]                                        # (1, 84)
    b2 = b2_ref[...]                                        # (1, 80)

    for b in range(batch_tile):
        # ---- conv1 (1->6, 5x5 VALID) + ReLU + 2x2 max-pool -----------------
        acc_e = jnp.zeros((28, 84), f32)
        acc_o = jnp.zeros((28, 84), f32)
        for kh in range(5):
            lhs = x_ref[b, kh:kh + 28, :]                   # (28, 32)
            acc_e += jnp.dot(lhs, w1_ref[kh], preferred_element_type=f32)
            acc_o += jnp.dot(lhs, w1_ref[5 + kh], preferred_element_type=f32)
        pw = jnp.maximum(jnp.maximum(acc_e, acc_o) + b1, 0.0)   # (28, 84) W-pooled
        p1_s[...] = pool_rows(pw, 14)                           # (14, 84) H-pooled

        # ---- conv2 (6->16, 5x5 VALID) + ReLU + 2x2 max-pool ----------------
        acc_e = jnp.zeros((10, 80), f32)
        acc_o = jnp.zeros((10, 80), f32)
        for kh in range(5):
            lhs = p1_s[kh:kh + 10, :]                       # (10, 84)
            acc_e += jnp.dot(lhs, w2_ref[kh], preferred_element_type=f32)
            acc_o += jnp.dot(lhs, w2_ref[5 + kh], preferred_element_type=f32)
        qw = jnp.maximum(jnp.maximum(acc_e, acc_o) + b2, 0.0)   # (10, 80)
        p2_s[...] = pool_rows(qw, 5)                            # (5, 80)

        # ---- flatten this image's features into one FC-input row ----------
        for h2 in range(5):
            fcin_s[b:b + 1, h2 * 80:(h2 + 1) * 80] = p2_s[h2:h2 + 1, :]

    # ---- fused, 128-padded MLP head over the whole batch tile --------------
    h = jnp.dot(fcin_s[...], wf1_ref[...], preferred_element_type=f32) + bf1_ref[...]
    h = jnp.maximum(h, 0.0)
    h = jnp.dot(h, wf2_ref[...], preferred_element_type=f32) + bf2_ref[...]
    h = jnp.maximum(h, 0.0)
    h = jnp.dot(h, wf3_ref[...], preferred_element_type=f32) + bf3_ref[...]
    out_ref[...] = h.astype(out_ref.dtype)


def _const_spec(shape):
    nd = len(shape)
    return pl.BlockSpec(shape, lambda i, nd=nd: (0,) * nd)


# --------------------------------------------------------------------------
# Wrapper
# --------------------------------------------------------------------------
def simple_classifier_forward(x, params, *, batch_tile=8):
    """x: (N, 1, 32, 32) float32 -> logits (N, 10)."""
    n = x.shape[0]
    assert x.shape[1:] == (1, 32, 32)
    bt = n if n < batch_tile else batch_tile
    n_pad = -(-n // bt) * bt

    x2 = x.reshape(n, 32, 32).astype(jnp.float32)
    if n_pad != n:
        x2 = jnp.pad(x2, ((0, n_pad - n), (0, 0), (0, 0)))

    f32 = jnp.float32
    # Conv weights packed for the fused conv+W-pool GEMMs.
    w1t = _conv_pool_weights(params["conv1_w"], 32)         # (10, 32, 84)
    b1t = jnp.tile(params["conv1_b"], 14).reshape(1, 84)
    w2t = _conv_pool_weights(params["conv2_w"], 14)         # (10, 84, 80)
    b2t = jnp.tile(params["conv2_b"], 5).reshape(1, 80)

    # fc1 rows permuted from torch (c, h, w) flatten order to the kernel's
    # (h, w, c) order; all FC dims zero-padded to 128 (lane-dense GEMMs/stores).
    h2 = np.repeat(np.arange(5), 80)
    w2 = np.tile(np.repeat(np.arange(5), 16), 5)
    co = np.tile(np.arange(16), 25)
    perm = co * 25 + h2 * 5 + w2                            # (400,)
    wf1 = jnp.zeros((400, 128), f32).at[:, :120].set(params["fc1_w"][perm, :])
    bf1 = jnp.zeros((1, 128), f32).at[:, :120].set(params["fc1_b"][None, :])
    wf2 = jnp.zeros((128, 128), f32).at[:120, :84].set(params["fc2_w"])
    bf2 = jnp.zeros((1, 128), f32).at[:, :84].set(params["fc2_b"][None, :])
    wf3 = jnp.zeros((128, 128), f32).at[:84, :10].set(params["fc3_w"])
    bf3 = jnp.zeros((1, 128), f32).at[:, :10].set(params["fc3_b"][None, :])

    kern = functools.partial(_lenet_kernel, batch_tile=bt)
    out = pl.pallas_call(
        kern,
        out_shape=jax.ShapeDtypeStruct((n_pad, 128), f32),
        grid_spec=pltpu.PrefetchScalarGridSpec(
            num_scalar_prefetch=0,
            grid=(n_pad // bt,),
            in_specs=[
                pl.BlockSpec((bt, 32, 32), lambda i: (i, 0, 0)),
                _const_spec((10, 32, 84)), _const_spec((1, 84)),
                _const_spec((10, 84, 80)), _const_spec((1, 80)),
                _const_spec((400, 128)), _const_spec((1, 128)),
                _const_spec((128, 128)), _const_spec((1, 128)),
                _const_spec((128, 128)), _const_spec((1, 128)),
            ],
            out_specs=pl.BlockSpec((bt, 128), lambda i: (i, 0)),
            scratch_shapes=[
                pltpu.VMEM((14, 84), f32),    # pool1 output (per image)
                pltpu.VMEM((5, 80), f32),     # pool2 output (per image)
                pltpu.VMEM((bt, 400), f32),   # flattened FC input (per tile)
            ],
        ),
        compiler_params=pltpu.CompilerParams(
            dimension_semantics=("parallel",),
            vmem_limit_bytes=32 * 1024 * 1024,
        ),
    )(x2, w1t, b1t, w2t, b2t, wf1, bf1, wf2, bf2, wf3, bf3)
    return out[:n, :10]


# --------------------------------------------------------------------------
# Deterministic parameter initialization (PyTorch-default-like uniform)
# --------------------------------------------------------------------------
def init_params(key):
    def uinit(k, shape, fan_in):
        bound = 1.0 / (fan_in ** 0.5)
        return jax.random.uniform(k, shape, jnp.float32, -bound, bound)

    ks = jax.random.split(key, 10)
    return {
        "conv1_w": uinit(ks[0], (6, 1, 5, 5), 1 * 5 * 5),
        "conv1_b": uinit(ks[1], (6,), 1 * 5 * 5),
        "conv2_w": uinit(ks[2], (16, 6, 5, 5), 6 * 5 * 5),
        "conv2_b": uinit(ks[3], (16,), 6 * 5 * 5),
        "fc1_w":   uinit(ks[4], (400, 120), 400),   # stored (in, out)
        "fc1_b":   uinit(ks[5], (120,), 400),
        "fc2_w":   uinit(ks[6], (120, 84), 120),
        "fc2_b":   uinit(ks[7], (84,), 120),
        "fc3_w":   uinit(ks[8], (84, 10), 84),
        "fc3_b":   uinit(ks[9], (10,), 84),
    }


# --------------------------------------------------------------------------
# Pure-JAX reference (correctness check only)
# --------------------------------------------------------------------------
def reference_forward(x, p):
    def conv(x, w, b):
        y = lax.conv_general_dilated(
            x, w, window_strides=(1, 1), padding="VALID",
            dimension_numbers=("NCHW", "OIHW", "NCHW"))
        return jnp.maximum(y + b[None, :, None, None], 0.0)

    def pool(x):
        return lax.reduce_window(
            x, -jnp.inf, lax.max, (1, 1, 2, 2), (1, 1, 2, 2), "VALID")

    x = pool(conv(x, p["conv1_w"], p["conv1_b"]))
    x = pool(conv(x, p["conv2_w"], p["conv2_b"]))
    x = x.reshape(x.shape[0], -1)
    x = jnp.maximum(x @ p["fc1_w"] + p["fc1_b"], 0.0)
    x = jnp.maximum(x @ p["fc2_w"] + p["fc2_b"], 0.0)
    return x @ p["fc3_w"] + p["fc3_b"]


if __name__ == "__main__":
    key = jax.random.PRNGKey(0)
    k_x, k_p = jax.random.split(key)
    # forward() implies 32x32 single-channel inputs (LeNet-5): 16*5*5 = 400.
    x = jax.random.normal(k_x, (2, 1, 32, 32), jnp.float32)
    params = init_params(k_p)

    fwd = jax.jit(simple_classifier_forward)
    out = jax.block_until_ready(fwd(x, params))

    ref = reference_forward(x, params)
    assert out.shape == (2, 10), out.shape
    err = float(jnp.max(jnp.abs(out - ref)))
    assert jnp.allclose(out, ref, rtol=5e-4, atol=5e-4), ("mismatch vs reference", err)
    print("KERNEL_OK")
</pallas_src>

<mosaic_0001>
module attributes {stable_mosaic.version = 11 : i64} {
  func.func @_lenet_kernel(%arg0: i32, %arg1: memref<2x32x32xf32, #tpu.memory_space<vmem>>, %arg2: memref<10x32x84xf32, #tpu.memory_space<vmem>>, %arg3: memref<1x84xf32, #tpu.memory_space<vmem>>, %arg4: memref<10x84x80xf32, #tpu.memory_space<vmem>>, %arg5: memref<1x80xf32, #tpu.memory_space<vmem>>, %arg6: memref<400x128xf32, #tpu.memory_space<vmem>>, %arg7: memref<1x128xf32, #tpu.memory_space<vmem>>, %arg8: memref<128x128xf32, #tpu.memory_space<vmem>>, %arg9: memref<1x128xf32, #tpu.memory_space<vmem>>, %arg10: memref<128x128xf32, #tpu.memory_space<vmem>>, %arg11: memref<1x128xf32, #tpu.memory_space<vmem>>, %arg12: memref<2x128xf32, #tpu.memory_space<vmem>>, %arg13: memref<14x84xf32, #tpu.memory_space<vmem>>, %arg14: memref<5x80xf32, #tpu.memory_space<vmem>>, %arg15: memref<2x400xf32, #tpu.memory_space<vmem>>) attributes {dimension_semantics = [#tpu.dimension_semantics<parallel>], iteration_bounds = array<i64: 1>, scalar_prefetch = 0 : i64, scratch_operands = 3 : i64, tpu.core_type = #tpu.core_type<tc>, window_params = [{transform_indices = @transform_0, window_bounds = array<i64: 2, 32, 32>}, {pipeline_mode = #tpu.pipeline_mode<synchronous>, transform_indices = @transform_1, window_bounds = array<i64: 10, 32, 84>}, {pipeline_mode = #tpu.pipeline_mode<synchronous>, transform_indices = @transform_2, window_bounds = array<i64: 1, 84>}, {pipeline_mode = #tpu.pipeline_mode<synchronous>, transform_indices = @transform_3, window_bounds = array<i64: 10, 84, 80>}, {pipeline_mode = #tpu.pipeline_mode<synchronous>, transform_indices = @transform_4, window_bounds = array<i64: 1, 80>}, {pipeline_mode = #tpu.pipeline_mode<synchronous>, transform_indices = @transform_5, window_bounds = array<i64: 400, 128>}, {pipeline_mode = #tpu.pipeline_mode<synchronous>, transform_indices = @transform_6, window_bounds = array<i64: 1, 128>}, {pipeline_mode = #tpu.pipeline_mode<synchronous>, transform_indices = @transform_7, window_bounds = array<i64: 128, 128>}, {pipeline_mode = #tpu.pipeline_mode<synchronous>, transform_indices = @transform_8, window_bounds = array<i64: 1, 128>}, {pipeline_mode = #tpu.pipeline_mode<synchronous>, transform_indices = @transform_9, window_bounds = array<i64: 128, 128>}, {pipeline_mode = #tpu.pipeline_mode<synchronous>, transform_indices = @transform_10, window_bounds = array<i64: 1, 128>}, {transform_indices = @transform_11, window_bounds = array<i64: 2, 128>}]} {
    %c0 = arith.constant 0 : index
    %c0_0 = arith.constant 0 : index
    %0 = vector.load %arg3[%c0, %c0_0] : memref<1x84xf32, #tpu.memory_space<vmem>>, vector<1x84xf32>
    %c0_1 = arith.constant 0 : index
    %c0_2 = arith.constant 0 : index
    %1 = vector.load %arg5[%c0_1, %c0_2] : memref<1x80xf32, #tpu.memory_space<vmem>>, vector<1x80xf32>
    %cst = arith.constant 0.000000e+00 : f32
    %2 = vector.broadcast %cst : f32 to vector<28x84xf32>
    %cst_3 = arith.constant 0.000000e+00 : f32
    %3 = vector.broadcast %cst_3 : f32 to vector<28x84xf32>
    %c0_4 = arith.constant 0 : index
    %c0_5 = arith.constant 0 : index
    %c0_6 = arith.constant 0 : index
    %4 = vector.load %arg1[%c0_4, %c0_5, %c0_6] : memref<2x32x32xf32, #tpu.memory_space<vmem>>, vector<1x28x32xf32>
    %5 = vector.shape_cast %4 : vector<1x28x32xf32> to vector<28x32xf32>
    %c0_7 = arith.constant 0 : index
    %c0_8 = arith.constant 0 : index
    %c0_9 = arith.constant 0 : index
    %6 = vector.load %arg2[%c0_7, %c0_8, %c0_9] : memref<10x32x84xf32, #tpu.memory_space<vmem>>, vector<1x32x84xf32>
    %7 = vector.shape_cast %6 : vector<1x32x84xf32> to vector<32x84xf32>
    %cst_10 = arith.constant dense<0.000000e+00> : vector<28x84xf32>
    %8 = tpu.matmul %5, %7, %cst_10 {dimension_numbers = #tpu.dot_dimension_numbers<[1], [0], [0], [1], [0, 0, 1, 1], [], []>} : vector<28x32xf32>, vector<32x84xf32>, vector<28x84xf32> -> vector<28x84xf32>
    %9 = arith.addf %2, %8 : vector<28x84xf32>
    %c5 = arith.constant 5 : index
    %c0_11 = arith.constant 0 : index
    %c0_12 = arith.constant 0 : index
    %10 = vector.load %arg2[%c5, %c0_11, %c0_12] : memref<10x32x84xf32, #tpu.memory_space<vmem>>, vector<1x32x84xf32>
    %11 = vector.shape_cast %10 : vector<1x32x84xf32> to vector<32x84xf32>
    %cst_13 = arith.constant dense<0.000000e+00> : vector<28x84xf32>
    %12 = tpu.matmul %5, %11, %cst_13 {dimension_numbers = #tpu.dot_dimension_numbers<[1], [0], [0], [1], [0, 0, 1, 1], [], []>} : vector<28x32xf32>, vector<32x84xf32>, vector<28x84xf32> -> vector<28x84xf32>
    %13 = arith.addf %3, %12 : vector<28x84xf32>
    %c0_14 = arith.constant 0 : index
    %c1 = arith.constant 1 : index
    %c0_15 = arith.constant 0 : index
    %14 = vector.load %arg1[%c0_14, %c1, %c0_15] : memref<2x32x32xf32, #tpu.memory_space<vmem>>, vector<1x28x32xf32>
    %15 = vector.shape_cast %14 : vector<1x28x32xf32> to vector<28x32xf32>
    %c1_16 = arith.constant 1 : index
    %c0_17 = arith.constant 0 : index
    %c0_18 = arith.constant 0 : index
    %16 = vector.load %arg2[%c1_16, %c0_17, %c0_18] : memref<10x32x84xf32, #tpu.memory_space<vmem>>, vector<1x32x84xf32>
    %17 = vector.shape_cast %16 : vector<1x32x84xf32> to vector<32x84xf32>
    %cst_19 = arith.constant dense<0.000000e+00> : vector<28x84xf32>
    %18 = tpu.matmul %15, %17, %cst_19 {dimension_numbers = #tpu.dot_dimension_numbers<[1], [0], [0], [1], [0, 0, 1, 1], [], []>} : vector<28x32xf32>, vector<32x84xf32>, vector<28x84xf32> -> vector<28x84xf32>
    %19 = arith.addf %9, %18 : vector<28x84xf32>
    %c6 = arith.constant 6 : index
    %c0_20 = arith.constant 0 : index
    %c0_21 = arith.constant 0 : index
    %20 = vector.load %arg2[%c6, %c0_20, %c0_21] : memref<10x32x84xf32, #tpu.memory_space<vmem>>, vector<1x32x84xf32>
    %21 = vector.shape_cast %20 : vector<1x32x84xf32> to vector<32x84xf32>
    %cst_22 = arith.constant dense<0.000000e+00> : vector<28x84xf32>
    %22 = tpu.matmul %15, %21, %cst_22 {dimension_numbers = #tpu.dot_dimension_numbers<[1], [0], [0], [1], [0, 0, 1, 1], [], []>} : vector<28x32xf32>, vector<32x84xf32>, vector<28x84xf32> -> vector<28x84xf32>
    %23 = arith.addf %13, %22 : vector<28x84xf32>
    %c0_23 = arith.constant 0 : index
    %c2 = arith.constant 2 : index
    %c0_24 = arith.constant 0 : index
    %24 = vector.load %arg1[%c0_23, %c2, %c0_24] : memref<2x32x32xf32, #tpu.memory_space<vmem>>, vector<1x28x32xf32>
    %25 = vector.shape_cast %24 : vector<1x28x32xf32> to vector<28x32xf32>
    %c2_25 = arith.constant 2 : index
    %c0_26 = arith.constant 0 : index
    %c0_27 = arith.constant 0 : index
    %26 = vector.load %arg2[%c2_25, %c0_26, %c0_27] : memref<10x32x84xf32, #tpu.memory_space<vmem>>, vector<1x32x84xf32>
    %27 = vector.shape_cast %26 : vector<1x32x84xf32> to vector<32x84xf32>
    %cst_28 = arith.constant dense<0.000000e+00> : vector<28x84xf32>
    %28 = tpu.matmul %25, %27, %cst_28 {dimension_numbers = #tpu.dot_dimension_numbers<[1], [0], [0], [1], [0, 0, 1, 1], [], []>} : vector<28x32xf32>, vector<32x84xf32>, vector<28x84xf32> -> vector<28x84xf32>
    %29 = arith.addf %19, %28 : vector<28x84xf32>
    %c7 = arith.constant 7 : index
    %c0_29 = arith.constant 0 : index
    %c0_30 = arith.constant 0 : index
    %30 = vector.load %arg2[%c7, %c0_29, %c0_30] : memref<10x32x84xf32, #tpu.memory_space<vmem>>, vector<1x32x84xf32>
    %31 = vector.shape_cast %30 : vector<1x32x84xf32> to vector<32x84xf32>
    %cst_31 = arith.constant dense<0.000000e+00> : vector<28x84xf32>
    %32 = tpu.matmul %25, %31, %cst_31 {dimension_numbers = #tpu.dot_dimension_numbers<[1], [0], [0], [1], [0, 0, 1, 1], [], []>} : vector<28x32xf32>, vector<32x84xf32>, vector<28x84xf32> -> vector<28x84xf32>
    %33 = arith.addf %23, %32 : vector<28x84xf32>
    %c0_32 = arith.constant 0 : index
    %c3 = arith.constant 3 : index
    %c0_33 = arith.constant 0 : index
    %34 = vector.load %arg1[%c0_32, %c3, %c0_33] : memref<2x32x32xf32, #tpu.memory_space<vmem>>, vector<1x28x32xf32>
    %35 = vector.shape_cast %34 : vector<1x28x32xf32> to vector<28x32xf32>
    %c3_34 = arith.constant 3 : index
    %c0_35 = arith.constant 0 : index
    %c0_36 = arith.constant 0 : index
    %36 = vector.load %arg2[%c3_34, %c0_35, %c0_36] : memref<10x32x84xf32, #tpu.memory_space<vmem>>, vector<1x32x84xf32>
    %37 = vector.shape_cast %36 : vector<1x32x84xf32> to vector<32x84xf32>
    %cst_37 = arith.constant dense<0.000000e+00> : vector<28x84xf32>
    %38 = tpu.matmul %35, %37, %cst_37 {dimension_numbers = #tpu.dot_dimension_numbers<[1], [0], [0], [1], [0, 0, 1, 1], [], []>} : vector<28x32xf32>, vector<32x84xf32>, vector<28x84xf32> -> vector<28x84xf32>
    %39 = arith.addf %29, %38 : vector<28x84xf32>
    %c8 = arith.constant 8 : index
    %c0_38 = arith.constant 0 : index
    %c0_39 = arith.constant 0 : index
    %40 = vector.load %arg2[%c8, %c0_38, %c0_39] : memref<10x32x84xf32, #tpu.memory_space<vmem>>, vector<1x32x84xf32>
    %41 = vector.shape_cast %40 : vector<1x32x84xf32> to vector<32x84xf32>
    %cst_40 = arith.constant dense<0.000000e+00> : vector<28x84xf32>
    %42 = tpu.matmul %35, %41, %cst_40 {dimension_numbers = #tpu.dot_dimension_numbers<[1], [0], [0], [1], [0, 0, 1, 1], [], []>} : vector<28x32xf32>, vector<32x84xf32>, vector<28x84xf32> -> vector<28x84xf32>
    %43 = arith.addf %33, %42 : vector<28x84xf32>
    %c0_41 = arith.constant 0 : index
    %c4 = arith.constant 4 : index
    %c0_42 = arith.constant 0 : index
    %44 = vector.load %arg1[%c0_41, %c4, %c0_42] : memref<2x32x32xf32, #tpu.memory_space<vmem>>, vector<1x28x32xf32>
    %45 = vector.shape_cast %44 : vector<1x28x32xf32> to vector<28x32xf32>
    %c4_43 = arith.constant 4 : index
    %c0_44 = arith.constant 0 : index
    %c0_45 = arith.constant 0 : index
    %46 = vector.load %arg2[%c4_43, %c0_44, %c0_45] : memref<10x32x84xf32, #tpu.memory_space<vmem>>, vector<1x32x84xf32>
    %47 = vector.shape_cast %46 : vector<1x32x84xf32> to vector<32x84xf32>
    %cst_46 = arith.constant dense<0.000000e+00> : vector<28x84xf32>
    %48 = tpu.matmul %45, %47, %cst_46 {dimension_numbers = #tpu.dot_dimension_numbers<[1], [0], [0], [1], [0, 0, 1, 1], [], []>} : vector<28x32xf32>, vector<32x84xf32>, vector<28x84xf32> -> vector<28x84xf32>
    %49 = arith.addf %39, %48 : vector<28x84xf32>
    %c9 = arith.constant 9 : index
    %c0_47 = arith.constant 0 : index
    %c0_48 = arith.constant 0 : index
    %50 = vector.load %arg2[%c9, %c0_47, %c0_48] : memref<10x32x84xf32, #tpu.memory_space<vmem>>, vector<1x32x84xf32>
    %51 = vector.shape_cast %50 : vector<1x32x84xf32> to vector<32x84xf32>
    %cst_49 = arith.constant dense<0.000000e+00> : vector<28x84xf32>
    %52 = tpu.matmul %45, %51, %cst_49 {dimension_numbers = #tpu.dot_dimension_numbers<[1], [0], [0], [1], [0, 0, 1, 1], [], []>} : vector<28x32xf32>, vector<32x84xf32>, vector<28x84xf32> -> vector<28x84xf32>
    %53 = arith.addf %43, %52 : vector<28x84xf32>
    %54 = arith.maximumf %49, %53 : vector<28x84xf32>
    %55 = vector.broadcast %0 : vector<1x84xf32> to vector<28x84xf32>
    %56 = arith.addf %54, %55 : vector<28x84xf32>
    %cst_50 = arith.constant 0.000000e+00 : f32
    %57 = vector.broadcast %cst_50 : f32 to vector<28x84xf32>
    %58 = arith.maximumf %56, %57 : vector<28x84xf32>
    %59 = tpu.iota {dimensions = array<i32: 0>} : vector<14x28xi32>
    %60 = tpu.iota {dimensions = array<i32: 1>} : vector<14x28xi32>
    %c2_i32 = arith.constant 2 : i32
    %61 = vector.broadcast %c2_i32 : i32 to vector<14x28xi32>
    %62 = arith.muli %61, %59 : vector<14x28xi32>
    %63 = arith.cmpi eq, %60, %62 : vector<14x28xi32>
    %64 = arith.extui %63 : vector<14x28xi1> to vector<14x28xi32>
    %65 = arith.sitofp %64 : vector<14x28xi32> to vector<14x28xf32>
    %c2_i32_51 = arith.constant 2 : i32
    %66 = vector.broadcast %c2_i32_51 : i32 to vector<14x28xi32>
    %67 = arith.muli %66, %59 : vector<14x28xi32>
    %c1_i32 = arith.constant 1 : i32
    %68 = vector.broadcast %c1_i32 : i32 to vector<14x28xi32>
    %69 = arith.addi %67, %68 : vector<14x28xi32>
    %70 = arith.cmpi eq, %60, %69 : vector<14x28xi32>
    %71 = arith.extui %70 : vector<14x28xi1> to vector<14x28xi32>
    %72 = arith.sitofp %71 : vector<14x28xi32> to vector<14x28xf32>
    %cst_52 = arith.constant dense<0.000000e+00> : vector<14x84xf32>
    %73 = tpu.matmul %65, %58, %cst_52 {dimension_numbers = #tpu.dot_dimension_numbers<[1], [0], [0], [1], [0, 0, 1, 1], [], []>} : vector<14x28xf32>, vector<28x84xf32>, vector<14x84xf32> -> vector<14x84xf32>
    %cst_53 = arith.constant dense<0.000000e+00> : vector<14x84xf32>
    %74 = tpu.matmul %72, %58, %cst_53 {dimension_numbers = #tpu.dot_dimension_numbers<[1], [0], [0], [1], [0, 0, 1, 1], [], []>} : vector<14x28xf32>, vector<28x84xf32>, vector<14x84xf32> -> vector<14x84xf32>
    %75 = arith.maximumf %73, %74 : vector<14x84xf32>
    %c0_54 = arith.constant 0 : index
    %c0_55 = arith.constant 0 : index
    %76 = vector.load %arg13[%c0_54, %c0_55] : memref<14x84xf32, #tpu.memory_space<vmem>>, vector<14x84xf32>
    tpu.vector_store %arg13[%c0_54, %c0_55], %75 {strides = array<i32>} : memref<14x84xf32, #tpu.memory_space<vmem>>, vector<14x84xf32>,
    %cst_56 = arith.constant 0.000000e+00 : f32
    %77 = vector.broadcast %cst_56 : f32 to vector<10x80xf32>
    %cst_57 = arith.constant 0.000000e+00 : f32
    %78 = vector.broadcast %cst_57 : f32 to vector<10x80xf32>
    %c0_58 = arith.constant 0 : index
    %c0_59 = arith.constant 0 : index
    %79 = vector.load %arg13[%c0_58, %c0_59] : memref<14x84xf32, #tpu.memory_space<vmem>>, vector<10x84xf32>
    %c0_60 = arith.constant 0 : index
    %c0_61 = arith.constant 0 : index
    %c0_62 = arith.constant 0 : index
    %80 = vector.load %arg4[%c0_60, %c0_61, %c0_62] : memref<10x84x80xf32, #tpu.memory_space<vmem>>, vector<1x84x80xf32>
    %81 = vector.shape_cast %80 : vector<1x84x80xf32> to vector<84x80xf32>
    %cst_63 = arith.constant dense<0.000000e+00> : vector<10x80xf32>
    %82 = tpu.matmul %79, %81, %cst_63 {dimension_numbers = #tpu.dot_dimension_numbers<[1], [0], [0], [1], [0, 0, 1, 1], [], []>} : vector<10x84xf32>, vector<84x80xf32>, vector<10x80xf32> -> vector<10x80xf32>
    %83 = arith.addf %77, %82 : vector<10x80xf32>
    %c5_64 = arith.constant 5 : index
    %c0_65 = arith.constant 0 : index
    %c0_66 = arith.constant 0 : index
    %84 = vector.load %arg4[%c5_64, %c0_65, %c0_66] : memref<10x84x80xf32, #tpu.memory_space<vmem>>, vector<1x84x80xf32>
    %85 = vector.shape_cast %84 : vector<1x84x80xf32> to vector<84x80xf32>
    %cst_67 = arith.constant dense<0.000000e+00> : vector<10x80xf32>
    %86 = tpu.matmul %79, %85, %cst_67 {dimension_numbers = #tpu.dot_dimension_numbers<[1], [0], [0], [1], [0, 0, 1, 1], [], []>} : vector<10x84xf32>, vector<84x80xf32>, vector<10x80xf32> -> vector<10x80xf32>
    %87 = arith.addf %78, %86 : vector<10x80xf32>
    %c1_68 = arith.constant 1 : index
    %c0_69 = arith.constant 0 : index
    %88 = vector.load %arg13[%c1_68, %c0_69] : memref<14x84xf32, #tpu.memory_space<vmem>>, vector<10x84xf32>
    %c1_70 = arith.constant 1 : index
    %c0_71 = arith.constant 0 : index
    %c0_72 = arith.constant 0 : index
    %89 = vector.load %arg4[%c1_70, %c0_71, %c0_72] : memref<10x84x80xf32, #tpu.memory_space<vmem>>, vector<1x84x80xf32>
    %90 = vector.shape_cast %89 : vector<1x84x80xf32> to vector<84x80xf32>
    %cst_73 = arith.constant dense<0.000000e+00> : vector<10x80xf32>
    %91 = tpu.matmul %88, %90, %cst_73 {dimension_numbers = #tpu.dot_dimension_numbers<[1], [0], [0], [1], [0, 0, 1, 1], [], []>} : vector<10x84xf32>, vector<84x80xf32>, vector<10x80xf32> -> vector<10x80xf32>
    %92 = arith.addf %83, %91 : vector<10x80xf32>
    %c6_74 = arith.constant 6 : index
    %c0_75 = arith.constant 0 : index
    %c0_76 = arith.constant 0 : index
    %93 = vector.load %arg4[%c6_74, %c0_75, %c0_76] : memref<10x84x80xf32, #tpu.memory_space<vmem>>, vector<1x84x80xf32>
    %94 = vector.shape_cast %93 : vector<1x84x80xf32> to vector<84x80xf32>
    %cst_77 = arith.constant dense<0.000000e+00> : vector<10x80xf32>
    %95 = tpu.matmul %88, %94, %cst_77 {dimension_numbers = #tpu.dot_dimension_numbers<[1], [0], [0], [1], [0, 0, 1, 1], [], []>} : vector<10x84xf32>, vector<84x80xf32>, vector<10x80xf32> -> vector<10x80xf32>
    %96 = arith.addf %87, %95 : vector<10x80xf32>
    %c2_78 = arith.constant 2 : index
    %c0_79 = arith.constant 0 : index
    %97 = vector.load %arg13[%c2_78, %c0_79] : memref<14x84xf32, #tpu.memory_space<vmem>>, vector<10x84xf32>
    %c2_80 = arith.constant 2 : index
    %c0_81 = arith.constant 0 : index
    %c0_82 = arith.constant 0 : index
    %98 = vector.load %arg4[%c2_80, %c0_81, %c0_82] : memref<10x84x80xf32, #tpu.memory_space<vmem>>, vector<1x84x80xf32>
    %99 = vector.shape_cast %98 : vector<1x84x80xf32> to vector<84x80xf32>
    %cst_83 = arith.constant dense<0.000000e+00> : vector<10x80xf32>
    %100 = tpu.matmul %97, %99, %cst_83 {dimension_numbers = #tpu.dot_dimension_numbers<[1], [0], [0], [1], [0, 0, 1, 1], [], []>} : vector<10x84xf32>, vector<84x80xf32>, vector<10x80xf32> -> vector<10x80xf32>
    %101 = arith.addf %92, %100 : vector<10x80xf32>
    %c7_84 = arith.constant 7 : index
    %c0_85 = arith.constant 0 : index
    %c0_86 = arith.constant 0 : index
    %102 = vector.load %arg4[%c7_84, %c0_85, %c0_86] : memref<10x84x80xf32, #tpu.memory_space<vmem>>, vector<1x84x80xf32>
    %103 = vector.shape_cast %102 : vector<1x84x80xf32> to vector<84x80xf32>
    %cst_87 = arith.constant dense<0.000000e+00> : vector<10x80xf32>
    %104 = tpu.matmul %97, %103, %cst_87 {dimension_numbers = #tpu.dot_dimension_numbers<[1], [0], [0], [1], [0, 0, 1, 1], [], []>} : vector<10x84xf32>, vector<84x80xf32>, vector<10x80xf32> -> vector<10x80xf32>
    %105 = arith.addf %96, %104 : vector<10x80xf32>
    %c3_88 = arith.constant 3 : index
    %c0_89 = arith.constant 0 : index
    %106 = vector.load %arg13[%c3_88, %c0_89] : memref<14x84xf32, #tpu.memory_space<vmem>>, vector<10x84xf32>
    %c3_90 = arith.constant 3 : index
    %c0_91 = arith.constant 0 : index
    %c0_92 = arith.constant 0 : index
    %107 = vector.load %arg4[%c3_90, %c0_91, %c0_92] : memref<10x84x80xf32, #tpu.memory_space<vmem>>, vector<1x84x80xf32>
    %108 = vector.shape_cast %107 : vector<1x84x80xf32> to vector<84x80xf32>
    %cst_93 = arith.constant dense<0.000000e+00> : vector<10x80xf32>
    %109 = tpu.matmul %106, %108, %cst_93 {dimension_numbers = #tpu.dot_dimension_numbers<[1], [0], [0], [1], [0, 0, 1, 1], [], []>} : vector<10x84xf32>, vector<84x80xf32>, vector<10x80xf32> -> vector<10x80xf32>
    %110 = arith.addf %101, %109 : vector<10x80xf32>
    %c8_94 = arith.constant 8 : index
    %c0_95 = arith.constant 0 : index
    %c0_96 = arith.constant 0 : index
    %111 = vector.load %arg4[%c8_94, %c0_95, %c0_96] : memref<10x84x80xf32, #tpu.memory_space<vmem>>, vector<1x84x80xf32>
    %112 = vector.shape_cast %111 : vector<1x84x80xf32> to vector<84x80xf32>
    %cst_97 = arith.constant dense<0.000000e+00> : vector<10x80xf32>
    %113 = tpu.matmul %106, %112, %cst_97 {dimension_numbers = #tpu.dot_dimension_numbers<[1], [0], [0], [1], [0, 0, 1, 1], [], []>} : vector<10x84xf32>, vector<84x80xf32>, vector<10x80xf32> -> vector<10x80xf32>
    %114 = arith.addf %105, %113 : vector<10x80xf32>
    %c4_98 = arith.constant 4 : index
    %c0_99 = arith.constant 0 : index
    %115 = vector.load %arg13[%c4_98, %c0_99] : memref<14x84xf32, #tpu.memory_space<vmem>>, vector<10x84xf32>
    %c4_100 = arith.constant 4 : index
    %c0_101 = arith.constant 0 : index
    %c0_102 = arith.constant 0 : index
    %116 = vector.load %arg4[%c4_100, %c0_101, %c0_102] : memref<10x84x80xf32, #tpu.memory_space<vmem>>, vector<1x84x80xf32>
    %117 = vector.shape_cast %116 : vector<1x84x80xf32> to vector<84x80xf32>
    %cst_103 = arith.constant dense<0.000000e+00> : vector<10x80xf32>
    %118 = tpu.matmul %115, %117, %cst_103 {dimension_numbers = #tpu.dot_dimension_numbers<[1], [0], [0], [1], [0, 0, 1, 1], [], []>} : vector<10x84xf32>, vector<84x80xf32>, vector<10x80xf32> -> vector<10x80xf32>
    %119 = arith.addf %110, %118 : vector<10x80xf32>
    %c9_104 = arith.constant 9 : index
    %c0_105 = arith.constant 0 : index
    %c0_106 = arith.constant 0 : index
    %120 = vector.load %arg4[%c9_104, %c0_105, %c0_106] : memref<10x84x80xf32, #tpu.memory_space<vmem>>, vector<1x84x80xf32>
    %121 = vector.shape_cast %120 : vector<1x84x80xf32> to vector<84x80xf32>
    %cst_107 = arith.constant dense<0.000000e+00> : vector<10x80xf32>
    %122 = tpu.matmul %115, %121, %cst_107 {dimension_numbers = #tpu.dot_dimension_numbers<[1], [0], [0], [1], [0, 0, 1, 1], [], []>} : vector<10x84xf32>, vector<84x80xf32>, vector<10x80xf32> -> vector<10x80xf32>
    %123 = arith.addf %114, %122 : vector<10x80xf32>
    %124 = arith.maximumf %119, %123 : vector<10x80xf32>
    %125 = vector.broadcast %1 : vector<1x80xf32> to vector<10x80xf32>
    %126 = arith.addf %124, %125 : vector<10x80xf32>
    %cst_108 = arith.constant 0.000000e+00 : f32
    %127 = vector.broadcast %cst_108 : f32 to vector<10x80xf32>
    %128 = arith.maximumf %126, %127 : vector<10x80xf32>
    %129 = tpu.iota {dimensions = array<i32: 0>} : vector<5x10xi32>
    %130 = tpu.iota {dimensions = array<i32: 1>} : vector<5x10xi32>
    %c2_i32_109 = arith.constant 2 : i32
    %131 = vector.broadcast %c2_i32_109 : i32 to vector<5x10xi32>
    %132 = arith.muli %131, %129 : vector<5x10xi32>
    %133 = arith.cmpi eq, %130, %132 : vector<5x10xi32>
    %134 = arith.extui %133 : vector<5x10xi1> to vector<5x10xi32>
    %135 = arith.sitofp %134 : vector<5x10xi32> to vector<5x10xf32>
    %c2_i32_110 = arith.constant 2 : i32
    %136 = vector.broadcast %c2_i32_110 : i32 to vector<5x10xi32>
    %137 = arith.muli %136, %129 : vector<5x10xi32>
    %c1_i32_111 = arith.constant 1 : i32
    %138 = vector.broadcast %c1_i32_111 : i32 to vector<5x10xi32>
    %139 = arith.addi %137, %138 : vector<5x10xi32>
    %140 = arith.cmpi eq, %130, %139 : vector<5x10xi32>
    %141 = arith.extui %140 : vector<5x10xi1> to vector<5x10xi32>
    %142 = arith.sitofp %141 : vector<5x10xi32> to vector<5x10xf32>
    %cst_112 = arith.constant dense<0.000000e+00> : vector<5x80xf32>
    %143 = tpu.matmul %135, %128, %cst_112 {dimension_numbers = #tpu.dot_dimension_numbers<[1], [0], [0], [1], [0, 0, 1, 1], [], []>} : vector<5x10xf32>, vector<10x80xf32>, vector<5x80xf32> -> vector<5x80xf32>
    %cst_113 = arith.constant dense<0.000000e+00> : vector<5x80xf32>
    %144 = tpu.matmul %142, %128, %cst_113 {dimension_numbers = #tpu.dot_dimension_numbers<[1], [0], [0], [1], [0, 0, 1, 1], [], []>} : vector<5x10xf32>, vector<10x80xf32>, vector<5x80xf32> -> vector<5x80xf32>
    %145 = arith.maximumf %143, %144 : vector<5x80xf32>
    %c0_114 = arith.constant 0 : index
    %c0_115 = arith.constant 0 : index
    %146 = vector.load %arg14[%c0_114, %c0_115] : memref<5x80xf32, #tpu.memory_space<vmem>>, vector<5x80xf32>
    tpu.vector_store %arg14[%c0_114, %c0_115], %145 {strides = array<i32>} : memref<5x80xf32, #tpu.memory_space<vmem>>, vector<5x80xf32>,
    %c0_116 = arith.constant 0 : index
    %c0_117 = arith.constant 0 : index
    %147 = vector.load %arg14[%c0_116, %c0_117] : memref<5x80xf32, #tpu.memory_space<vmem>>, vector<1x80xf32>
    %c0_118 = arith.constant 0 : index
    %c0_119 = arith.constant 0 : index
    %148 = vector.load %arg15[%c0_118, %c0_119] : memref<2x400xf32, #tpu.memory_space<vmem>>, vector<1x80xf32>
    tpu.vector_store %arg15[%c0_118, %c0_119], %147 {strides = array<i32>} : memref<2x400xf32, #tpu.memory_space<vmem>>, vector<1x80xf32>,
    %c1_120 = arith.constant 1 : index
    %c0_121 = arith.constant 0 : index
    %149 = vector.load %arg14[%c1_120, %c0_121] : memref<5x80xf32, #tpu.memory_space<vmem>>, vector<1x80xf32>
    %c0_122 = arith.constant 0 : index
    %c80 = arith.constant 80 : index
    %150 = vector.load %arg15[%c0_122, %c80] : memref<2x400xf32, #tpu.memory_space<vmem>>, vector<1x80xf32>
    tpu.vector_store %arg15[%c0_122, %c80], %149 {strides = array<i32>} : memref<2x400xf32, #tpu.memory_space<vmem>>, vector<1x80xf32>,
    %c2_123 = arith.constant 2 : index
    %c0_124 = arith.constant 0 : index
    %151 = vector.load %arg14[%c2_123, %c0_124] : memref<5x80xf32, #tpu.memory_space<vmem>>, vector<1x80xf32>
    %c0_125 = arith.constant 0 : index
    %c160 = arith.constant 160 : index
    %152 = vector.load %arg15[%c0_125, %c160] : memref<2x400xf32, #tpu.memory_space<vmem>>, vector<1x80xf32>
    tpu.vector_store %arg15[%c0_125, %c160], %151 {strides = array<i32>} : memref<2x400xf32, #tpu.memory_space<vmem>>, vector<1x80xf32>,
    %c3_126 = arith.constant 3 : index
    %c0_127 = arith.constant 0 : index
    %153 = vector.load %arg14[%c3_126, %c0_127] : memref<5x80xf32, #tpu.memory_space<vmem>>, vector<1x80xf32>
    %c0_128 = arith.constant 0 : index
    %c240 = arith.constant 240 : index
    %154 = vector.load %arg15[%c0_128, %c240] : memref<2x400xf32, #tpu.memory_space<vmem>>, vector<1x80xf32>
    tpu.vector_store %arg15[%c0_128, %c240], %153 {strides = array<i32>} : memref<2x400xf32, #tpu.memory_space<vmem>>, vector<1x80xf32>,
    %c4_129 = arith.constant 4 : index
    %c0_130 = arith.constant 0 : index
    %155 = vector.load %arg14[%c4_129, %c0_130] : memref<5x80xf32, #tpu.memory_space<vmem>>, vector<1x80xf32>
    %c0_131 = arith.constant 0 : index
    %c320 = arith.constant 320 : index
    %156 = vector.load %arg15[%c0_131, %c320] : memref<2x400xf32, #tpu.memory_space<vmem>>, vector<1x80xf32>
    tpu.vector_store %arg15[%c0_131, %c320], %155 {strides = array<i32>} : memref<2x400xf32, #tpu.memory_space<vmem>>, vector<1x80xf32>,
    %cst_132 = arith.constant 0.000000e+00 : f32
    %157 = vector.broadcast %cst_132 : f32 to vector<28x84xf32>
    %cst_133 = arith.constant 0.000000e+00 : f32
    %158 = vector.broadcast %cst_133 : f32 to vector<28x84xf32>
    %c1_134 = arith.constant 1 : index
    %c0_135 = arith.constant 0 : index
    %c0_136 = arith.constant 0 : index
    %159 = vector.load %arg1[%c1_134, %c0_135, %c0_136] : memref<2x32x32xf32, #tpu.memory_space<vmem>>, vector<1x28x32xf32>
    %160 = vector.shape_cast %159 : vector<1x28x32xf32> to vector<28x32xf32>
    %c0_137 = arith.constant 0 : index
    %c0_138 = arith.constant 0 : index
    %c0_139 = arith.constant 0 : index
    %161 = vector.load %arg2[%c0_137, %c0_138, %c0_139] : memref<10x32x84xf32, #tpu.memory_space<vmem>>, vector<1x32x84xf32>
    %162 = vector.shape_cast %161 : vector<1x32x84xf32> to vector<32x84xf32>
    %cst_140 = arith.constant dense<0.000000e+00> : vector<28x84xf32>
    %163 = tpu.matmul %160, %162, %cst_140 {dimension_numbers = #tpu.dot_dimension_numbers<[1], [0], [0], [1], [0, 0, 1, 1], [], []>} : vector<28x32xf32>, vector<32x84xf32>, vector<28x84xf32> -> vector<28x84xf32>
    %164 = arith.addf %157, %163 : vector<28x84xf32>
    %c5_141 = arith.constant 5 : index
    %c0_142 = arith.constant 0 : index
    %c0_143 = arith.constant 0 : index
    %165 = vector.load %arg2[%c5_141, %c0_142, %c0_143] : memref<10x32x84xf32, #tpu.memory_space<vmem>>, vector<1x32x84xf32>
    %166 = vector.shape_cast %165 : vector<1x32x84xf32> to vector<32x84xf32>
    %cst_144 = arith.constant dense<0.000000e+00> : vector<28x84xf32>
    %167 = tpu.matmul %160, %166, %cst_144 {dimension_numbers = #tpu.dot_dimension_numbers<[1], [0], [0], [1], [0, 0, 1, 1], [], []>} : vector<28x32xf32>, vector<32x84xf32>, vector<28x84xf32> -> vector<28x84xf32>
    %168 = arith.addf %158, %167 : vector<28x84xf32>
    %c1_145 = arith.constant 1 : index
    %c1_146 = arith.constant 1 : index
    %c0_147 = arith.constant 0 : index
    %169 = vector.load %arg1[%c1_145, %c1_146, %c0_147] : memref<2x32x32xf32, #tpu.memory_space<vmem>>, vector<1x28x32xf32>
    %170 = vector.shape_cast %169 : vector<1x28x32xf32> to vector<28x32xf32>
    %c1_148 = arith.constant 1 : index
    %c0_149 = arith.constant 0 : index
    %c0_150 = arith.constant 0 : index
    %171 = vector.load %arg2[%c1_148, %c0_149, %c0_150] : memref<10x32x84xf32, #tpu.memory_space<vmem>>, vector<1x32x84xf32>
    %172 = vector.shape_cast %171 : vector<1x32x84xf32> to vector<32x84xf32>
    %cst_151 = arith.constant dense<0.000000e+00> : vector<28x84xf32>
    %173 = tpu.matmul %170, %172, %cst_151 {dimension_numbers = #tpu.dot_dimension_numbers<[1], [0], [0], [1], [0, 0, 1, 1], [], []>} : vector<28x32xf32>, vector<32x84xf32>, vector<28x84xf32> -> vector<28x84xf32>
    %174 = arith.addf %164, %173 : vector<28x84xf32>
    %c6_152 = arith.constant 6 : index
    %c0_153 = arith.constant 0 : index
    %c0_154 = arith.constant 0 : index
    %175 = vector.load %arg2[%c6_152, %c0_153, %c0_154] : memref<10x32x84xf32, #tpu.memory_space<vmem>>, vector<1x32x84xf32>
    %176 = vector.shape_cast %175 : vector<1x32x84xf32> to vector<32x84xf32>
    %cst_155 = arith.constant dense<0.000000e+00> : vector<28x84xf32>
    %177 = tpu.matmul %170, %176, %cst_155 {dimension_numbers = #tpu.dot_dimension_numbers<[1], [0], [0], [1], [0, 0, 1, 1], [], []>} : vector<28x32xf32>, vector<32x84xf32>, vector<28x84xf32> -> vector<28x84xf32>
    %178 = arith.addf %168, %177 : vector<28x84xf32>
    %c1_156 = arith.constant 1 : index
    %c2_157 = arith.constant 2 : index
    %c0_158 = arith.constant 0 : index
    %179 = vector.load %arg1[%c1_156, %c2_157, %c0_158] : memref<2x32x32xf32, #tpu.memory_space<vmem>>, vector<1x28x32xf32>
    %180 = vector.shape_cast %179 : vector<1x28x32xf32> to vector<28x32xf32>
    %c2_159 = arith.constant 2 : index
    %c0_160 = arith.constant 0 : index
    %c0_161 = arith.constant 0 : index
    %181 = vector.load %arg2[%c2_159, %c0_160, %c0_161] : memref<10x32x84xf32, #tpu.memory_space<vmem>>, vector<1x32x84xf32>
    %182 = vector.shape_cast %181 : vector<1x32x84xf32> to vector<32x84xf32>
    %cst_162 = arith.constant dense<0.000000e+00> : vector<28x84xf32>
    %183 = tpu.matmul %180, %182, %cst_162 {dimension_numbers = #tpu.dot_dimension_numbers<[1], [0], [0], [1], [0, 0, 1, 1], [], []>} : vector<28x32xf32>, vector<32x84xf32>, vector<28x84xf32> -> vector<28x84xf32>
    %184 = arith.addf %174, %183 : vector<28x84xf32>
    %c7_163 = arith.constant 7 : index
    %c0_164 = arith.constant 0 : index
    %c0_165 = arith.constant 0 : index
    %185 = vector.load %arg2[%c7_163, %c0_164, %c0_165] : memref<10x32x84xf32, #tpu.memory_space<vmem>>, vector<1x32x84xf32>
    %186 = vector.shape_cast %185 : vector<1x32x84xf32> to vector<32x84xf32>
    %cst_166 = arith.constant dense<0.000000e+00> : vector<28x84xf32>
    %187 = tpu.matmul %180, %186, %cst_166 {dimension_numbers = #tpu.dot_dimension_numbers<[1], [0], [0], [1], [0, 0, 1, 1], [], []>} : vector<28x32xf32>, vector<32x84xf32>, vector<28x84xf32> -> vector<28x84xf32>
    %188 = arith.addf %178, %187 : vector<28x84xf32>
    %c1_167 = arith.constant 1 : index
    %c3_168 = arith.constant 3 : index
    %c0_169 = arith.constant 0 : index
    %189 = vector.load %arg1[%c1_167, %c3_168, %c0_169] : memref<2x32x32xf32, #tpu.memory_space<vmem>>, vector<1x28x32xf32>
    %190 = vector.shape_cast %189 : vector<1x28x32xf32> to vector<28x32xf32>
    %c3_170 = arith.constant 3 : index
    %c0_171 = arith.constant 0 : index
    %c0_172 = arith.constant 0 : index
    %191 = vector.load %arg2[%c3_170, %c0_171, %c0_172] : memref<10x32x84xf32, #tpu.memory_space<vmem>>, vector<1x32x84xf32>
    %192 = vector.shape_cast %191 : vector<1x32x84xf32> to vector<32x84xf32>
    %cst_173 = arith.constant dense<0.000000e+00> : vector<28x84xf32>
    %193 = tpu.matmul %190, %192, %cst_173 {dimension_numbers = #tpu.dot_dimension_numbers<[1], [0], [0], [1], [0, 0, 1, 1], [], []>} : vector<28x32xf32>, vector<32x84xf32>, vector<28x84xf32> -> vector<28x84xf32>
    %194 = arith.addf %184, %193 : vector<28x84xf32>
    %c8_174 = arith.constant 8 : index
    %c0_175 = arith.constant 0 : index
    %c0_176 = arith.constant 0 : index
    %195 = vector.load %arg2[%c8_174, %c0_175, %c0_176] : memref<10x32x84xf32, #tpu.memory_space<vmem>>, vector<1x32x84xf32>
    %196 = vector.shape_cast %195 : vector<1x32x84xf32> to vector<32x84xf32>
    %cst_177 = arith.constant dense<0.000000e+00> : vector<28x84xf32>
    %197 = tpu.matmul %190, %196, %cst_177 {dimension_numbers = #tpu.dot_dimension_numbers<[1], [0], [0], [1], [0, 0, 1, 1], [], []>} : vector<28x32xf32>, vector<32x84xf32>, vector<28x84xf32> -> vector<28x84xf32>
    %198 = arith.addf %188, %197 : vector<28x84xf32>
    %c1_178 = arith.constant 1 : index
    %c4_179 = arith.constant 4 : index
    %c0_180 = arith.constant 0 : index
    %199 = vector.load %arg1[%c1_178, %c4_179, %c0_180] : memref<2x32x32xf32, #tpu.memory_space<vmem>>, vector<1x28x32xf32>
    %200 = vector.shape_cast %199 : vector<1x28x32xf32> to vector<28x32xf32>
    %c4_181 = arith.constant 4 : index
    %c0_182 = arith.constant 0 : index
    %c0_183 = arith.constant 0 : index
    %201 = vector.load %arg2[%c4_181, %c0_182, %c0_183] : memref<10x32x84xf32, #tpu.memory_space<vmem>>, vector<1x32x84xf32>
    %202 = vector.shape_cast %201 : vector<1x32x84xf32> to vector<32x84xf32>
    %cst_184 = arith.constant dense<0.000000e+00> : vector<28x84xf32>
    %203 = tpu.matmul %200, %202, %cst_184 {dimension_numbers = #tpu.dot_dimension_numbers<[1], [0], [0], [1], [0, 0, 1, 1], [], []>} : vector<28x32xf32>, vector<32x84xf32>, vector<28x84xf32> -> vector<28x84xf32>
    %204 = arith.addf %194, %203 : vector<28x84xf32>
    %c9_185 = arith.constant 9 : index
    %c0_186 = arith.constant 0 : index
    %c0_187 = arith.constant 0 : index
    %205 = vector.load %arg2[%c9_185, %c0_186, %c0_187] : memref<10x32x84xf32, #tpu.memory_space<vmem>>, vector<1x32x84xf32>
    %206 = vector.shape_cast %205 : vector<1x32x84xf32> to vector<32x84xf32>
    %cst_188 = arith.constant dense<0.000000e+00> : vector<28x84xf32>
    %207 = tpu.matmul %200, %206, %cst_188 {dimension_numbers = #tpu.dot_dimension_numbers<[1], [0], [0], [1], [0, 0, 1, 1], [], []>} : vector<28x32xf32>, vector<32x84xf32>, vector<28x84xf32> -> vector<28x84xf32>
    %208 = arith.addf %198, %207 : vector<28x84xf32>
    %209 = arith.maximumf %204, %208 : vector<28x84xf32>
    %210 = vector.broadcast %0 : vector<1x84xf32> to vector<28x84xf32>
    %211 = arith.addf %209, %210 : vector<28x84xf32>
    %cst_189 = arith.constant 0.000000e+00 : f32
    %212 = vector.broadcast %cst_189 : f32 to vector<28x84xf32>
    %213 = arith.maximumf %211, %212 : vector<28x84xf32>
    %214 = tpu.iota {dimensions = array<i32: 0>} : vector<14x28xi32>
    %215 = tpu.iota {dimensions = array<i32: 1>} : vector<14x28xi32>
    %c2_i32_190 = arith.constant 2 : i32
    %216 = vector.broadcast %c2_i32_190 : i32 to vector<14x28xi32>
    %217 = arith.muli %216, %214 : vector<14x28xi32>
    %218 = arith.cmpi eq, %215, %217 : vector<14x28xi32>
    %219 = arith.extui %218 : vector<14x28xi1> to vector<14x28xi32>
    %220 = arith.sitofp %219 : vector<14x28xi32> to vector<14x28xf32>
    %c2_i32_191 = arith.constant 2 : i32
    %221 = vector.broadcast %c2_i32_191 : i32 to vector<14x28xi32>
    %222 = arith.muli %221, %214 : vector<14x28xi32>
    %c1_i32_192 = arith.constant 1 : i32
    %223 = vector.broadcast %c1_i32_192 : i32 to vector<14x28xi32>
    %224 = arith.addi %222, %223 : vector<14x28xi32>
    %225 = arith.cmpi eq, %215, %224 : vector<14x28xi32>
    %226 = arith.extui %225 : vector<14x28xi1> to vector<14x28xi32>
    %227 = arith.sitofp %226 : vector<14x28xi32> to vector<14x28xf32>
    %cst_193 = arith.constant dense<0.000000e+00> : vector<14x84xf32>
    %228 = tpu.matmul %220, %213, %cst_193 {dimension_numbers = #tpu.dot_dimension_numbers<[1], [0], [0], [1], [0, 0, 1, 1], [], []>} : vector<14x28xf32>, vector<28x84xf32>, vector<14x84xf32> -> vector<14x84xf32>
    %cst_194 = arith.constant dense<0.000000e+00> : vector<14x84xf32>
    %229 = tpu.matmul %227, %213, %cst_194 {dimension_numbers = #tpu.dot_dimension_numbers<[1], [0], [0], [1], [0, 0, 1, 1], [], []>} : vector<14x28xf32>, vector<28x84xf32>, vector<14x84xf32> -> vector<14x84xf32>
    %230 = arith.maximumf %228, %229 : vector<14x84xf32>
    %c0_195 = arith.constant 0 : index
    %c0_196 = arith.constant 0 : index
    %231 = vector.load %arg13[%c0_195, %c0_196] : memref<14x84xf32, #tpu.memory_space<vmem>>, vector<14x84xf32>
    tpu.vector_store %arg13[%c0_195, %c0_196], %230 {strides = array<i32>} : memref<14x84xf32, #tpu.memory_space<vmem>>, vector<14x84xf32>,
    %cst_197 = arith.constant 0.000000e+00 : f32
    %232 = vector.broadcast %cst_197 : f32 to vector<10x80xf32>
    %cst_198 = arith.constant 0.000000e+00 : f32
    %233 = vector.broadcast %cst_198 : f32 to vector<10x80xf32>
    %c0_199 = arith.constant 0 : index
    %c0_200 = arith.constant 0 : index
    %234 = vector.load %arg13[%c0_199, %c0_200] : memref<14x84xf32, #tpu.memory_space<vmem>>, vector<10x84xf32>
    %c0_201 = arith.constant 0 : index
    %c0_202 = arith.constant 0 : index
    %c0_203 = arith.constant 0 : index
    %235 = vector.load %arg4[%c0_201, %c0_202, %c0_203] : memref<10x84x80xf32, #tpu.memory_space<vmem>>, vector<1x84x80xf32>
    %236 = vector.shape_cast %235 : vector<1x84x80xf32> to vector<84x80xf32>
    %cst_204 = arith.constant dense<0.000000e+00> : vector<10x80xf32>
    %237 = tpu.matmul %234, %236, %cst_204 {dimension_numbers = #tpu.dot_dimension_numbers<[1], [0], [0], [1], [0, 0, 1, 1], [], []>} : vector<10x84xf32>, vector<84x80xf32>, vector<10x80xf32> -> vector<10x80xf32>
    %238 = arith.addf %232, %237 : vector<10x80xf32>
    %c5_205 = arith.constant 5 : index
    %c0_206 = arith.constant 0 : index
    %c0_207 = arith.constant 0 : index
    %239 = vector.load %arg4[%c5_205, %c0_206, %c0_207] : memref<10x84x80xf32, #tpu.memory_space<vmem>>, vector<1x84x80xf32>
    %240 = vector.shape_cast %239 : vector<1x84x80xf32> to vector<84x80xf32>
    %cst_208 = arith.constant dense<0.000000e+00> : vector<10x80xf32>
    %241 = tpu.matmul %234, %240, %cst_208 {dimension_numbers = #tpu.dot_dimension_numbers<[1], [0], [0], [1], [0, 0, 1, 1], [], []>} : vector<10x84xf32>, vector<84x80xf32>, vector<10x80xf32> -> vector<10x80xf32>
    %242 = arith.addf %233, %241 : vector<10x80xf32>
    %c1_209 = arith.constant 1 : index
    %c0_210 = arith.constant 0 : index
    %243 = vector.load %arg13[%c1_209, %c0_210] : memref<14x84xf32, #tpu.memory_space<vmem>>, vector<10x84xf32>
    %c1_211 = arith.constant 1 : index
    %c0_212 = arith.constant 0 : index
    %c0_213 = arith.constant 0 : index
    %244 = vector.load %arg4[%c1_211, %c0_212, %c0_213] : memref<10x84x80xf32, #tpu.memory_space<vmem>>, vector<1x84x80xf32>
    %245 = vector.shape_cast %244 : vector<1x84x80xf32> to vector<84x80xf32>
    %cst_214 = arith.constant dense<0.000000e+00> : vector<10x80xf32>
    %246 = tpu.matmul %243, %245, %cst_214 {dimension_numbers = #tpu.dot_dimension_numbers<[1], [0], [0], [1], [0, 0, 1, 1], [], []>} : vector<10x84xf32>, vector<84x80xf32>, vector<10x80xf32> -> vector<10x80xf32>
    %247 = arith.addf %238, %246 : vector<10x80xf32>
    %c6_215 = arith.constant 6 : index
    %c0_216 = arith.constant 0 : index
    %c0_217 = arith.constant 0 : index
    %248 = vector.load %arg4[%c6_215, %c0_216, %c0_217] : memref<10x84x80xf32, #tpu.memory_space<vmem>>, vector<1x84x80xf32>
    %249 = vector.shape_cast %248 : vector<1x84x80xf32> to vector<84x80xf32>
    %cst_218 = arith.constant dense<0.000000e+00> : vector<10x80xf32>
    %250 = tpu.matmul %243, %249, %cst_218 {dimension_numbers = #tpu.dot_dimension_numbers<[1], [0], [0], [1], [0, 0, 1, 1], [], []>} : vector<10x84xf32>, vector<84x80xf32>, vector<10x80xf32> -> vector<10x80xf32>
    %251 = arith.addf %242, %250 : vector<10x80xf32>
    %c2_219 = arith.constant 2 : index
    %c0_220 = arith.constant 0 : index
    %252 = vector.load %arg13[%c2_219, %c0_220] : memref<14x84xf32, #tpu.memory_space<vmem>>, vector<10x84xf32>
    %c2_221 = arith.constant 2 : index
    %c0_222 = arith.constant 0 : index
    %c0_223 = arith.constant 0 : index
    %253 = vector.load %arg4[%c2_221, %c0_222, %c0_223] : memref<10x84x80xf32, #tpu.memory_space<vmem>>, vector<1x84x80xf32>
    %254 = vector.shape_cast %253 : vector<1x84x80xf32> to vector<84x80xf32>
    %cst_224 = arith.constant dense<0.000000e+00> : vector<10x80xf32>
    %255 = tpu.matmul %252, %254, %cst_224 {dimension_numbers = #tpu.dot_dimension_numbers<[1], [0], [0], [1], [0, 0, 1, 1], [], []>} : vector<10x84xf32>, vector<84x80xf32>, vector<10x80xf32> -> vector<10x80xf32>
    %256 = arith.addf %247, %255 : vector<10x80xf32>
    %c7_225 = arith.constant 7 : index
    %c0_226 = arith.constant 0 : index
    %c0_227 = arith.constant 0 : index
    %257 = vector.load %arg4[%c7_225, %c0_226, %c0_227] : memref<10x84x80xf32, #tpu.memory_space<vmem>>, vector<1x84x80xf32>
    %258 = vector.shape_cast %257 : vector<1x84x80xf32> to vector<84x80xf32>
    %cst_228 = arith.constant dense<0.000000e+00> : vector<10x80xf32>
    %259 = tpu.matmul %252, %258, %cst_228 {dimension_numbers = #tpu.dot_dimension_numbers<[1], [0], [0], [1], [0, 0, 1, 1], [], []>} : vector<10x84xf32>, vector<84x80xf32>, vector<10x80xf32> -> vector<10x80xf32>
    %260 = arith.addf %251, %259 : vector<10x80xf32>
    %c3_229 = arith.constant 3 : index
    %c0_230 = arith.constant 0 : index
    %261 = vector.load %arg13[%c3_229, %c0_230] : memref<14x84xf32, #tpu.memory_space<vmem>>, vector<10x84xf32>
    %c3_231 = arith.constant 3 : index
    %c0_232 = arith.constant 0 : index
    %c0_233 = arith.constant 0 : index
    %262 = vector.load %arg4[%c3_231, %c0_232, %c0_233] : memref<10x84x80xf32, #tpu.memory_space<vmem>>, vector<1x84x80xf32>
    %263 = vector.shape_cast %262 : vector<1x84x80xf32> to vector<84x80xf32>
    %cst_234 = arith.constant dense<0.000000e+00> : vector<10x80xf32>
    %264 = tpu.matmul %261, %263, %cst_234 {dimension_numbers = #tpu.dot_dimension_numbers<[1], [0], [0], [1], [0, 0, 1, 1], [], []>} : vector<10x84xf32>, vector<84x80xf32>, vector<10x80xf32> -> vector<10x80xf32>
    %265 = arith.addf %256, %264 : vector<10x80xf32>
    %c8_235 = arith.constant 8 : index
    %c0_236 = arith.constant 0 : index
    %c0_237 = arith.constant 0 : index
    %266 = vector.load %arg4[%c8_235, %c0_236, %c0_237] : memref<10x84x80xf32, #tpu.memory_space<vmem>>, vector<1x84x80xf32>
    %267 = vector.shape_cast %266 : vector<1x84x80xf32> to vector<84x80xf32>
    %cst_238 = arith.constant dense<0.000000e+00> : vector<10x80xf32>
    %268 = tpu.matmul %261, %267, %cst_238 {dimension_numbers = #tpu.dot_dimension_numbers<[1], [0], [0], [1], [0, 0, 1, 1], [], []>} : vector<10x84xf32>, vector<84x80xf32>, vector<10x80xf32> -> vector<10x80xf32>
    %269 = arith.addf %260, %268 : vector<10x80xf32>
    %c4_239 = arith.constant 4 : index
    %c0_240 = arith.constant 0 : index
    %270 = vector.load %arg13[%c4_239, %c0_240] : memref<14x84xf32, #tpu.memory_space<vmem>>, vector<10x84xf32>
    %c4_241 = arith.constant 4 : index
    %c0_242 = arith.constant 0 : index
    %c0_243 = arith.constant 0 : index
    %271 = vector.load %arg4[%c4_241, %c0_242, %c0_243] : memref<10x84x80xf32, #tpu.memory_space<vmem>>, vector<1x84x80xf32>
    %272 = vector.shape_cast %271 : vector<1x84x80xf32> to vector<84x80xf32>
    %cst_244 = arith.constant dense<0.000000e+00> : vector<10x80xf32>
    %273 = tpu.matmul %270, %272, %cst_244 {dimension_numbers = #tpu.dot_dimension_numbers<[1], [0], [0], [1], [0, 0, 1, 1], [], []>} : vector<10x84xf32>, vector<84x80xf32>, vector<10x80xf32> -> vector<10x80xf32>
    %274 = arith.addf %265, %273 : vector<10x80xf32>
    %c9_245 = arith.constant 9 : index
    %c0_246 = arith.constant 0 : index
    %c0_247 = arith.constant 0 : index
    %275 = vector.load %arg4[%c9_245, %c0_246, %c0_247] : memref<10x84x80xf32, #tpu.memory_space<vmem>>, vector<1x84x80xf32>
    %276 = vector.shape_cast %275 : vector<1x84x80xf32> to vector<84x80xf32>
    %cst_248 = arith.constant dense<0.000000e+00> : vector<10x80xf32>
    %277 = tpu.matmul %270, %276, %cst_248 {dimension_numbers = #tpu.dot_dimension_numbers<[1], [0], [0], [1], [0, 0, 1, 1], [], []>} : vector<10x84xf32>, vector<84x80xf32>, vector<10x80xf32> -> vector<10x80xf32>
    %278 = arith.addf %269, %277 : vector<10x80xf32>
    %279 = arith.maximumf %274, %278 : vector<10x80xf32>
    %280 = vector.broadcast %1 : vector<1x80xf32> to vector<10x80xf32>
    %281 = arith.addf %279, %280 : vector<10x80xf32>
    %cst_249 = arith.constant 0.000000e+00 : f32
    %282 = vector.broadcast %cst_249 : f32 to vector<10x80xf32>
    %283 = arith.maximumf %281, %282 : vector<10x80xf32>
    %284 = tpu.iota {dimensions = array<i32: 0>} : vector<5x10xi32>
    %285 = tpu.iota {dimensions = array<i32: 1>} : vector<5x10xi32>
    %c2_i32_250 = arith.constant 2 : i32
    %286 = vector.broadcast %c2_i32_250 : i32 to vector<5x10xi32>
    %287 = arith.muli %286, %284 : vector<5x10xi32>
    %288 = arith.cmpi eq, %285, %287 : vector<5x10xi32>
    %289 = arith.extui %288 : vector<5x10xi1> to vector<5x10xi32>
    %290 = arith.sitofp %289 : vector<5x10xi32> to vector<5x10xf32>
    %c2_i32_251 = arith.constant 2 : i32
    %291 = vector.broadcast %c2_i32_251 : i32 to vector<5x10xi32>
    %292 = arith.muli %291, %284 : vector<5x10xi32>
    %c1_i32_252 = arith.constant 1 : i32
    %293 = vector.broadcast %c1_i32_252 : i32 to vector<5x10xi32>
    %294 = arith.addi %292, %293 : vector<5x10xi32>
    %295 = arith.cmpi eq, %285, %294 : vector<5x10xi32>
    %296 = arith.extui %295 : vector<5x10xi1> to vector<5x10xi32>
    %297 = arith.sitofp %296 : vector<5x10xi32> to vector<5x10xf32>
    %cst_253 = arith.constant dense<0.000000e+00> : vector<5x80xf32>
    %298 = tpu.matmul %290, %283, %cst_253 {dimension_numbers = #tpu.dot_dimension_numbers<[1], [0], [0], [1], [0, 0, 1, 1], [], []>} : vector<5x10xf32>, vector<10x80xf32>, vector<5x80xf32> -> vector<5x80xf32>
    %cst_254 = arith.constant dense<0.000000e+00> : vector<5x80xf32>
    %299 = tpu.matmul %297, %283, %cst_254 {dimension_numbers = #tpu.dot_dimension_numbers<[1], [0], [0], [1], [0, 0, 1, 1], [], []>} : vector<5x10xf32>, vector<10x80xf32>, vector<5x80xf32> -> vector<5x80xf32>
    %300 = arith.maximumf %298, %299 : vector<5x80xf32>
    %c0_255 = arith.constant 0 : index
    %c0_256 = arith.constant 0 : index
    %301 = vector.load %arg14[%c0_255, %c0_256] : memref<5x80xf32, #tpu.memory_space<vmem>>, vector<5x80xf32>
    tpu.vector_store %arg14[%c0_255, %c0_256], %300 {strides = array<i32>} : memref<5x80xf32, #tpu.memory_space<vmem>>, vector<5x80xf32>,
    %c0_257 = arith.constant 0 : index
    %c0_258 = arith.constant 0 : index
    %302 = vector.load %arg14[%c0_257, %c0_258] : memref<5x80xf32, #tpu.memory_space<vmem>>, vector<1x80xf32>
    %c1_259 = arith.constant 1 : index
    %c0_260 = arith.constant 0 : index
    %303 = vector.load %arg15[%c1_259, %c0_260] : memref<2x400xf32, #tpu.memory_space<vmem>>, vector<1x80xf32>
    tpu.vector_store %arg15[%c1_259, %c0_260], %302 {strides = array<i32>} : memref<2x400xf32, #tpu.memory_space<vmem>>, vector<1x80xf32>,
    %c1_261 = arith.constant 1 : index
    %c0_262 = arith.constant 0 : index
    %304 = vector.load %arg14[%c1_261, %c0_262] : memref<5x80xf32, #tpu.memory_space<vmem>>, vector<1x80xf32>
    %c1_263 = arith.constant 1 : index
    %c80_264 = arith.constant 80 : index
    %305 = vector.load %arg15[%c1_263, %c80_264] : memref<2x400xf32, #tpu.memory_space<vmem>>, vector<1x80xf32>
    tpu.vector_store %arg15[%c1_263, %c80_264], %304 {strides = array<i32>} : memref<2x400xf32, #tpu.memory_space<vmem>>, vector<1x80xf32>,
    %c2_265 = arith.constant 2 : index
    %c0_266 = arith.constant 0 : index
    %306 = vector.load %arg14[%c2_265, %c0_266] : memref<5x80xf32, #tpu.memory_space<vmem>>, vector<1x80xf32>
    %c1_267 = arith.constant 1 : index
    %c160_268 = arith.constant 160 : index
    %307 = vector.load %arg15[%c1_267, %c160_268] : memref<2x400xf32, #tpu.memory_space<vmem>>, vector<1x80xf32>
    tpu.vector_store %arg15[%c1_267, %c160_268], %306 {strides = array<i32>} : memref<2x400xf32, #tpu.memory_space<vmem>>, vector<1x80xf32>,
    %c3_269 = arith.constant 3 : index
    %c0_270 = arith.constant 0 : index
    %308 = vector.load %arg14[%c3_269, %c0_270] : memref<5x80xf32, #tpu.memory_space<vmem>>, vector<1x80xf32>
    %c1_271 = arith.constant 1 : index
    %c240_272 = arith.constant 240 : index
    %309 = vector.load %arg15[%c1_271, %c240_272] : memref<2x400xf32, #tpu.memory_space<vmem>>, vector<1x80xf32>
    tpu.vector_store %arg15[%c1_271, %c240_272], %308 {strides = array<i32>} : memref<2x400xf32, #tpu.memory_space<vmem>>, vector<1x80xf32>,
    %c4_273 = arith.constant 4 : index
    %c0_274 = arith.constant 0 : index
    %310 = vector.load %arg14[%c4_273, %c0_274] : memref<5x80xf32, #tpu.memory_space<vmem>>, vector<1x80xf32>
    %c1_275 = arith.constant 1 : index
    %c320_276 = arith.constant 320 : index
    %311 = vector.load %arg15[%c1_275, %c320_276] : memref<2x400xf32, #tpu.memory_space<vmem>>, vector<1x80xf32>
    tpu.vector_store %arg15[%c1_275, %c320_276], %310 {strides = array<i32>} : memref<2x400xf32, #tpu.memory_space<vmem>>, vector<1x80xf32>,
    %c0_277 = arith.constant 0 : index
    %c0_278 = arith.constant 0 : index
    %312 = vector.load %arg15[%c0_277, %c0_278] : memref<2x400xf32, #tpu.memory_space<vmem>>, vector<2x400xf32>
    %c0_279 = arith.constant 0 : index
    %c0_280 = arith.constant 0 : index
    %313 = vector.load %arg6[%c0_279, %c0_280] : memref<400x128xf32, #tpu.memory_space<vmem>>, vector<400x128xf32>
    %cst_281 = arith.constant dense<0.000000e+00> : vector<2x128xf32>
    %314 = tpu.matmul %312, %313, %cst_281 {dimension_numbers = #tpu.dot_dimension_numbers<[1], [0], [0], [1], [0, 0, 1, 1], [], []>} : vector<2x400xf32>, vector<400x128xf32>, vector<2x128xf32> -> vector<2x128xf32>
    %c0_282 = arith.constant 0 : index
    %c0_283 = arith.constant 0 : index
    %315 = vector.load %arg7[%c0_282, %c0_283] : memref<1x128xf32, #tpu.memory_space<vmem>>, vector<1x128xf32>
    %316 = vector.broadcast %315 : vector<1x128xf32> to vector<2x128xf32>
    %317 = arith.addf %314, %316 : vector<2x128xf32>
    %cst_284 = arith.constant 0.000000e+00 : f32
    %318 = vector.broadcast %cst_284 : f32 to vector<2x128xf32>
    %319 = arith.maximumf %317, %318 : vector<2x128xf32>
    %c0_285 = arith.constant 0 : index
    %c0_286 = arith.constant 0 : index
    %320 = vector.load %arg8[%c0_285, %c0_286] : memref<128x128xf32, #tpu.memory_space<vmem>>, vector<128x128xf32>
    %cst_287 = arith.constant dense<0.000000e+00> : vector<2x128xf32>
    %321 = tpu.matmul %319, %320, %cst_287 {dimension_numbers = #tpu.dot_dimension_numbers<[1], [0], [0], [1], [0, 0, 1, 1], [], []>} : vector<2x128xf32>, vector<128x128xf32>, vector<2x128xf32> -> vector<2x128xf32>
    %c0_288 = arith.constant 0 : index
    %c0_289 = arith.constant 0 : index
    %322 = vector.load %arg9[%c0_288, %c0_289] : memref<1x128xf32, #tpu.memory_space<vmem>>, vector<1x128xf32>
    %323 = vector.broadcast %322 : vector<1x128xf32> to vector<2x128xf32>
    %324 = arith.addf %321, %323 : vector<2x128xf32>
    %cst_290 = arith.constant 0.000000e+00 : f32
    %325 = vector.broadcast %cst_290 : f32 to vector<2x128xf32>
    %326 = arith.maximumf %324, %325 : vector<2x128xf32>
    %c0_291 = arith.constant 0 : index
    %c0_292 = arith.constant 0 : index
    %327 = vector.load %arg10[%c0_291, %c0_292] : memref<128x128xf32, #tpu.memory_space<vmem>>, vector<128x128xf32>
    %cst_293 = arith.constant dense<0.000000e+00> : vector<2x128xf32>
    %328 = tpu.matmul %326, %327, %cst_293 {dimension_numbers = #tpu.dot_dimension_numbers<[1], [0], [0], [1], [0, 0, 1, 1], [], []>} : vector<2x128xf32>, vector<128x128xf32>, vector<2x128xf32> -> vector<2x128xf32>
    %c0_294 = arith.constant 0 : index
    %c0_295 = arith.constant 0 : index
    %329 = vector.load %arg11[%c0_294, %c0_295] : memref<1x128xf32, #tpu.memory_space<vmem>>, vector<1x128xf32>
    %330 = vector.broadcast %329 : vector<1x128xf32> to vector<2x128xf32>
    %331 = arith.addf %328, %330 : vector<2x128xf32>
    %c0_296 = arith.constant 0 : index
    %c0_297 = arith.constant 0 : index
    %332 = vector.load %arg12[%c0_296, %c0_297] : memref<2x128xf32, #tpu.memory_space<vmem>>, vector<2x128xf32>
    tpu.vector_store %arg12[%c0_296, %c0_297], %331 {strides = array<i32>} : memref<2x128xf32, #tpu.memory_space<vmem>>, vector<2x128xf32>,
    return
  }
  func.func @transform_0(%arg0: i32) -> (i32, i32, i32) {
    %c0_i32 = arith.constant 0 : i32
    %c0_i32_0 = arith.constant 0 : i32
    %c0_i32_1 = arith.constant 0 : i32
    return %arg0, %c0_i32, %c0_i32_0 : i32, i32, i32
  }
  func.func @transform_1(%arg0: i32) -> (i32, i32, i32) {
    %c0_i32 = arith.constant 0 : i32
    %c0_i32_0 = arith.constant 0 : i32
    %c0_i32_1 = arith.constant 0 : i32
    %c0_i32_2 = arith.constant 0 : i32
    return %c0_i32, %c0_i32_0, %c0_i32_1 : i32, i32, i32
  }
  func.func @transform_2(%arg0: i32) -> (i32, i32) {
    %c0_i32 = arith.constant 0 : i32
    %c0_i32_0 = arith.constant 0 : i32
    %c0_i32_1 = arith.constant 0 : i32
    return %c0_i32, %c0_i32_0 : i32, i32
  }
  func.func @transform_3(%arg0: i32) -> (i32, i32, i32) {
    %c0_i32 = arith.constant 0 : i32
    %c0_i32_0 = arith.constant 0 : i32
    %c0_i32_1 = arith.constant 0 : i32
    %c0_i32_2 = arith.constant 0 : i32
    return %c0_i32, %c0_i32_0, %c0_i32_1 : i32, i32, i32
  }
  func.func @transform_4(%arg0: i32) -> (i32, i32) {
    %c0_i32 = arith.constant 0 : i32
    %c0_i32_0 = arith.constant 0 : i32
    %c0_i32_1 = arith.constant 0 : i32
    return %c0_i32, %c0_i32_0 : i32, i32
  }
  func.func @transform_5(%arg0: i32) -> (i32, i32) {
    %c0_i32 = arith.constant 0 : i32
    %c0_i32_0 = arith.constant 0 : i32
    %c0_i32_1 = arith.constant 0 : i32
    return %c0_i32, %c0_i32_0 : i32, i32
  }
  func.func @transform_6(%arg0: i32) -> (i32, i32) {
    %c0_i32 = arith.constant 0 : i32
    %c0_i32_0 = arith.constant 0 : i32
    %c0_i32_1 = arith.constant 0 : i32
    return %c0_i32, %c0_i32_0 : i32, i32
  }
  func.func @transform_7(%arg0: i32) -> (i32, i32) {
    %c0_i32 = arith.constant 0 : i32
    %c0_i32_0 = arith.constant 0 : i32
    %c0_i32_1 = arith.constant 0 : i32
    return %c0_i32, %c0_i32_0 : i32, i32
  }
  func.func @transform_8(%arg0: i32) -> (i32, i32) {
    %c0_i32 = arith.constant 0 : i32
    %c0_i32_0 = arith.constant 0 : i32
    %c0_i32_1 = arith.constant 0 : i32
    return %c0_i32, %c0_i32_0 : i32, i32
  }
  func.func @transform_9(%arg0: i32) -> (i32, i32) {
    %c0_i32 = arith.constant 0 : i32
    %c0_i32_0 = arith.constant 0 : i32
    %c0_i32_1 = arith.constant 0 : i32
    return %c0_i32, %c0_i32_0 : i32, i32
  }
  func.func @transform_10(%arg0: i32) -> (i32, i32) {
    %c0_i32 = arith.constant 0 : i32
    %c0_i32_0 = arith.constant 0 : i32
    %c0_i32_1 = arith.constant 0 : i32
    return %c0_i32, %c0_i32_0 : i32, i32
  }
  func.func @transform_11(%arg0: i32) -> (i32, i32) {
    %c0_i32 = arith.constant 0 : i32
    %c0_i32_0 = arith.constant 0 : i32
    return %arg0, %c0_i32 : i32, i32
  }
}

</mosaic_0001>

<bundles_post_ra>
// kernel: tile.13
= control target key start
LH: loop header
LB: loop body
LE: loop exit
PB: predicated region body
PF: predicated region fallthrough
CT: control target
= control target key end

     0   :  { %s28_s0 = inlined_call_operand.vmem [shape: f32[6], index: 0, kind: input, shape index: {}]   ;;  %s29_s1 = inlined_call_operand.vmem [shape: f32[14,6], index: 1, kind: output, shape index: {}]  }
   0x1   :  { %v4_v0 = vld [vmem:[%s28_s0] ss:$0 sm:$0xff] }
   0x2   :  { %5 = vst [vmem:[%s29_s1] sm:$0xff] %v4_v0  ;;  %8 = vst [vmem:[%s29_s1 + $0x8] sm:$0xff] %v4_v0 }

// kernel: tile.14
= control target key start
LH: loop header
LB: loop body
LE: loop exit
PB: predicated region body
PF: predicated region fallthrough
CT: control target
= control target key end

     0   :  { %s115_s10 = smov 78   ;;  %s116_s11 = smov 66   ;;  %vm3_vm0 = vcmask 48128   ;;  %vm9_vm1 = vcmask 687728   ;;  %vm15_vm2 = vcmask 638528   ;;  %vm21_vm3 = vcmask 589328   ;;  %s183_s0 = inlined_call_operand.vmem [shape: f32[14,6], index: 0, kind: input, shape index: {}]   ;;  %s184_s1 = inlined_call_operand.vmem [shape: f32[1,84], index: 1, kind: output, shape index: {}]  }
   0x1   :  { %v89_v0 = vld [vmem:[%s183_s0 + $0xd] sm:$0x1]   ;;  %v91_v1 = vld [vmem:[%s183_s0 + $0xb] sm:$0x1]   ;;  %v90_v2 = vld [vmem:[%s183_s0 + $0xc] sm:$0x1]  }
   0x2   :  { %7 = vrot.lane.b32.xlu0 %v89_v0, %s115_s10  ;;  %19 = vrot.lane.b32.xlu1 %v91_v1, %s116_s11  ;;  %v92_v3 = vld [vmem:[%s183_s0 + $0xa] sm:$0x1]   ;;  %s117_s16 = smov 72   ;;  %s118_s17 = smov 60   ;;  %v93_v4 = vld [vmem:[%s183_s0 + $0x9] sm:$0x1]  }
   0x3   :  { %v94_v5 = vld [vmem:[%s183_s0 + $0x8] sm:$0x1]   ;;  %v2_v6 = vld [vmem:[%s183_s0] sm:$0x1]   ;;  %s119_s24 = smov 54   ;;  %s120_s25 = smov 48  }
   0x4   :  { %4 = vst.msk [vmem:[#allocation0] sm:$0x1] %vm3_vm0, %v2_v6   ;;  %v95_v7 = vld [vmem:[%s183_s0 + $0x7] sm:$0x1]   ;;  %v96_v8 = vld [vmem:[%s183_s0 + $0x6] sm:$0x1]  }
   0x5   :  { %s121_s30 = smov 42   ;;  %s122_s2 = smov 36   ;;  %v97_v9 = vld [vmem:[%s183_s0 + $0x5] sm:$0x1]   ;;  %v98_v10 = vld [vmem:[%s183_s0 + $0x4] sm:$0x1]  }
   0x6   :  { %13 = vrot.lane.b32.xlu0 %v90_v2, %s117_s16  ;;  %25 = vrot.lane.b32.xlu1 %v92_v3, %s118_s17  ;;  %s123_s7 = smov 30   ;;  %s124_s8 = smov 24   ;;  %v99_v11 = vld [vmem:[%s183_s0 + $0x3] sm:$0x1]   ;;  %v100_v12 = vld [vmem:[%s183_s0 + $0x2] sm:$0x1]  }
   0x7   :  { %s125_s13 = smov 18   ;;  %s126_s14 = smov 12   ;;  %v101_v13 = vld [vmem:[%s183_s0 + $0x1] sm:$0x1]   ;;  %vm27_vm4 = vcmask 540128   ;;  %vm33_vm5 = vcmask 490928  }
   0x8   :  { %s127_s0 = smov 6   ;;  %vm39_vm6 = vcmask 441728   ;;  %vm45_vm7 = vcmask 392528   ;;  %vm51_vm8 = vcmask 343328   ;;  %vm57_vm9 = vcmask 294128  }
   0x9   :  { %vm63_vm10 = vcmask 244928   ;;  %vm69_vm11 = vcmask 195728   ;;  %vm75_vm12 = vcmask 146528   ;;  %vm81_vm13 = vcmask 97328  }
   0xa   :  { %31 = vrot.lane.b32.xlu0 %v93_v4, %s119_s24  ;;  %37 = vrot.lane.b32.xlu1 %v94_v5, %s120_s25 }
   0xe   :  { %43 = vrot.lane.b32.xlu0 %v95_v7, %s121_s30  ;;  %49 = vrot.lane.b32.xlu1 %v96_v8, %s122_s2 }
  0x12   :  { %55 = vrot.lane.b32.xlu0 %v97_v9, %s123_s7  ;;  %61 = vrot.lane.b32.xlu1 %v98_v10, %s124_s8 }
  0x16   :  { %67 = vrot.lane.b32.xlu0 %v99_v11, %s125_s13  ;;  %73 = vrot.lane.b32.xlu1 %v100_v12, %s126_s14 }
  0x1a   :  { %79 = vrot.lane.b32.xlu0 %v101_v13, %s127_s0 }
  0x74   :  { %v8_v14 = vpop.permute.xlu0 %7   ;;  %v20_v15 = vpop.permute.xlu1 %19  }
  0x75   :  { %10 = vst.msk [vmem:[#allocation0] sm:$0x1] %vm9_vm1, %v8_v14  }
  0x78   :  { %v14_v16 = vpop.permute.xlu0 %13   ;;  %v26_v17 = vpop.permute.xlu1 %25  }
  0x79   :  { %16 = vst.msk [vmem:[#allocation0] sm:$0x1] %vm15_vm2, %v14_v16  }
  0x7a   :  { %22 = vst.msk [vmem:[#allocation0] sm:$0x1] %vm21_vm3, %v20_v15  }
  0x7b   :  { %28 = vst.msk [vmem:[#allocation0] sm:$0x1] %vm27_vm4, %v26_v17  }
  0x7c   :  { %v32_v18 = vpop.permute.xlu0 %31   ;;  %v38_v19 = vpop.permute.xlu1 %37  }
  0x7d   :  { %34 = vst.msk [vmem:[#allocation0] sm:$0x1] %vm33_vm5, %v32_v18  }
  0x7e   :  { %40 = vst.msk [vmem:[#allocation0] sm:$0x1] %vm39_vm6, %v38_v19  }
  0x80   :  { %v44_v20 = vpop.permute.xlu0 %43   ;;  %v50_v21 = vpop.permute.xlu1 %49  }
  0x81   :  { %46 = vst.msk [vmem:[#allocation0] sm:$0x1] %vm45_vm7, %v44_v20  }
  0x82   :  { %52 = vst.msk [vmem:[#allocation0] sm:$0x1] %vm51_vm8, %v50_v21  }
  0x84   :  { %v56_v22 = vpop.permute.xlu0 %55   ;;  %v62_v23 = vpop.permute.xlu1 %61  }
  0x85   :  { %58 = vst.msk [vmem:[#allocation0] sm:$0x1] %vm57_vm9, %v56_v22  }
  0x86   :  { %64 = vst.msk [vmem:[#allocation0] sm:$0x1] %vm63_vm10, %v62_v23  }
  0x88   :  { %v68_v24 = vpop.permute.xlu0 %67   ;;  %v74_v25 = vpop.permute.xlu1 %73  }
  0x89   :  { %70 = vst.msk [vmem:[#allocation0] sm:$0x1] %vm69_vm11, %v68_v24  }
  0x8a   :  { %76 = vst.msk [vmem:[#allocation0] sm:$0x1] %vm75_vm12, %v74_v25  }
  0x8c   :  { %v80_v26 = vpop.permute.xlu0 %79  }
  0x8d   :  { %82 = vst.msk [vmem:[#allocation0] sm:$0x1] %vm81_vm13, %v80_v26  }
  0x94   :  { %v86_v27 = vld [vmem:[#allocation0] sm:$0x1] }
  0x95   :  { %88 = vst [vmem:[%s184_s1] sm:$0x1] %v86_v27 }

// kernel: tile.18
= control target key start
LH: loop header
LB: loop body
LE: loop exit
PB: predicated region body
PF: predicated region fallthrough
CT: control target
= control target key end

     0   :  { %s22_s0 = inlined_call_operand.vmem [shape: f32[16], index: 0, kind: input, shape index: {}]   ;;  %s23_s1 = inlined_call_operand.vmem [shape: f32[5,16], index: 1, kind: output, shape index: {}]  }
   0x1   :  { %v4_v0 = vld [vmem:[%s22_s0] ss:$0 sm:$0xff] }
   0x2   :  { %5 = vst [vmem:[%s23_s1] sm:$0xff] %v4_v0 }

// kernel: tile.19
= control target key start
LH: loop header
LB: loop body
LE: loop exit
PB: predicated region body
PF: predicated region fallthrough
CT: control target
= control target key end

     0   :  { %s43_s10 = smov 64   ;;  %s44_s11 = smov 32   ;;  %vm3_vm0 = vcmask 130048   ;;  %vm9_vm1 = vcmask 654848   ;;  %vm15_vm2 = vcmask 523648   ;;  %vm21_vm3 = vcmask 392448   ;;  %s75_s0 = inlined_call_operand.vmem [shape: f32[5,16], index: 0, kind: input, shape index: {}]   ;;  %s76_s1 = inlined_call_operand.vmem [shape: f32[1,80], index: 1, kind: output, shape index: {}]  }
   0x1   :  { %v35_v0 = vld [vmem:[%s75_s0 + $0x4] sm:$0x1]   ;;  %v37_v1 = vld [vmem:[%s75_s0 + $0x2] sm:$0x1]   ;;  %v36_v2 = vld [vmem:[%s75_s0 + $0x3] sm:$0x1]  }
   0x2   :  { %7 = vrot.lane.b32.xlu0 %v35_v0, %s43_s10  ;;  %19 = vrot.lane.b32.xlu1 %v37_v1, %s44_s11  ;;  %v38_v3 = vld [vmem:[%s75_s0 + $0x1] sm:$0x1]   ;;  %v2_v4 = vld [vmem:[%s75_s0] sm:$0x1]   ;;  %s45_s0 = smov 48   ;;  %s46_s18 = smov 16  }
   0x3   :  { %4 = vst.msk [vmem:[#allocation0] sm:$0x1] %vm3_vm0, %v2_v4   ;;  %vm27_vm4 = vcmask 261248  }
   0x6   :  { %13 = vrot.lane.b32.xlu0 %v36_v2, %s45_s0  ;;  %25 = vrot.lane.b32.xlu1 %v38_v3, %s46_s18 }
  0x74   :  { %v8_v5 = vpop.permute.xlu0 %7   ;;  %v20_v6 = vpop.permute.xlu1 %19  }
  0x75   :  { %10 = vst.msk [vmem:[#allocation0] sm:$0x1] %vm9_vm1, %v8_v5  }
  0x78   :  { %v14_v7 = vpop.permute.xlu0 %13   ;;  %v26_v8 = vpop.permute.xlu1 %25  }
  0x79   :  { %16 = vst.msk [vmem:[#allocation0] sm:$0x1] %vm15_vm2, %v14_v7  }
  0x7a   :  { %22 = vst.msk [vmem:[#allocation0] sm:$0x1] %vm21_vm3, %v20_v6  }
  0x7b   :  { %28 = vst.msk [vmem:[#allocation0] sm:$0x1] %vm27_vm4, %v26_v8  }
  0x82   :  { %v32_v9 = vld [vmem:[#allocation0] sm:$0x1] }
  0x83   :  { %34 = vst [vmem:[%s76_s1] sm:$0x1] %v32_v9 }

// kernel: simple_classifier_forward.1
= control target key start
LH: loop header
LB: loop body
LE: loop exit
PB: predicated region body
PF: predicated region fallthrough
CT: control target
= control target key end

     0   :  { %vm63_vm0 = vcmask 261120   ;;  %s9651_s0 = inlined_call_operand.vmem [shape: f32[2,32,32], index: 0, kind: input, shape index: {}]   ;;  %s9652_s1 = inlined_call_operand.vmem [shape: f32[10,32,84], index: 1, kind: input, shape index: {}]   ;;  %s9653_s2 = inlined_call_operand.vmem [shape: f32[1,84], index: 2, kind: input, shape index: {}]   ;;  %s9654_s3 = inlined_call_operand.vmem [shape: f32[10,84,80], index: 3, kind: input, shape index: {}]   ;;  %s9655_s4 = inlined_call_operand.vmem [shape: f32[1,80], index: 4, kind: input, shape index: {}]   ;;  %s9656_s5 = inlined_call_operand.vmem [shape: f32[400,128], index: 5, kind: input, shape index: {}]   ;;  %s9657_s6 = inlined_call_operand.vmem [shape: f32[1,128], index: 6, kind: input, shape index: {}]   ;;  %s9658_s7 = inlined_call_operand.vmem [shape: f32[128,128], index: 7, kind: input, shape index: {}]   ;;  %s9659_s8 = inlined_call_operand.vmem [shape: f32[1,128], index: 8, kind: input, shape index: {}]   ;;  %s9660_s9 = inlined_call_operand.vmem [shape: f32[128,128], index: 9, kind: input, shape index: {}]   ;;  %s9661_s10 = inlined_call_operand.vmem [shape: f32[1,128], index: 10, kind: input, shape index: {}]   ;;  %s9662_s11 = inlined_call_operand.hbm [shape: f32[2,128], index: 11, kind: output, shape index: {}]  }
   0x1   :  { %v5192_v0 = vld [vmem:[%s9652_s1 + $0x20] sm:$0xff]  ;;  %v5193_v1 = vld [vmem:[%s9652_s1 + $0x28] sm:$0xff]  ;;  %v5194_v5 = vld [vmem:[%s9652_s1 + $0x30] sm:$0xff] }
   0x2   :  { %v5204_v2 = vld [vmem:[%s9652_s1 + $0xc0] sm:$0xff]  ;;  %v7103_v3 = vpack.c.bf16 %v5193_v1, %v5192_v0  ;;  %v5205_v4 = vld [vmem:[%s9652_s1 + $0xc8] sm:$0xff]  ;;  %v5195_v6 = vld [vmem:[%s9652_s1 + $0x38] sm:$0xff] }
   0x3   :  { %v7119_v7 = vpack.c.bf16 %v5205_v4, %v5204_v2  ;;  %v7107_v8 = vpack.c.bf16 %v5195_v6, %v5194_v5  ;;  %v5206_v9 = vld [vmem:[%s9652_s1 + $0xd0] sm:$0xff]  ;;  %v5207_v10 = vld [vmem:[%s9652_s1 + $0xd8] sm:$0xff]  ;;  %v54_v11 = vld [vmem:[%s9651_s0 + $0x1] sm:$0xff] }
   0x4   :  { %7104 = vmatprep.subr.bf16.mxu0 %v7103_v3  ;;  %v7123_v12 = vpack.c.bf16 %v5207_v10, %v5206_v9  ;;  %6189 = vmatprep.mubr.msk.f32.mxu0 %vm63_vm0, %v54_v11  ;;  %v45_v13 = vld [vmem:[%s9652_s1] sm:$0xff]  ;;  %v46_v14 = vld [vmem:[%s9652_s1 + $0x8] sm:$0xff]  ;;  %v47_v19 = vld [vmem:[%s9652_s1 + $0x10] sm:$0xff] }
   0x5   :  { %7120 = vmatprep.subr.bf16.mxu1 %v7119_v7  ;;  %7106 = vmatpush3.bf16.msra.mxu0 %v7103_v3  ;;  %v5188_v15 = vld [vmem:[%s9652_s1 + $0xa0] sm:$0xff]  ;;  %v5189_v16 = vld [vmem:[%s9652_s1 + $0xa8] sm:$0xff]  ;;  %v7111_v17 = vpack.c.bf16 %v46_v14, %v45_v13  ;;  %v48_v20 = vld [vmem:[%s9652_s1 + $0x18] sm:$0xff] }
   0x6   :  { %7122 = vmatpush3.bf16.msra.mxu1 %v7119_v7  ;;  %7108 = vmatprep.subr.bf16.mxu0 %v7107_v8  ;;  %v7127_v18 = vpack.c.bf16 %v5189_v16, %v5188_v15  ;;  %v55_v21 = vld [vmem:[%s9651_s0 + $0x9] sm:$0xff]  ;;  %v5191_v23 = vld [vmem:[%s9652_s1 + $0xb8] sm:$0xff]  ;;  %v7115_v25 = vpack.c.bf16 %v48_v20, %v47_v19  ;;  %v5216_v27 = vld [vmem:[%s9652_s1 + $0x40] sm:$0xff] }
   0x7   :  { %7124 = vmatprep.subr.bf16.mxu1 %v7123_v12  ;;  %6217 = vmatprep.mubr.msk.f32.mxu1 %vm63_vm0, %v54_v11  ;;  %v5190_v22 = vld [vmem:[%s9652_s1 + $0xb0] sm:$0xff]  ;;  %v5217_v28 = vld [vmem:[%s9652_s1 + $0x48] sm:$0xff]  ;;  %v57_v29 = vld [vmem:[%s9651_s0 + $0x19] sm:$0xf] }
   0x8   :  { %v56_v24 = vld [vmem:[%s9651_s0 + $0x11] sm:$0xff]  ;;  %v7131_v26 = vpack.c.bf16 %v5191_v23, %v5190_v22  ;;  %v5224_v30 = vld [vmem:[%s9652_s1 + $0xe0] sm:$0xff]  ;;  %v5225_v31 = vld [vmem:[%s9652_s1 + $0xe8] sm:$0xff]  ;;  %v7135_v33 = vpack.c.bf16 %v5217_v28, %v5216_v27 }
   0x9   :  { %7110 = vmatpush3.bf16.msra.mxu0 %v7107_v8  ;;  %v41_v32 = vld [vmem:[%s9651_s0] sm:$0xff]  ;;  %v7143_v34 = vpack.c.bf16 %v5225_v31, %v5224_v30  ;;  %v5218_v35 = vld [vmem:[%s9652_s1 + $0x50] sm:$0xff]  ;;  %v5219_v36 = vld [vmem:[%s9652_s1 + $0x58] sm:$0xff] }
   0xa   :  { %7126 = vmatpush3.bf16.msra.mxu1 %v7123_v12  ;;  %7112 = vmatprep.subr.bf16.mxu0 %v7111_v17  ;;  %v42_v37 = vld [vmem:[%s9651_s0 + $0x8] sm:$0xff]  ;;  %v5226_v38 = vld [vmem:[%s9652_s1 + $0xf0] sm:$0xff]  ;;  %v5227_v39 = vld [vmem:[%s9652_s1 + $0xf8] sm:$0xff]  ;;  %v7139_v41 = vpack.c.bf16 %v5219_v36, %v5218_v35 }
   0xb   :  { %7128 = vmatprep.subr.bf16.mxu1 %v7127_v18  ;;  %v43_v40 = vld [vmem:[%s9651_s0 + $0x10] sm:$0xff]  ;;  %v44_v42 = vld [vmem:[%s9651_s0 + $0x18] sm:$0xf]  ;;  %v7147_v43 = vpack.c.bf16 %v5227_v39, %v5226_v38  ;;  %v5232_v44 = vld [vmem:[%s9652_s1 + $0x60] sm:$0xff] }
   0xc   :  { %6190 = vmatmul.mubr.msk.f32.vlgmr.msra.gmra.mrb[0].mxu0 %vm63_vm0, %v55_v21  ;;  %v5233_v45 = vld [vmem:[%s9652_s1 + $0x68] sm:$0xff]  ;;  %v5240_v46 = vld [vmem:[%s9652_s1 + $0x100] sm:$0xff] }
   0xd   :  { %6218 = vmatmul.mubr.msk.f32.vlgmr.msra.gmra.mrb[0].mxu1 %vm63_vm0, %v55_v21  ;;  %7114 = vmatpush3.bf16.msra.mxu0 %v7111_v17  ;;  %v5241_v47 = vld [vmem:[%s9652_s1 + $0x108] sm:$0xff] }
   0xe   :  { %7130 = vmatpush3.bf16.msra.mxu1 %v7127_v18  ;;  %6192 = vmatprep.mubr.msk.f32.mxu0 %vm63_vm0, %v56_v24 }
   0xf   :  { %6220 = vmatprep.mubr.msk.f32.mxu1 %vm63_vm0, %v56_v24  ;;  %7116 = vmatprep.subr.bf16.mxu0 %v7115_v25 }
  0x10   :  { %6193 = vmatmul.mubr.msk.f32.gmra.mrb[2].mxu0 %vm63_vm0, %v57_v29  ;;  %7132 = vmatprep.subr.bf16.mxu1 %v7131_v26 }
  0x11   :  { %6221 = vmatmul.mubr.msk.f32.gmra.mrb[2].mxu1 %vm63_vm0, %v57_v29  ;;  %7118 = vmatpush3.bf16.msra.mxu0 %v7115_v25 }
  0x12   :  { %7134 = vmatpush3.bf16.msra.mxu1 %v7131_v26  ;;  %6203 = vmatprep.mubr.msk.f32.mxu0 %vm63_vm0, %v41_v32 }
  0x13   :  { %6231 = vmatprep.mubr.msk.f32.mxu1 %vm63_vm0, %v41_v32  ;;  %7136 = vmatprep.subr.bf16.mxu0 %v7135_v33 }
  0x14   :  { %6204 = vmatmul.mubr.msk.f32.vlgmr.msra.gmra.mrb[0].mxu0 %vm63_vm0, %v42_v37  ;;  %7144 = vmatprep.subr.bf16.mxu1 %v7143_v34 }
  0x15   :  { %6232 = vmatmul.mubr.msk.f32.vlgmr.msra.gmra.mrb[0].mxu1 %vm63_vm0, %v42_v37  ;;  %7138 = vmatpush3.bf16.msra.mxu0 %v7135_v33 }
  0x16   :  { %16 = vsyncpa [#allocation6], 0  ;;  %7146 = vmatpush3.bf16.msra.mxu1 %v7143_v34  ;;  %6206 = vmatprep.mubr.msk.f32.mxu0 %vm63_vm0, %v43_v40  ;;  %v433_v48 = vld [vmem:[%s9651_s0 + $0x2] sm:$0xff]  ;;  %v7151_v49 = vpack.c.bf16 %v5233_v45, %v5232_v44  ;;  %v7159_v50 = vpack.c.bf16 %v5241_v47, %v5240_v46  ;;  %v5234_v51 = vld [vmem:[%s9652_s1 + $0x70] sm:$0xff]  ;;  %v1063_v16 = vlaneseq  ;;  %vm1084_vm2 = vcmask 228352   ;;  %s7964_s24 = smov 80  }
  0x17   :  { %6234 = vmatprep.mubr.msk.f32.mxu1 %vm63_vm0, %v43_v40  ;;  %7140 = vmatprep.subr.bf16.mxu0 %v7139_v41  ;;  %v5235_v52 = vld [vmem:[%s9652_s1 + $0x78] sm:$0xff]  ;;  %v434_v53 = vld [vmem:[%s9651_s0 + $0xa] sm:$0xff]  ;;  %v5248_v59 = vld [vmem:[%s9652_s1 + $0x80] sm:$0xff]  ;;  %v7959_v21 = vmov 0.0   ;;  %vm1091_vm4 = vcmask 1043456   ;;  %vm7960_vm5 = vmmov 1  }
  0x18   :  { %6207 = vmatmul.mubr.msk.f32.gmra.mrb[2].mxu0 %vm63_vm0, %v44_v42  ;;  %7148 = vmatprep.subr.bf16.mxu1 %v7147_v43  ;;  %v5242_v54 = vld [vmem:[%s9652_s1 + $0x110] sm:$0xff]  ;;  %v5243_v55 = vld [vmem:[%s9652_s1 + $0x118] sm:$0xff]  ;;  %v7155_v57 = vpack.c.bf16 %v5235_v52, %v5234_v51  ;;  %v5249_v60 = vld [vmem:[%s9652_s1 + $0x88] sm:$0xff]  ;;  %v8249_v17 = vshrl.u32 %v1063_v16, 7  ;;  %v1067_v19 = vand.u32 127, %v1063_v16  ;;  %vm1255_vm9 = vcmask 685056  }
  0x19   :  { %6235 = vmatmul.mubr.msk.f32.gmra.mrb[2].mxu1 %vm63_vm0, %v44_v42  ;;  %7142 = vmatpush3.bf16.msra.mxu0 %v7139_v41  ;;  %v435_v56 = vld [vmem:[%s9651_s0 + $0x12] sm:$0xff]  ;;  %v7163_v58 = vpack.c.bf16 %v5243_v55, %v5242_v54  ;;  %v436_v61 = vld [vmem:[%s9651_s0 + $0x1a] sm:$0xf]  ;;  %v5256_v62 = vld [vmem:[%s9652_s1 + $0x120] sm:$0xff]  ;;  %v7167_v1 = vpack.c.bf16 %v5249_v60, %v5248_v59  ;;  %vm1253_vm10 = vcmask 687104   ;;  %vm7962_vm11 = vmmov 0  }
  0x1a   :  { %7150 = vmatpush3.bf16.msra.mxu1 %v7147_v43  ;;  %6245 = vmatprep.mubr.msk.f32.mxu0 %vm63_vm0, %v433_v48  ;;  %v5257_v63 = vld [vmem:[%s9652_s1 + $0x128] sm:$0xff]  ;;  %v5250_v3 = vld [vmem:[%s9652_s1 + $0x90] sm:$0xff]  ;;  %v5251_v4 = vld [vmem:[%s9652_s1 + $0x98] sm:$0xff]  ;;  %v1068_v18 = vmul.u32 2, %v8249_v17  ;;  %v1065_v28 = vadd.s32 8, %v8249_v17  ;;  %vm2223_vm12 = vcmask 1041408  }
  0x1b   :  { %6259 = vmatprep.mubr.msk.f32.mxu1 %vm63_vm0, %v433_v48  ;;  %7152 = vmatprep.subr.bf16.mxu0 %v7151_v49  ;;  %v637_v0 = vld [vmem:[%s9651_s0 + $0x3] sm:$0xff]  ;;  %v7175_v2 = vpack.c.bf16 %v5257_v63, %v5256_v62  ;;  %v638_v5 = vld [vmem:[%s9651_s0 + $0xb] sm:$0xff]  ;;  %v5259_v7 = vld [vmem:[%s9652_s1 + $0x138] sm:$0xff]  ;;  %v7171_v9 = vpack.c.bf16 %v5251_v4, %v5250_v3  ;;  %vm2220_vm14 = vcmask 80896   ;;  %vm2370_vm15 = vcmask 651264   ;;  %s7965_s25 = smov 64  }
  0x1c   :  { %6246 = vmatmul.mubr.msk.f32.vlgmr.msra.gmra.mrb[0].mxu0 %vm63_vm0, %v434_v53  ;;  %7160 = vmatprep.subr.bf16.mxu1 %v7159_v50  ;;  %v5258_v6 = vld [vmem:[%s9652_s1 + $0x130] sm:$0xff]  ;;  %v640_v11 = vld [vmem:[%s9651_s0 + $0x1b] sm:$0xf]  ;;  %v841_v12 = vld [vmem:[%s9651_s0 + $0x4] sm:$0xff]  ;;  %v1076_v20 = vadd.s32 1, %v1068_v18  ;;  %vm1070_vm1 = vcmp.eq.s32.totalorder %v1067_v19, %v1068_v18  ;;  %v1069_v37 = vmul.u32 2, %v1065_v28 }
  0x1d   :  { %6260 = vmatmul.mubr.msk.f32.vlgmr.msra.gmra.mrb[0].mxu1 %vm63_vm0, %v434_v53  ;;  %7154 = vmatpush3.bf16.msra.mxu0 %v7151_v49  ;;  %v639_v8 = vld [vmem:[%s9651_s0 + $0x13] sm:$0xff]  ;;  %v7179_v10 = vpack.c.bf16 %v5259_v7, %v5258_v6  ;;  %v844_v15 = vld [vmem:[%s9651_s0 + $0x1c] sm:$0xf]  ;;  %v8253_v22 = vsel %vm1070_vm1, 1.0, %v7959_v21  ;;  %v5264_v25 = vld [vmem:[%s9653_s2] ss:$0 sm:$0xff] }
  0x1e   :  { %7162 = vmatpush3.bf16.msra.mxu1 %v7159_v50  ;;  %6248 = vmatprep.mubr.msk.f32.mxu0 %vm63_vm0, %v435_v56  ;;  %v842_v13 = vld [vmem:[%s9651_s0 + $0xc] sm:$0xff]  ;;  %v843_v14 = vld [vmem:[%s9651_s0 + $0x14] sm:$0xff]  ;;  %vm1078_vm3 = vcmp.eq.s32.totalorder %v1067_v19, %v1076_v20  ;;  %v1077_v46 = vadd.s32 1, %v1069_v37  ;;  %v5287_v49 = vld [vmem:[%s9654_s3 + $0x60] sm:$0xff]  ;;  %vm1071_vm7 = vcmp.eq.s32.totalorder %v1067_v19, %v1069_v37  ;;  %vm2373_vm1 = vcmask 647168   ;;  %s7966_s30 = smov 32  }
  0x1f   :  { %6262 = vmatprep.mubr.msk.f32.mxu1 %vm63_vm0, %v435_v56  ;;  %7156 = vmatprep.subr.bf16.mxu0 %v7155_v57  ;;  %v8256_v23 = vsel %vm1078_vm3, 1.0, %v7959_v21  ;;  %v5286_v47 = vld [vmem:[%s9654_s3 + $0x58] sm:$0xff]  ;;  %v5303_v50 = vld [vmem:[%s9654_s3 + $0x210] sm:$0xff]  ;;  %vm8280_vm6 = vmpackc.low %vm1091_vm4, %vm7960_vm5  ;;  %vm2391_vm3 = vcmask 256002   ;;  %s7968_s27 = smov [#allocation5]  }
  0x20   :  { %6249 = vmatmul.mubr.msk.f32.gmra.mrb[2].mxu0 %vm63_vm0, %v436_v61  ;;  %7164 = vmatprep.subr.bf16.mxu1 %v7163_v58  ;;  %v5304_v51 = vld [vmem:[%s9654_s3 + $0x218] sm:$0xff]  ;;  %vm1079_vm8 = vcmp.eq.s32.totalorder %v1067_v19, %v1077_v46  ;;  %v7203_v55 = vpack.c.bf16 %v5287_v49, %v5286_v47  ;;  %v5305_v59 = vld [vmem:[%s9654_s3 + $0x220] sm:$0xff]  ;;  %v5306_v60 = vld [vmem:[%s9654_s3 + $0x228] sm:$0xff]  ;;  %s5180_s28 = sshll.u32 %s7968_s27, 4  ;;  %s5181_s28 = int_to_ptr.vmem [resolvable:$true] %s5180_s28 }
  0x21   :  { %6263 = vmatmul.mubr.msk.f32.gmra.mrb[2].mxu1 %vm63_vm0, %v436_v61  ;;  %7158 = vmatpush3.bf16.msra.mxu0 %v7155_v57  ;;  %v7243_v56 = vpack.c.bf16 %v5304_v51, %v5303_v50  ;;  %v5288_v57 = vld [vmem:[%s9654_s3 + $0x68] sm:$0xff]  ;;  %v8305_v61 = vsel %vm1071_vm7, 1.0, %v7959_v21  ;;  %v8308_v62 = vsel %vm1079_vm8, 1.0, %v7959_v21  ;;  %v5307_v3 = vld [vmem:[%s9654_s3 + $0x230] sm:$0xff]  ;;  %v5308_v4 = vld [vmem:[%s9654_s3 + $0x238] sm:$0xff]  ;;  %vm2442_vm7 = vcmask 1040896   ;;  %p7940_p1 = scmp.lt.s32.totalorder %s5181_s28, %s5181_s28 }
  0x22   :  { %7166 = vmatpush3.bf16.msra.mxu1 %v7163_v58  ;;  %6273 = vmatprep.mubr.msk.f32.mxu0 %vm63_vm0, %v637_v0  ;;  %v5289_v58 = vld [vmem:[%s9654_s3 + $0x70] sm:$0xff]  ;;  %v7251_v6 = vpack.c.bf16 %v5308_v4, %v5307_v3  ;;  %v5292_v7 = vld [vmem:[%s9654_s3 + $0x88] sm:$0xff]  ;;  %v5312_v18 = vld [vmem:[%s9654_s3 + $0x258] sm:$0xff]  ;;  %vm2443_vm8 = vcmask 124930  }
  0x23   :  { %6287 = vmatprep.mubr.msk.f32.mxu1 %vm63_vm0, %v637_v0  ;;  %7168 = vmatprep.subr.bf16.mxu0 %v7167_v1  ;;  %v7207_v63 = vpack.c.bf16 %v5289_v58, %v5288_v57  ;;  %v7247_v0 = vpack.c.bf16 %v5306_v60, %v5305_v59  ;;  %v5296_v20 = vld [vmem:[%s9654_s3 + $0xa8] sm:$0xf]  ;;  %v1261_v37 = vld [vmem:[%s9654_s3 + $0x10] sm:$0xff]  ;;  %v5279_v47 = vld [vmem:[%s9654_s3 + $0x1d8] sm:$0xff] }
  0x24   :  { %6274 = vmatmul.mubr.msk.f32.vlgmr.msra.gmra.mrb[0].mxu0 %vm63_vm0, %v638_v5  ;;  %7176 = vmatprep.subr.bf16.mxu1 %v7175_v2  ;;  %v1267_v59 = vld [vmem:[%s9654_s3 + $0x40] sm:$0xff]  ;;  %v1268_v60 = vld [vmem:[%s9654_s3 + $0x48] sm:$0xff]  ;;  %v1269_v3 = vld [vmem:[%s9654_s3 + $0x50] sm:$0xf] }
  0x25   :  { %6288 = vmatmul.mubr.msk.f32.vlgmr.msra.gmra.mrb[0].mxu1 %vm63_vm0, %v638_v5  ;;  %7170 = vmatpush3.bf16.msra.mxu0 %v7167_v1  ;;  %v5290_v1 = vld [vmem:[%s9654_s3 + $0x78] sm:$0xff]  ;;  %v5285_v4 = vld [vmem:[%s9654_s3 + $0x208] sm:$0xf]  ;;  %vm8684_vm13 = vmpackc.low %vm2223_vm12, %vm7960_vm5  ;;  %vm2387_vm5 = vcmask 654336   ;;  %vm2439_vm12 = vcmask 523264  }
  0x26   :  { %7178 = vmatpush3.bf16.msra.mxu1 %v7175_v2  ;;  %6276 = vmatprep.mubr.msk.f32.mxu0 %vm63_vm0, %v639_v8  ;;  %v5291_v2 = vld [vmem:[%s9654_s3 + $0x80] sm:$0xff]  ;;  %v5548_v53 = vld [vmem:[%s9654_s3 + $0x238] sm:$0xff] }
  0x27   :  { %6290 = vmatprep.mubr.msk.f32.mxu1 %vm63_vm0, %v639_v8  ;;  %7172 = vmatprep.subr.bf16.mxu0 %v7171_v9  ;;  %v7211_v5 = vpack.c.bf16 %v5291_v2, %v5290_v1  ;;  %v5293_v8 = vld [vmem:[%s9654_s3 + $0x90] sm:$0xff]  ;;  %v7239_v1 = vpack.c.bf16 %v1268_v60, %v1267_v59  ;;  %v5366_v59 = vld [vmem:[%s9654_s3 + $0x2e0] sm:$0xff]  ;;  %v5367_v60 = vld [vmem:[%s9654_s3 + $0x2e8] sm:$0xff] }
  0x28   :  { %6277 = vmatmul.mubr.msk.f32.gmra.mrb[2].mxu0 %vm63_vm0, %v640_v11  ;;  %7180 = vmatprep.subr.bf16.mxu1 %v7179_v10 }
  0x29   :  { %6291 = vmatmul.mubr.msk.f32.gmra.mrb[2].mxu1 %vm63_vm0, %v640_v11  ;;  %7174 = vmatpush3.bf16.msra.mxu0 %v7171_v9  ;;  %v5309_v9 = vld [vmem:[%s9654_s3 + $0x240] sm:$0xff]  ;;  %v5310_v11 = vld [vmem:[%s9654_s3 + $0x248] sm:$0xff] }
  0x2a   :  { %7182 = vmatpush3.bf16.msra.mxu1 %v7179_v10  ;;  %6301 = vmatprep.mubr.msk.f32.mxu0 %vm63_vm0, %v841_v12  ;;  %v7215_v10 = vpack.c.bf16 %v5293_v8, %v5292_v7  ;;  %v5334_v7 = vld [vmem:[%s9654_s3 + $0x268] sm:$0xff]  ;;  %v5335_v8 = vld [vmem:[%s9654_s3 + $0x270] sm:$0xff] }
  0x2b   :  { %6315 = vmatprep.mubr.msk.f32.mxu1 %vm63_vm0, %v841_v12  ;;  %v7255_v12 = vpack.c.bf16 %v5310_v11, %v5309_v9  ;;  %v5322_v9 = vld [vmem:[%s9654_s3 + $0xc0] sm:$0xff]  ;;  %v7303_v11 = vpack.c.bf16 %v5335_v8, %v5334_v7  ;;  %v5356_v8 = vld [vmem:[%s9654_s3 + $0x148] sm:$0xff] }
  0x2c   :  { %6302 = vmatmul.mubr.msk.f32.vlgmr.msra.gmra.mrb[0].mxu0 %vm63_vm0, %v842_v13 }
  0x2d   :  { %6316 = vmatmul.mubr.msk.f32.vlgmr.msra.gmra.mrb[0].mxu1 %vm63_vm0, %v842_v13  ;;  %6304 = vmatprep.mubr.msk.f32.mxu0 %vm63_vm0, %v843_v14  ;;  %v5294_v13 = vld [vmem:[%s9654_s3 + $0x98] sm:$0xff] }
  0x2e   :  { %6318 = vmatprep.mubr.msk.f32.mxu1 %vm63_vm0, %v843_v14  ;;  %v5295_v14 = vld [vmem:[%s9654_s3 + $0xa0] sm:$0xff] }
  0x2f   :  { %v7219_v16 = vpack.c.bf16 %v5295_v14, %v5294_v13  ;;  %v5336_v13 = vld [vmem:[%s9654_s3 + $0x278] sm:$0xff]  ;;  %v5337_v14 = vld [vmem:[%s9654_s3 + $0x280] sm:$0xff] }
  0x30   :  { %6305 = vmatmul.mubr.msk.f32.gmra.mrb[2].mxu0 %vm63_vm0, %v844_v15 }
  0x31   :  { %6319 = vmatmul.mubr.msk.f32.gmra.mrb[2].mxu1 %vm63_vm0, %v844_v15  ;;  %6329 = vmatprep.mubr.msk.f32.mxu0 %vm1084_vm2, %v8253_v22  ;;  %v5311_v15 = vld [vmem:[%s9654_s3 + $0x250] sm:$0xff] }
  0x32   :  { %6340 = vmatprep.mubr.msk.f32.mxu1 %vm1084_vm2, %v8256_v23  ;;  %v7259_v19 = vpack.c.bf16 %v5312_v18, %v5311_v15  ;;  %v7307_v18 = vpack.c.bf16 %v5337_v14, %v5336_v13  ;;  %v5358_v14 = vld [vmem:[%s9654_s3 + $0x158] sm:$0xf] }
  0xff   :  { %v6303_v24 = vpop.f32.mrb[0].mxu0 }
 0x100   :  { %v6317_v26 = vpop.f32.mrb[0].mxu1  ;;  %v928_v27 = vpop.f32.mrb[1].mxu0 }
 0x101   :  { %v1046_v29 = vmax.f32 %v6303_v24, %v6317_v26  ;;  %v1022_v30 = vpop.f32.mrb[1].mxu1  ;;  %v5313_v24 = vld [vmem:[%s9654_s3 + $0x260] sm:$0xf]  ;;  %v1260_v26 = vld [vmem:[%s9654_s3 + $0x8] sm:$0xff] }
 0x102   :  { %v1045_v31 = vmax.f32 %v928_v27, %v1022_v30  ;;  %v5275_v27 = vld [vmem:[%s9654_s3 + $0x1b8] sm:$0xff] }
 0x103   :  { %v1056_v32 = vadd.f32 %v5264_v25, %v1046_v29  ;;  %v6306_v33 = vpop.f32.mrb[2].mxu0  ;;  %v5276_v29 = vld [vmem:[%s9654_s3 + $0x1c0] sm:$0xff] }
 0x104   :  { %v1055_v34 = vadd.f32 %v5264_v25, %v1045_v31  ;;  %v6320_v35 = vpop.f32.mrb[2].mxu1  ;;  %v938_v36 = vpop.f32.mrb[3].mxu0  ;;  %v7263_v30 = vpack.c.bf16 %v5276_v29, %v5275_v27  ;;  %v5326_v29 = vld [vmem:[%s9654_s3 + $0xe0] sm:$0xff] }
 0x105   :  { %v1060_v38 = vmax.f32 %v1056_v32, 0.0  ;;  %v1048_v39 = vmax.f32 %v6306_v33, %v6320_v35  ;;  %v1032_v40 = vpop.f32.mrb[3].mxu1 }
 0x106   :  { %v1059_v41 = vmax.f32 %v1055_v34, 0.0  ;;  %v1047_v42 = vmax.f32 %v938_v36, %v1032_v40  ;;  %v5278_v40 = vld [vmem:[%s9654_s3 + $0x1d0] sm:$0xff] }
 0x107   :  { %v1058_v43 = vadd.f32 %v5264_v25, %v1048_v39  ;;  %v5277_v39 = vld [vmem:[%s9654_s3 + $0x1c8] sm:$0xff] }
 0x108   :  { %v7183_v44 = vpack.c.bf16 %v1060_v38, %v1059_v41  ;;  %v1057_v45 = vadd.f32 %v5264_v25, %v1047_v42  ;;  %v1259_v25 = vld [vmem:[%s9654_s3] sm:$0xff]  ;;  %v1262_v38 = vld [vmem:[%s9654_s3 + $0x18] sm:$0xff]  ;;  %v7267_v46 = vpack.c.bf16 %v5278_v40, %v5277_v39 }
 0x109   :  { %v1062_v48 = vmax.f32 %v1058_v43, 0.0  ;;  %v7223_v28 = vpack.c.bf16 %v1260_v26, %v1259_v25  ;;  %v1263_v42 = vld [vmem:[%s9654_s3 + $0x20] sm:$0xff]  ;;  %v1264_v43 = vld [vmem:[%s9654_s3 + $0x28] sm:$0xff]  ;;  %v5339_v26 = vld [vmem:[%s9654_s3 + $0x290] sm:$0xff] }
 0x10a   :  { %v1061_v52 = vmax.f32 %v1057_v45, 0.0  ;;  %7184 = vmatprep.subr.bf16.mxu0 %v7183_v44  ;;  %7194 = vmatprep.subr.bf16.mxu1 %v7183_v44  ;;  %v7227_v45 = vpack.c.bf16 %v1262_v38, %v1261_v37  ;;  %v7231_v50 = vpack.c.bf16 %v1264_v43, %v1263_v42  ;;  %v5338_v25 = vld [vmem:[%s9654_s3 + $0x288] sm:$0xff]  ;;  %v5343_v38 = vld [vmem:[%s9654_s3 + $0x2b0] sm:$0xff]  ;;  %v5344_v42 = vld [vmem:[%s9654_s3 + $0x2b8] sm:$0xf] }
 0x10b   :  { %7186 = vmatpush3.bf16.msra.mxu0 %v7183_v44  ;;  %7196 = vmatpush3.bf16.msra.mxu1 %v7183_v44  ;;  %v5342_v37 = vld [vmem:[%s9654_s3 + $0x2a8] sm:$0xff] }
 0x10c   :  { %v7187_v54 = vpack.c.bf16 %v1062_v48, %v1061_v52  ;;  %v5280_v48 = vld [vmem:[%s9654_s3 + $0x1e0] sm:$0xff]  ;;  %v1265_v52 = vld [vmem:[%s9654_s3 + $0x30] sm:$0xff]  ;;  %v7319_v40 = vpack.c.bf16 %v5343_v38, %v5342_v37  ;;  %v5348_v43 = vld [vmem:[%s9654_s3 + $0x108] sm:$0xff] }
 0x10d   :  { %v7271_v51 = vpack.c.bf16 %v5280_v48, %v5279_v47  ;;  %v5350_v48 = vld [vmem:[%s9654_s3 + $0x118] sm:$0xff] }
 0x10e   :  { %7189 = vmatprep.subr.msk.bf16.mxu0 %vm8280_vm6, %v7187_v54  ;;  %7199 = vmatprep.subr.msk.bf16.mxu1 %vm8280_vm6, %v7187_v54 }
 0x10f   :  { %7192 = vmatpush3.bf16.msk.msra.mxu0 %vm8280_vm6, %v7187_v54  ;;  %7202 = vmatpush3.bf16.msk.msra.mxu1 %vm8280_vm6, %v7187_v54  ;;  %v1266_v54 = vld [vmem:[%s9654_s3 + $0x38] sm:$0xff] }
 0x110   :  { %7204 = vmatprep.subr.bf16.mxu0 %v7203_v55  ;;  %7244 = vmatprep.subr.bf16.mxu1 %v7243_v56  ;;  %v7235_v57 = vpack.c.bf16 %v1266_v54, %v1265_v52  ;;  %v5365_v52 = vld [vmem:[%s9654_s3 + $0x2d8] sm:$0xff] }
 0x112   :  { %6330 = vmatmul.mubr.msk.f32.vlgmr.msra.gmra.mrb[4].mxu0 %vm1084_vm2, %v8305_v61  ;;  %6341 = vmatmul.mubr.msk.f32.vlgmr.msra.gmra.mrb[4].mxu1 %vm1084_vm2, %v8308_v62 }
 0x113   :  { %7206 = vmatpush3.bf16.msra.mxu0 %v7203_v55  ;;  %7246 = vmatpush3.bf16.msra.mxu1 %v7243_v56  ;;  %v5281_v55 = vld [vmem:[%s9654_s3 + $0x1e8] sm:$0xff]  ;;  %v5282_v56 = vld [vmem:[%s9654_s3 + $0x1f0] sm:$0xff] }
 0x114   :  { %7208 = vmatprep.subr.bf16.mxu0 %v7207_v63  ;;  %7248 = vmatprep.subr.bf16.mxu1 %v7247_v0  ;;  %v7275_v58 = vpack.c.bf16 %v5282_v56, %v5281_v55  ;;  %v5352_v56 = vld [vmem:[%s9654_s3 + $0x128] sm:$0xff] }
 0x117   :  { %7210 = vmatpush3.bf16.msra.mxu0 %v7207_v63  ;;  %7250 = vmatpush3.bf16.msra.mxu1 %v7247_v0  ;;  %v5283_v63 = vld [vmem:[%s9654_s3 + $0x1f8] sm:$0xff]  ;;  %v5284_v0 = vld [vmem:[%s9654_s3 + $0x200] sm:$0xff] }
 0x118   :  { %7212 = vmatprep.subr.bf16.mxu0 %v7211_v5  ;;  %7252 = vmatprep.subr.bf16.mxu1 %v7251_v6  ;;  %v7279_v2 = vpack.c.bf16 %v5284_v0, %v5283_v63 }
 0x11b   :  { %7214 = vmatpush3.bf16.msra.mxu0 %v7211_v5  ;;  %7254 = vmatpush3.bf16.msra.mxu1 %v7251_v6  ;;  %v5320_v5 = vld [vmem:[%s9654_s3 + $0xb0] sm:$0xff]  ;;  %v5321_v6 = vld [vmem:[%s9654_s3 + $0xb8] sm:$0xff] }
 0x11c   :  { %7216 = vmatprep.subr.bf16.mxu0 %v7215_v10  ;;  %7256 = vmatprep.subr.bf16.mxu1 %v7255_v12 }
 0x11f   :  { %7218 = vmatpush3.bf16.msra.mxu0 %v7215_v10  ;;  %7258 = vmatpush3.bf16.msra.mxu1 %v7255_v12  ;;  %v7283_v10 = vpack.c.bf16 %v5321_v6, %v5320_v5  ;;  %v5323_v12 = vld [vmem:[%s9654_s3 + $0xc8] sm:$0xff]  ;;  %v5369_v5 = vld [vmem:[%s9654_s3 + $0x2f8] sm:$0xff] }
 0x120   :  { %7220 = vmatprep.subr.bf16.mxu0 %v7219_v16  ;;  %7260 = vmatprep.subr.bf16.mxu1 %v7259_v19 }
 0x123   :  { %7222 = vmatpush3.bf16.msra.mxu0 %v7219_v16  ;;  %7262 = vmatpush3.bf16.msra.mxu1 %v7259_v19  ;;  %v7287_v16 = vpack.c.bf16 %v5323_v12, %v5322_v9  ;;  %v5324_v19 = vld [vmem:[%s9654_s3 + $0xd0] sm:$0xff] }
 0x124   :  { %6363 = vmatprep.subr.msk.mxu0 %vm1091_vm4, %v5296_v20  ;;  %6413 = vmatprep.subr.msk.mxu1 %vm1091_vm4, %v5313_v24  ;;  %v5357_v9 = vld [vmem:[%s9654_s3 + $0x150] sm:$0xff] }
 0x125   :  { %v7339_v12 = vpack.c.bf16 %v5357_v9, %v5356_v8 }
 0x127   :  { %6364 = vmatpush3.msk.msra.mxu0 %vm1091_vm4, %v5296_v20  ;;  %6414 = vmatpush3.msk.msra.mxu1 %vm1091_vm4, %v5313_v24  ;;  %v5325_v20 = vld [vmem:[%s9654_s3 + $0xd8] sm:$0xff] }
 0x128   :  { %7224 = vmatprep.subr.bf16.mxu0 %v7223_v28  ;;  %7264 = vmatprep.subr.bf16.mxu1 %v7263_v30  ;;  %v7291_v27 = vpack.c.bf16 %v5325_v20, %v5324_v19  ;;  %v5390_v19 = vld [vmem:[%s9654_s3 + $0x318] sm:$0xff]  ;;  %v5391_v20 = vld [vmem:[%s9654_s3 + $0x320] sm:$0xff] }
 0x1e5   :  { %v6331_v31 = vpop.f32.mrb[4].mxu0  ;;  %v6342_v32 = vpop.f32.mrb[4].mxu1 }
 0x1e6   :  { %v1252_v33 = vmax.f32 %v6331_v31, %v6342_v32  ;;  %v1161_v34 = vpop.f32.mrb[5].mxu0  ;;  %v1242_v35 = vpop.f32.mrb[5].mxu1  ;;  %v5340_v31 = vld [vmem:[%s9654_s3 + $0x298] sm:$0xff]  ;;  %v5341_v32 = vld [vmem:[%s9654_s3 + $0x2a0] sm:$0xff] }
 0x1e7   :  { %v1251_v36 = vmax.f32 %v1161_v34, %v1242_v35  ;;  %v7315_v34 = vpack.c.bf16 %v5341_v32, %v5340_v31  ;;  %v5328_v35 = vld [vmem:[%s9654_s3 + $0xf0] sm:$0xff]  ;;  %v5380_v32 = vld [vmem:[%s9654_s3 + $0x180] sm:$0xff] }
 0x1e8   :  { %1256 = vst.msk [vmem:[#allocation2 + $0x8] sm:$0x3f] %vm1255_vm9, %v1252_v33 }
 0x1e9   :  { %1254 = vst.msk [vmem:[#allocation2] sm:$0xff] %vm1253_vm10, %v1251_v36  ;;  %v5329_v36 = vld [vmem:[%s9654_s3 + $0xf8] sm:$0xff] }
 0x1ea   :  { %v7299_v39 = vpack.c.bf16 %v5329_v36, %v5328_v35  ;;  %v5394_v35 = vld [vmem:[%s9654_s3 + $0x338] sm:$0xff]  ;;  %v5395_v36 = vld [vmem:[%s9654_s3 + $0x340] sm:$0xff] }
 0x1ef   :  { %v1283_v44 = vld [vmem:[#allocation2 + $0x9] sm:$0x3] }
 0x1f0   :  { %v1282_v41 = vld [vmem:[#allocation2 + $0x1] sm:$0xff]  ;;  %v1633_v54 = vld [vmem:[#allocation2 + $0xa] sm:$0x3] }
 0x1f1   :  { %6365 = vmatprep.mubr.msk.f32.mxu0 %vm1253_vm10, %v1282_v41  ;;  %6415 = vmatprep.mubr.msk.f32.mxu1 %vm1253_vm10, %v1282_v41  ;;  %v1257_v49 = vld [vmem:[#allocation2] sm:$0xff]  ;;  %v1258_v15 = vld [vmem:[#allocation2 + $0x8] sm:$0x3] }
 0x1f2   :  { %6366 = vmatmul.mubr.msk.f32.vlgmr.msra.gmra.mrb[6].mxu0 %vm1253_vm10, %v1283_v44  ;;  %6416 = vmatmul.mubr.msk.f32.vlgmr.msra.gmra.mrb[6].mxu1 %vm1253_vm10, %v1283_v44  ;;  %v1632_v24 = vld [vmem:[#allocation2 + $0x2] sm:$0xff]  ;;  %v5349_v44 = vld [vmem:[%s9654_s3 + $0x110] sm:$0xff] }
 0x1f3   :  { %7226 = vmatpush3.bf16.msra.mxu0 %v7223_v28  ;;  %7266 = vmatpush3.bf16.msra.mxu1 %v7263_v30  ;;  %v7311_v28 = vpack.c.bf16 %v5339_v26, %v5338_v25  ;;  %v5327_v30 = vld [vmem:[%s9654_s3 + $0xe8] sm:$0xff]  ;;  %v5330_v41 = vld [vmem:[%s9654_s3 + $0x100] sm:$0xf]  ;;  %v7323_v47 = vpack.c.bf16 %v5349_v44, %v5348_v43  ;;  %v5378_v25 = vld [vmem:[%s9654_s3 + $0x170] sm:$0xff] }
 0x1f4   :  { %6390 = vmatprep.mubr.msk.f32.mxu0 %vm1253_vm10, %v1257_v49  ;;  %6440 = vmatprep.mubr.msk.f32.mxu1 %vm1253_vm10, %v1257_v49  ;;  %v7295_v33 = vpack.c.bf16 %v5327_v30, %v5326_v29  ;;  %v5351_v49 = vld [vmem:[%s9654_s3 + $0x120] sm:$0xff]  ;;  %v5379_v26 = vld [vmem:[%s9654_s3 + $0x178] sm:$0xff]  ;;  %v5393_v29 = vld [vmem:[%s9654_s3 + $0x330] sm:$0xff] }
 0x1f5   :  { %7228 = vmatprep.subr.bf16.mxu0 %v7227_v45  ;;  %7268 = vmatprep.subr.bf16.mxu1 %v7267_v46  ;;  %v7327_v55 = vpack.c.bf16 %v5351_v49, %v5350_v48  ;;  %v1824_v63 = vld [vmem:[#allocation2 + $0x3] sm:$0xff]  ;;  %v1825_v30 = vld [vmem:[#allocation2 + $0xb] sm:$0x3]  ;;  %v7367_v31 = vpack.c.bf16 %v5379_v26, %v5378_v25  ;;  %v5397_v43 = vld [vmem:[%s9654_s3 + $0x350] sm:$0xff] }
 0x1f6   :  { %v2016_v37 = vld [vmem:[#allocation2 + $0x4] sm:$0xff]  ;;  %v5398_v48 = vld [vmem:[%s9654_s3 + $0x358] sm:$0xff] }
 0x1f7   :  { %7230 = vmatpush3.bf16.msra.mxu0 %v7227_v45  ;;  %7270 = vmatpush3.bf16.msra.mxu1 %v7267_v46  ;;  %v5362_v45 = vld [vmem:[%s9654_s3 + $0x2c0] sm:$0xff]  ;;  %v5363_v46 = vld [vmem:[%s9654_s3 + $0x2c8] sm:$0xff] }
 0x1f8   :  { %7232 = vmatprep.subr.bf16.mxu0 %v7231_v50  ;;  %7272 = vmatprep.subr.bf16.mxu1 %v7271_v51  ;;  %v5399_v49 = vld [vmem:[%s9654_s3 + $0x360] sm:$0xff]  ;;  %v2452_v25 = vld [vmem:[%s9652_s1 + $0x8] sm:$0xff] }
 0x1f9   :  { %v5417_v26 = vld [vmem:[%s9652_s1 + $0xa0] sm:$0xff] }
 0x1fb   :  { %7234 = vmatpush3.bf16.msra.mxu0 %v7231_v50  ;;  %7274 = vmatpush3.bf16.msra.mxu1 %v7271_v51  ;;  %v7343_v50 = vpack.c.bf16 %v5363_v46, %v5362_v45  ;;  %v5364_v51 = vld [vmem:[%s9654_s3 + $0x2d0] sm:$0xff]  ;;  %v5384_v46 = vld [vmem:[%s9654_s3 + $0x1a0] sm:$0xff] }
 0x1fc   :  { %7236 = vmatprep.subr.bf16.mxu0 %v7235_v57  ;;  %7276 = vmatprep.subr.bf16.mxu1 %v7275_v58 }
 0x1ff   :  { %7238 = vmatpush3.bf16.msra.mxu0 %v7235_v57  ;;  %7278 = vmatpush3.bf16.msra.mxu1 %v7275_v58  ;;  %v5353_v57 = vld [vmem:[%s9654_s3 + $0x130] sm:$0xff]  ;;  %v7347_v58 = vpack.c.bf16 %v5365_v52, %v5364_v51  ;;  %v7399_v51 = vpack.c.bf16 %v5399_v49, %v5398_v48  ;;  %v5456_v48 = vld [vmem:[%s9652_s1 + $0x58] sm:$0xff] }
 0x200   :  { %7240 = vmatprep.subr.bf16.mxu0 %v7239_v1  ;;  %7280 = vmatprep.subr.bf16.mxu1 %v7279_v2  ;;  %v7331_v0 = vpack.c.bf16 %v5353_v57, %v5352_v56  ;;  %v5386_v52 = vld [vmem:[%s9654_s3 + $0x1b0] sm:$0xf]  ;;  %v7961_v56 = vmov 0.0|0.0  }
 0x201   :  { %v5463_v49 = vld [vmem:[%s9652_s1 + $0xf0] sm:$0xff] }
 0x203   :  { %7242 = vmatpush3.bf16.msra.mxu0 %v7239_v1  ;;  %7282 = vmatpush3.bf16.msra.mxu1 %v7279_v2  ;;  %v7351_v1 = vpack.c.bf16 %v5367_v60, %v5366_v59  ;;  %v5354_v2 = vld [vmem:[%s9654_s3 + $0x138] sm:$0xff] }
 0x204   :  { %6388 = vmatprep.subr.msk.mxu0 %vm1091_vm4, %v1269_v3  ;;  %6438 = vmatprep.subr.msk.mxu1 %vm1091_vm4, %v5285_v4 }
 0x207   :  { %6389 = vmatpush3.msk.msra.mxu0 %vm1091_vm4, %v1269_v3  ;;  %6439 = vmatpush3.msk.msra.mxu1 %vm1091_vm4, %v5285_v4  ;;  %v5355_v3 = vld [vmem:[%s9654_s3 + $0x140] sm:$0xff]  ;;  %v5368_v4 = vld [vmem:[%s9654_s3 + $0x2f0] sm:$0xff] }
 0x208   :  { %6391 = vmatmul.mubr.msk.f32.vlgmr.msra.gmra.mrb[6].mxu0 %vm1253_vm10, %v1258_v15  ;;  %6441 = vmatmul.mubr.msk.f32.vlgmr.msra.gmra.mrb[6].mxu1 %vm1253_vm10, %v1258_v15  ;;  %v7335_v6 = vpack.c.bf16 %v5355_v3, %v5354_v2  ;;  %v7355_v7 = vpack.c.bf16 %v5369_v5, %v5368_v4  ;;  %v5372_v15 = vld [vmem:[%s9654_s3 + $0x310] sm:$0xf]  ;;  %v5425_v3 = vld [vmem:[%s9652_s1 + $0x20] sm:$0xff]  ;;  %v5426_v5 = vld [vmem:[%s9652_s1 + $0x28] sm:$0xff] }
 0x209   :  { %7284 = vmatprep.subr.bf16.mxu0 %v7283_v10  ;;  %7304 = vmatprep.subr.bf16.mxu1 %v7303_v11 }
 0x20a   :  { %7286 = vmatpush3.bf16.msra.mxu0 %v7283_v10  ;;  %6465 = vmatprep.mubr.msk.f32.mxu0 %vm1253_vm10, %v1632_v24  ;;  %v5370_v10 = vld [vmem:[%s9654_s3 + $0x300] sm:$0xff] }
 0x20b   :  { %7306 = vmatpush3.bf16.msra.mxu1 %v7303_v11  ;;  %6490 = vmatprep.mubr.msk.f32.mxu1 %vm1253_vm10, %v1632_v24  ;;  %v5371_v11 = vld [vmem:[%s9654_s3 + $0x308] sm:$0xff] }
 0x20c   :  { %7288 = vmatprep.subr.bf16.mxu0 %v7287_v16  ;;  %7308 = vmatprep.subr.bf16.mxu1 %v7307_v18  ;;  %v7359_v13 = vpack.c.bf16 %v5371_v11, %v5370_v10  ;;  %v7411_v11 = vpack.c.bf16 %v5426_v5, %v5425_v3  ;;  %v5475_v3 = vld [vmem:[%s9652_s1 + $0x70] sm:$0xff]  ;;  %v4780_v10 = vld [vmem:[%s9656_s5 + $0x80] sm:$0xff] }
 0x20d   :  { %v5483_v5 = vld [vmem:[%s9652_s1 + $0x110] sm:$0xff] }
 0x20e   :  { %7290 = vmatpush3.bf16.msra.mxu0 %v7287_v16  ;;  %v5376_v16 = vld [vmem:[%s9654_s3 + $0x160] sm:$0xff] }
 0x20f   :  { %7310 = vmatpush3.bf16.msra.mxu1 %v7307_v18  ;;  %7292 = vmatprep.subr.bf16.mxu0 %v7291_v27  ;;  %v5377_v18 = vld [vmem:[%s9654_s3 + $0x168] sm:$0xff] }
 0x210   :  { %7312 = vmatprep.subr.bf16.mxu1 %v7311_v28  ;;  %v7363_v24 = vpack.c.bf16 %v5377_v18, %v5376_v16  ;;  %v5439_v16 = vld [vmem:[%s9652_s1 + $0xd0] sm:$0xff]  ;;  %v5440_v18 = vld [vmem:[%s9652_s1 + $0xd8] sm:$0xff] }
 0x212   :  { %7294 = vmatpush3.bf16.msra.mxu0 %v7291_v27  ;;  %v7383_v27 = vpack.c.bf16 %v5391_v20, %v5390_v19  ;;  %v7431_v20 = vpack.c.bf16 %v5440_v18, %v5439_v16  ;;  %v5452_v16 = vld [vmem:[%s9651_s0 + $0x3a] sm:$0xf]  ;;  %v5469_v18 = vld [vmem:[%s9651_s0 + $0x23] sm:$0xff] }
 0x213   :  { %7314 = vmatpush3.bf16.msra.mxu1 %v7311_v28  ;;  %7296 = vmatprep.subr.bf16.mxu0 %v7295_v33  ;;  %v5392_v28 = vld [vmem:[%s9654_s3 + $0x328] sm:$0xff] }
 0x214   :  { %7316 = vmatprep.subr.bf16.mxu1 %v7315_v34 }
 0x216   :  { %7298 = vmatpush3.bf16.msra.mxu0 %v7295_v33  ;;  %v5381_v33 = vld [vmem:[%s9654_s3 + $0x188] sm:$0xff] }
 0x217   :  { %7318 = vmatpush3.bf16.msra.mxu1 %v7315_v34  ;;  %7300 = vmatprep.subr.bf16.mxu0 %v7299_v39  ;;  %v7387_v34 = vpack.c.bf16 %v5393_v29, %v5392_v28  ;;  %v7371_v38 = vpack.c.bf16 %v5381_v33, %v5380_v32  ;;  %v5421_v28 = vld [vmem:[%s9651_s0 + $0x21] sm:$0xff]  ;;  %v2454_v32 = vld [vmem:[%s9652_s1 + $0x18] sm:$0xff]  ;;  %v5419_v33 = vld [vmem:[%s9652_s1 + $0xb0] sm:$0xff] }
 0x218   :  { %7320 = vmatprep.subr.bf16.mxu1 %v7319_v40 }
 0x21a   :  { %7302 = vmatpush3.bf16.msra.mxu0 %v7299_v39  ;;  %v7391_v39 = vpack.c.bf16 %v5395_v36, %v5394_v35  ;;  %v5422_v35 = vld [vmem:[%s9651_s0 + $0x29] sm:$0xff]  ;;  %v5423_v36 = vld [vmem:[%s9651_s0 + $0x31] sm:$0xff] }
 0x21b   :  { %7322 = vmatpush3.bf16.msra.mxu1 %v7319_v40  ;;  %6463 = vmatprep.subr.msk.mxu0 %vm1091_vm4, %v5330_v41  ;;  %v5382_v40 = vld [vmem:[%s9654_s3 + $0x190] sm:$0xff] }
 0x21c   :  { %6488 = vmatprep.subr.msk.mxu1 %vm1091_vm4, %v5344_v42 }
 0x21e   :  { %6464 = vmatpush3.msk.msra.mxu0 %vm1091_vm4, %v5330_v41  ;;  %v5383_v41 = vld [vmem:[%s9654_s3 + $0x198] sm:$0xff] }
 0x21f   :  { %6489 = vmatpush3.msk.msra.mxu1 %vm1091_vm4, %v5344_v42  ;;  %6466 = vmatmul.mubr.msk.f32.vlgmr.msra.gmra.mrb[6].mxu0 %vm1253_vm10, %v1633_v54  ;;  %v5396_v42 = vld [vmem:[%s9654_s3 + $0x348] sm:$0xff]  ;;  %v7375_v44 = vpack.c.bf16 %v5383_v41, %v5382_v40  ;;  %v5461_v41 = vld [vmem:[%s9652_s1 + $0xe0] sm:$0xff] }
 0x220   :  { %6491 = vmatmul.mubr.msk.f32.vlgmr.msra.gmra.mrb[6].mxu1 %vm1253_vm10, %v1633_v54  ;;  %7324 = vmatprep.subr.bf16.mxu0 %v7323_v47  ;;  %v7395_v45 = vpack.c.bf16 %v5397_v43, %v5396_v42  ;;  %v5400_v54 = vld [vmem:[%s9654_s3 + $0x368] sm:$0xf]  ;;  %v5424_v43 = vld [vmem:[%s9651_s0 + $0x39] sm:$0xf] }
 0x221   :  { %7344 = vmatprep.subr.bf16.mxu1 %v7343_v50  ;;  %7326 = vmatpush3.bf16.msra.mxu0 %v7323_v47  ;;  %v5385_v47 = vld [vmem:[%s9654_s3 + $0x1a8] sm:$0xff] }
 0x222   :  { %6515 = vmatprep.mubr.msk.f32.mxu0 %vm1253_vm10, %v1824_v63  ;;  %7346 = vmatpush3.bf16.msra.mxu1 %v7343_v50  ;;  %v7379_v50 = vpack.c.bf16 %v5385_v47, %v5384_v46  ;;  %v5454_v40 = vld [vmem:[%s9652_s1 + $0x48] sm:$0xff]  ;;  %v5455_v47 = vld [vmem:[%s9652_s1 + $0x50] sm:$0xff] }
 0x223   :  { %6540 = vmatprep.mubr.msk.f32.mxu1 %vm1253_vm10, %v1824_v63  ;;  %7328 = vmatprep.subr.bf16.mxu0 %v7327_v55  ;;  %v5462_v42 = vld [vmem:[%s9652_s1 + $0xe8] sm:$0xff] }
 0x224   :  { %7348 = vmatprep.subr.bf16.mxu1 %v7347_v58  ;;  %v7451_v46 = vpack.c.bf16 %v5462_v42, %v5461_v41 }
 0x225   :  { %7330 = vmatpush3.bf16.msra.mxu0 %v7327_v55  ;;  %v2017_v55 = vld [vmem:[#allocation2 + $0xc] sm:$0x3] }
 0x226   :  { %7350 = vmatpush3.bf16.msra.mxu1 %v7347_v58  ;;  %7332 = vmatprep.subr.bf16.mxu0 %v7331_v0  ;;  %v5404_v58 = vld [vmem:[%s9655_s4] ss:$0 sm:$0xff] }
 0x227   :  { %7352 = vmatprep.subr.bf16.mxu1 %v7351_v1 }
 0x229   :  { %7334 = vmatpush3.bf16.msra.mxu0 %v7331_v0 }
 0x22a   :  { %7354 = vmatpush3.bf16.msra.mxu1 %v7351_v1  ;;  %7336 = vmatprep.subr.bf16.mxu0 %v7335_v6 }
 0x22b   :  { %7356 = vmatprep.subr.bf16.mxu1 %v7355_v7 }
 0x22d   :  { %7338 = vmatpush3.bf16.msra.mxu0 %v7335_v6  ;;  %v5437_v6 = vld [vmem:[%s9652_s1 + $0xc0] sm:$0xff] }
 0x22e   :  { %7358 = vmatpush3.bf16.msra.mxu1 %v7355_v7  ;;  %7340 = vmatprep.subr.bf16.mxu0 %v7339_v12  ;;  %v5438_v7 = vld [vmem:[%s9652_s1 + $0xc8] sm:$0xff] }
 0x22f   :  { %7360 = vmatprep.subr.bf16.mxu1 %v7359_v13 }
 0x231   :  { %7342 = vmatpush3.bf16.msra.mxu0 %v7339_v12  ;;  %v7427_v12 = vpack.c.bf16 %v5438_v7, %v5437_v6  ;;  %v5484_v6 = vld [vmem:[%s9652_s1 + $0x118] sm:$0xff]  ;;  %v5450_v7 = vld [vmem:[%s9651_s0 + $0x2a] sm:$0xff] }
 0x232   :  { %7362 = vmatpush3.bf16.msra.mxu1 %v7359_v13  ;;  %6513 = vmatprep.subr.msk.mxu0 %vm1091_vm4, %v5358_v14  ;;  %v5427_v13 = vld [vmem:[%s9652_s1 + $0x30] sm:$0xff] }
 0x233   :  { %6538 = vmatprep.subr.msk.mxu1 %vm1091_vm4, %v5372_v15 }
 0x235   :  { %6514 = vmatpush3.msk.msra.mxu0 %vm1091_vm4, %v5358_v14 }
 0x236   :  { %6539 = vmatpush3.msk.msra.mxu1 %vm1091_vm4, %v5372_v15  ;;  %6516 = vmatmul.mubr.msk.f32.vlgmr.msra.gmra.mrb[6].mxu0 %vm1253_vm10, %v1825_v30  ;;  %v5428_v15 = vld [vmem:[%s9652_s1 + $0x38] sm:$0xff] }
 0x237   :  { %6541 = vmatmul.mubr.msk.f32.vlgmr.msra.gmra.mrb[6].mxu1 %vm1253_vm10, %v1825_v30  ;;  %7364 = vmatprep.subr.bf16.mxu0 %v7363_v24  ;;  %v7415_v19 = vpack.c.bf16 %v5428_v15, %v5427_v13  ;;  %v5494_v13 = vld [vmem:[%s9652_s1 + $0x88] sm:$0xff] }
 0x238   :  { %7384 = vmatprep.subr.bf16.mxu1 %v7383_v27  ;;  %7366 = vmatpush3.bf16.msra.mxu0 %v7363_v24  ;;  %v2451_v24 = vld [vmem:[%s9652_s1] sm:$0xff]  ;;  %v5502_v15 = vld [vmem:[%s9652_s1 + $0x128] sm:$0xff] }
 0x239   :  { %6565 = vmatprep.mubr.msk.f32.mxu0 %vm1253_vm10, %v2016_v37  ;;  %7386 = vmatpush3.bf16.msra.mxu1 %v7383_v27  ;;  %v5418_v27 = vld [vmem:[%s9652_s1 + $0xa8] sm:$0xff]  ;;  %v7419_v29 = vpack.c.bf16 %v2452_v25, %v2451_v24  ;;  %v5495_v24 = vld [vmem:[%s9652_s1 + $0x90] sm:$0xff]  ;;  %v5496_v25 = vld [vmem:[%s9652_s1 + $0x98] sm:$0xff] }
 0x23a   :  { %6590 = vmatprep.mubr.msk.f32.mxu1 %vm1253_vm10, %v2016_v37  ;;  %7368 = vmatprep.subr.bf16.mxu0 %v7367_v31  ;;  %v7435_v30 = vpack.c.bf16 %v5418_v27, %v5417_v26  ;;  %v5503_v26 = vld [vmem:[%s9652_s1 + $0x130] sm:$0xff]  ;;  %v5504_v27 = vld [vmem:[%s9652_s1 + $0x138] sm:$0xff] }
 0x23b   :  { %7388 = vmatprep.subr.bf16.mxu1 %v7387_v34 }
 0x23c   :  { %7370 = vmatpush3.bf16.msra.mxu0 %v7367_v31  ;;  %v2453_v31 = vld [vmem:[%s9652_s1 + $0x10] sm:$0xff] }
 0x23d   :  { %7390 = vmatpush3.bf16.msra.mxu1 %v7387_v34  ;;  %7372 = vmatprep.subr.bf16.mxu0 %v7371_v38  ;;  %v5420_v34 = vld [vmem:[%s9652_s1 + $0xb8] sm:$0xff]  ;;  %v7423_v37 = vpack.c.bf16 %v2454_v32, %v2453_v31  ;;  %v7487_v31 = vpack.c.bf16 %v5504_v27, %v5503_v26  ;;  %v5531_v27 = vld [vmem:[%s9654_s3 + $0x80] sm:$0xff] }
 0x23e   :  { %7392 = vmatprep.subr.bf16.mxu1 %v7391_v39  ;;  %v5472_v32 = vld [vmem:[%s9651_s0 + $0x3b] sm:$0xf] }
 0x23f   :  { %v5530_v26 = vld [vmem:[%s9654_s3 + $0x78] sm:$0xff] }
 0x240   :  { %7374 = vmatpush3.bf16.msra.mxu0 %v7371_v38  ;;  %v7439_v38 = vpack.c.bf16 %v5420_v34, %v5419_v33  ;;  %v5489_v33 = vld [vmem:[%s9651_s0 + $0x24] sm:$0xff]  ;;  %v5490_v34 = vld [vmem:[%s9651_s0 + $0x2c] sm:$0xff] }
 0x241   :  { %7394 = vmatpush3.bf16.msra.mxu1 %v7391_v39  ;;  %7376 = vmatprep.subr.bf16.mxu0 %v7375_v44  ;;  %v5453_v39 = vld [vmem:[%s9652_s1 + $0x40] sm:$0xff] }
 0x242   :  { %7396 = vmatprep.subr.bf16.mxu1 %v7395_v45 }
 0x244   :  { %7378 = vmatpush3.bf16.msra.mxu0 %v7375_v44  ;;  %v5413_v44 = vld [vmem:[%s9651_s0 + $0x20] sm:$0xff] }
 0x245   :  { %7398 = vmatpush3.bf16.msra.mxu1 %v7395_v45  ;;  %7380 = vmatprep.subr.bf16.mxu0 %v7379_v50  ;;  %v7443_v45 = vpack.c.bf16 %v5454_v40, %v5453_v39 }
 0x246   :  { %7400 = vmatprep.subr.bf16.mxu1 %v7399_v51 }
 0x248   :  { %7382 = vmatpush3.bf16.msra.mxu0 %v7379_v50  ;;  %v5464_v50 = vld [vmem:[%s9652_s1 + $0xf8] sm:$0xff] }
 0x249   :  { %7402 = vmatpush3.bf16.msra.mxu1 %v7399_v51  ;;  %6563 = vmatprep.subr.msk.mxu0 %vm1091_vm4, %v5386_v52  ;;  %v5414_v51 = vld [vmem:[%s9651_s0 + $0x28] sm:$0xff] }
 0x24a   :  { %6588 = vmatprep.subr.msk.mxu1 %vm1091_vm4, %v5400_v54 }
 0x24c   :  { %6564 = vmatpush3.msk.msra.mxu0 %vm1091_vm4, %v5386_v52  ;;  %v5415_v52 = vld [vmem:[%s9651_s0 + $0x30] sm:$0xff] }
 0x24d   :  { %6589 = vmatpush3.msk.msra.mxu1 %vm1091_vm4, %v5400_v54  ;;  %6566 = vmatmul.mubr.msk.f32.vlgmr.msra.gmra.mrb[6].mxu0 %vm1253_vm10, %v2017_v55  ;;  %v7447_v54 = vpack.c.bf16 %v5456_v48, %v5455_v47 }
 0x24e   :  { %6591 = vmatmul.mubr.msk.f32.vlgmr.msra.gmra.mrb[6].mxu1 %vm1253_vm10, %v2017_v55  ;;  %7403 = vmatprep.subr.bf16.mxu0 %v7961_v56  ;;  %v7455_v55 = vpack.c.bf16 %v5464_v50, %v5463_v49 }
 0x24f   :  { %7407 = vmatprep.subr.bf16.mxu1 %v7961_v56  ;;  %6597 = vmatprep.mubr.msk.f32.mxu0 %vm7962_vm11, %v7959_v21 }
 0x250   :  { %6604 = vmatprep.mubr.msk.f32.mxu1 %vm7962_vm11, %v7959_v21 }
 0x320   :  { %v6567_v57 = vpop.f32.mrb[6].mxu0 }
 0x321   :  { %v6592_v59 = vpop.f32.mrb[6].mxu1  ;;  %v2105_v60 = vpop.f32.mrb[7].mxu0 }
 0x322   :  { %v2209_v63 = vmax.f32 %v6567_v57, %v6592_v59  ;;  %v2197_v0 = vpop.f32.mrb[7].mxu1  ;;  %v5473_v57 = vld [vmem:[%s9652_s1 + $0x60] sm:$0xff] }
 0x323   :  { %v2208_v1 = vmax.f32 %v2105_v60, %v2197_v0  ;;  %v5481_v59 = vld [vmem:[%s9652_s1 + $0x100] sm:$0xff]  ;;  %v5482_v60 = vld [vmem:[%s9652_s1 + $0x108] sm:$0xff] }
 0x324   :  { %v2217_v2 = vadd.f32 %v5404_v58, %v2209_v63  ;;  %v5416_v63 = vld [vmem:[%s9651_s0 + $0x38] sm:$0xf]  ;;  %v5449_v0 = vld [vmem:[%s9651_s0 + $0x22] sm:$0xff] }
 0x325   :  { %v2216_v4 = vadd.f32 %v5404_v58, %v2208_v1  ;;  %v5474_v58 = vld [vmem:[%s9652_s1 + $0x68] sm:$0xff] }
 0x326   :  { %v2219_v8 = vmax.f32 %v2217_v2, 0.0  ;;  %v7459_v1 = vpack.c.bf16 %v5474_v58, %v5473_v57  ;;  %v7467_v2 = vpack.c.bf16 %v5482_v60, %v5481_v59 }
 0x327   :  { %v2218_v9 = vmax.f32 %v2216_v4, 0.0  ;;  %v5476_v4 = vld [vmem:[%s9652_s1 + $0x78] sm:$0xff] }
 0x329   :  { %v7404_v14 = vpack.c.bf16 %v2219_v8, %v2218_v9  ;;  %v5451_v8 = vld [vmem:[%s9651_s0 + $0x32] sm:$0xff]  ;;  %v7463_v9 = vpack.c.bf16 %v5476_v4, %v5475_v3 }
 0x32b   :  { %7406 = vmatpush3.bf16.msk.msra.mxu0 %vm8684_vm13, %v7404_v14  ;;  %7410 = vmatpush3.bf16.msk.msra.mxu1 %vm8684_vm13, %v7404_v14  ;;  %v5501_v14 = vld [vmem:[%s9652_s1 + $0x120] sm:$0xff] }
 0x32c   :  { %7412 = vmatprep.subr.bf16.mxu0 %v7411_v11  ;;  %7428 = vmatprep.subr.bf16.mxu1 %v7427_v12 }
 0x32e   :  { %6598 = vmatmul.mubr.msk.f32.vlgmr.msra.gmra.mrb[8].mxu0 %vm2220_vm14, %v8253_v22  ;;  %6605 = vmatmul.mubr.msk.f32.vlgmr.msra.gmra.mrb[8].mxu1 %vm2220_vm14, %v8256_v23 }
 0x32f   :  { %7414 = vmatpush3.bf16.msra.mxu0 %v7411_v11  ;;  %7430 = vmatpush3.bf16.msra.mxu1 %v7427_v12  ;;  %v7471_v11 = vpack.c.bf16 %v5484_v6, %v5483_v5  ;;  %v5493_v12 = vld [vmem:[%s9652_s1 + $0x80] sm:$0xff]  ;;  %v5526_v6 = vld [vmem:[%s9654_s3 + $0x58] sm:$0xff] }
 0x330   :  { %7416 = vmatprep.subr.bf16.mxu0 %v7415_v19  ;;  %7432 = vmatprep.subr.bf16.mxu1 %v7431_v20 }
 0x331   :  { %6615 = vmatprep.mubr.msk.f32.mxu0 %vm63_vm0, %v5421_v28  ;;  %6643 = vmatprep.mubr.msk.f32.mxu1 %vm63_vm0, %v5421_v28  ;;  %v5470_v28 = vld [vmem:[%s9651_s0 + $0x2b] sm:$0xff] }
 0x333   :  { %7418 = vmatpush3.bf16.msra.mxu0 %v7415_v19  ;;  %7434 = vmatpush3.bf16.msra.mxu1 %v7431_v20  ;;  %v7475_v19 = vpack.c.bf16 %v5494_v13, %v5493_v12  ;;  %v7483_v20 = vpack.c.bf16 %v5502_v15, %v5501_v14 }
 0x334   :  { %7420 = vmatprep.subr.bf16.mxu0 %v7419_v29  ;;  %7436 = vmatprep.subr.bf16.mxu1 %v7435_v30 }
 0x336   :  { %6616 = vmatmul.mubr.msk.f32.vlgmr.msra.gmra.mrb[10].mxu0 %vm63_vm0, %v5422_v35  ;;  %6644 = vmatmul.mubr.msk.f32.vlgmr.msra.gmra.mrb[10].mxu1 %vm63_vm0, %v5422_v35  ;;  %v5491_v35 = vld [vmem:[%s9651_s0 + $0x34] sm:$0xff] }
 0x337   :  { %7422 = vmatpush3.bf16.msra.mxu0 %v7419_v29  ;;  %7438 = vmatpush3.bf16.msra.mxu1 %v7435_v30  ;;  %v5471_v29 = vld [vmem:[%s9651_s0 + $0x33] sm:$0xff]  ;;  %v7479_v30 = vpack.c.bf16 %v5496_v25, %v5495_v24 }
 0x338   :  { %6618 = vmatprep.mubr.msk.f32.mxu0 %vm63_vm0, %v5423_v36  ;;  %6646 = vmatprep.mubr.msk.f32.mxu1 %vm63_vm0, %v5423_v36  ;;  %v5492_v36 = vld [vmem:[%s9651_s0 + $0x3c] sm:$0xf]  ;;  %s7963_s0 = smov 112  }
 0x339   :  { %7424 = vmatprep.subr.bf16.mxu0 %v7423_v37  ;;  %7440 = vmatprep.subr.bf16.mxu1 %v7439_v38 }
 0x33a   :  { %6619 = vmatmul.mubr.msk.f32.gmra.mrb[12].mxu0 %vm63_vm0, %v5424_v43  ;;  %6647 = vmatmul.mubr.msk.f32.gmra.mrb[12].mxu1 %vm63_vm0, %v5424_v43 }
 0x33b   :  { %7426 = vmatpush3.bf16.msra.mxu0 %v7423_v37  ;;  %7442 = vmatpush3.bf16.msra.mxu1 %v7439_v38 }
 0x33c   :  { %6629 = vmatprep.mubr.msk.f32.mxu0 %vm63_vm0, %v5413_v44  ;;  %6657 = vmatprep.mubr.msk.f32.mxu1 %vm63_vm0, %v5413_v44 }
 0x33d   :  { %7444 = vmatprep.subr.bf16.mxu0 %v7443_v45  ;;  %7452 = vmatprep.subr.bf16.mxu1 %v7451_v46 }
 0x33e   :  { %6630 = vmatmul.mubr.msk.f32.vlgmr.msra.gmra.mrb[10].mxu0 %vm63_vm0, %v5414_v51  ;;  %6658 = vmatmul.mubr.msk.f32.vlgmr.msra.gmra.mrb[10].mxu1 %vm63_vm0, %v5414_v51 }
 0x33f   :  { %7446 = vmatpush3.bf16.msra.mxu0 %v7443_v45  ;;  %7454 = vmatpush3.bf16.msra.mxu1 %v7451_v46 }
 0x340   :  { %6632 = vmatprep.mubr.msk.f32.mxu0 %vm63_vm0, %v5415_v52  ;;  %6660 = vmatprep.mubr.msk.f32.mxu1 %vm63_vm0, %v5415_v52  ;;  %v7933_v52 = vld [vmem:[%s9653_s2] ss:$0 sm:$0xff] }
 0x341   :  { %7448 = vmatprep.subr.bf16.mxu0 %v7447_v54  ;;  %7456 = vmatprep.subr.bf16.mxu1 %v7455_v55 }
 0x342   :  { %6633 = vmatmul.mubr.msk.f32.gmra.mrb[12].mxu0 %vm63_vm0, %v5416_v63  ;;  %6661 = vmatmul.mubr.msk.f32.gmra.mrb[12].mxu1 %vm63_vm0, %v5416_v63 }
 0x343   :  { %7450 = vmatpush3.bf16.msra.mxu0 %v7447_v54  ;;  %7458 = vmatpush3.bf16.msra.mxu1 %v7455_v55 }
 0x344   :  { %6671 = vmatprep.mubr.msk.f32.mxu0 %vm63_vm0, %v5449_v0  ;;  %6685 = vmatprep.mubr.msk.f32.mxu1 %vm63_vm0, %v5449_v0 }
 0x345   :  { %7460 = vmatprep.subr.bf16.mxu0 %v7459_v1  ;;  %7468 = vmatprep.subr.bf16.mxu1 %v7467_v2 }
 0x346   :  { %6672 = vmatmul.mubr.msk.f32.vlgmr.msra.gmra.mrb[10].mxu0 %vm63_vm0, %v5450_v7  ;;  %6686 = vmatmul.mubr.msk.f32.vlgmr.msra.gmra.mrb[10].mxu1 %vm63_vm0, %v5450_v7 }
 0x347   :  { %7462 = vmatpush3.bf16.msra.mxu0 %v7459_v1  ;;  %7470 = vmatpush3.bf16.msra.mxu1 %v7467_v2 }
 0x348   :  { %6674 = vmatprep.mubr.msk.f32.mxu0 %vm63_vm0, %v5451_v8  ;;  %6688 = vmatprep.mubr.msk.f32.mxu1 %vm63_vm0, %v5451_v8  ;;  %v5527_v8 = vld [vmem:[%s9654_s3 + $0x60] sm:$0xff] }
 0x349   :  { %7464 = vmatprep.subr.bf16.mxu0 %v7463_v9  ;;  %7472 = vmatprep.subr.bf16.mxu1 %v7471_v11  ;;  %v7511_v14 = vpack.c.bf16 %v5527_v8, %v5526_v6 }
 0x34a   :  { %6675 = vmatmul.mubr.msk.f32.gmra.mrb[12].mxu0 %vm63_vm0, %v5452_v16  ;;  %6689 = vmatmul.mubr.msk.f32.gmra.mrb[12].mxu1 %vm63_vm0, %v5452_v16  ;;  %v5528_v16 = vld [vmem:[%s9654_s3 + $0x68] sm:$0xff] }
 0x34b   :  { %7466 = vmatpush3.bf16.msra.mxu0 %v7463_v9  ;;  %7474 = vmatpush3.bf16.msra.mxu1 %v7471_v11  ;;  %v5543_v9 = vld [vmem:[%s9654_s3 + $0x210] sm:$0xff]  ;;  %v5544_v11 = vld [vmem:[%s9654_s3 + $0x218] sm:$0xff] }
 0x34c   :  { %6699 = vmatprep.mubr.msk.f32.mxu0 %vm63_vm0, %v5469_v18  ;;  %6713 = vmatprep.mubr.msk.f32.mxu1 %vm63_vm0, %v5469_v18  ;;  %v7551_v15 = vpack.c.bf16 %v5544_v11, %v5543_v9  ;;  %v5529_v18 = vld [vmem:[%s9654_s3 + $0x70] sm:$0xff]  ;;  %v5519_v9 = vld [vmem:[%s9654_s3 + $0x1d8] sm:$0xff]  ;;  %v5520_v11 = vld [vmem:[%s9654_s3 + $0x1e0] sm:$0xff] }
 0x34d   :  { %7476 = vmatprep.subr.bf16.mxu0 %v7475_v19  ;;  %7484 = vmatprep.subr.bf16.mxu1 %v7483_v20  ;;  %v7515_v24 = vpack.c.bf16 %v5529_v18, %v5528_v16  ;;  %v3619_v16 = vld [vmem:[%s9654_s3 + $0x38] sm:$0xff]  ;;  %v5521_v18 = vld [vmem:[%s9654_s3 + $0x1e8] sm:$0xff] }
 0x34e   :  { %6700 = vmatmul.mubr.msk.f32.vlgmr.msra.gmra.mrb[10].mxu0 %vm63_vm0, %v5470_v28  ;;  %6714 = vmatmul.mubr.msk.f32.vlgmr.msra.gmra.mrb[10].mxu1 %vm63_vm0, %v5470_v28  ;;  %v5547_v28 = vld [vmem:[%s9654_s3 + $0x230] sm:$0xff] }
 0x34f   :  { %7478 = vmatpush3.bf16.msra.mxu0 %v7475_v19  ;;  %7486 = vmatpush3.bf16.msra.mxu1 %v7483_v20  ;;  %v5545_v19 = vld [vmem:[%s9654_s3 + $0x220] sm:$0xff]  ;;  %v5546_v20 = vld [vmem:[%s9654_s3 + $0x228] sm:$0xff] }
 0x350   :  { %6702 = vmatprep.mubr.msk.f32.mxu0 %vm63_vm0, %v5471_v29  ;;  %6716 = vmatprep.mubr.msk.f32.mxu1 %vm63_vm0, %v5471_v29  ;;  %v7555_v25 = vpack.c.bf16 %v5546_v20, %v5545_v19  ;;  %v7519_v29 = vpack.c.bf16 %v5531_v27, %v5530_v26  ;;  %v5522_v19 = vld [vmem:[%s9654_s3 + $0x1f0] sm:$0xff]  ;;  %v3621_v26 = vld [vmem:[%s9654_s3 + $0x48] sm:$0xff]  ;;  %v5523_v27 = vld [vmem:[%s9654_s3 + $0x1f8] sm:$0xff] }
 0x351   :  { %7480 = vmatprep.subr.bf16.mxu0 %v7479_v30  ;;  %7488 = vmatprep.subr.bf16.mxu1 %v7487_v31 }
 0x352   :  { %6703 = vmatmul.mubr.msk.f32.gmra.mrb[12].mxu0 %vm63_vm0, %v5472_v32  ;;  %6717 = vmatmul.mubr.msk.f32.gmra.mrb[12].mxu1 %vm63_vm0, %v5472_v32 }
 0x353   :  { %7482 = vmatpush3.bf16.msra.mxu0 %v7479_v30  ;;  %7490 = vmatpush3.bf16.msra.mxu1 %v7487_v31  ;;  %v7559_v30 = vpack.c.bf16 %v5548_v53, %v5547_v28  ;;  %v5524_v28 = vld [vmem:[%s9654_s3 + $0x200] sm:$0xff] }
 0x354   :  { %6727 = vmatprep.mubr.msk.f32.mxu0 %vm63_vm0, %v5489_v33  ;;  %6741 = vmatprep.mubr.msk.f32.mxu1 %vm63_vm0, %v5489_v33  ;;  %v5532_v33 = vld [vmem:[%s9654_s3 + $0x88] sm:$0xff] }
 0x356   :  { %6728 = vmatmul.mubr.msk.f32.vlgmr.msra.gmra.mrb[10].mxu0 %vm63_vm0, %v5490_v34  ;;  %6742 = vmatmul.mubr.msk.f32.vlgmr.msra.gmra.mrb[10].mxu1 %vm63_vm0, %v5490_v34  ;;  %v5533_v34 = vld [vmem:[%s9654_s3 + $0x90] sm:$0xff] }
 0x357   :  { %6730 = vmatprep.mubr.msk.f32.mxu0 %vm63_vm0, %v5491_v35  ;;  %6744 = vmatprep.mubr.msk.f32.mxu1 %vm63_vm0, %v5491_v35  ;;  %v5549_v35 = vld [vmem:[%s9654_s3 + $0x240] sm:$0xff] }
 0x35a   :  { %6731 = vmatmul.mubr.msk.f32.gmra.mrb[12].mxu0 %vm63_vm0, %v5492_v36  ;;  %6745 = vmatmul.mubr.msk.f32.gmra.mrb[12].mxu1 %vm63_vm0, %v5492_v36  ;;  %vm2390_vm0 = vcmask 1041024   ;;  %v7523_v36 = vpack.c.bf16 %v5533_v34, %v5532_v33  ;;  %v5574_v33 = vld [vmem:[%s9654_s3 + $0x268] sm:$0xff]  ;;  %v5575_v34 = vld [vmem:[%s9654_s3 + $0x270] sm:$0xff] }
 0x35b   :  { %6755 = vmatprep.mubr.msk.f32.mxu0 %vm1084_vm2, %v8253_v22  ;;  %6766 = vmatprep.mubr.msk.f32.mxu1 %vm1084_vm2, %v8256_v23 }
 0x401   :  { %v2293_v37 = vpop.f32.mrb[8].mxu0  ;;  %v2365_v38 = vpop.f32.mrb[8].mxu1 }
 0x402   :  { %v2369_v39 = vmax.f32 %v2293_v37, %v2365_v38  ;;  %v6599_v40 = vpop.f32.mrb[9].mxu0  ;;  %v6606_v41 = vpop.f32.mrb[9].mxu1  ;;  %v5550_v37 = vld [vmem:[%s9654_s3 + $0x248] sm:$0xff] }
 0x403   :  { %v7563_v38 = vpack.c.bf16 %v5550_v37, %v5549_v35  ;;  %v5535_v40 = vld [vmem:[%s9654_s3 + $0xa0] sm:$0xff]  ;;  %v5551_v41 = vld [vmem:[%s9654_s3 + $0x250] sm:$0xff]  ;;  %v7611_v37 = vpack.c.bf16 %v5575_v34, %v5574_v33  ;;  %v5596_v34 = vld [vmem:[%s9654_s3 + $0x148] sm:$0xff] }
 0x404   :  { %2371 = vst.msk [vmem:[#allocation3] sm:$0x1f] %vm2370_vm15, %v2369_v39  ;;  %v5534_v39 = vld [vmem:[%s9654_s3 + $0x98] sm:$0xff]  ;;  %v5562_v35 = vld [vmem:[%s9654_s3 + $0xc0] sm:$0xff] }
 0x40b   :  { %v2372_v42 = vld [vmem:[#allocation3] sm:$0x1]  ;;  %v5411_v43 = vld.sshfl [vmem:[#allocation3 + $0x3] sm:$0x1 pattern:$0x76325410] }
 0x40c   :  { %2374 = vst.msk [vmem:[#allocation4] sm:$0x1] %vm2373_vm1, %v2372_v42  ;;  %2417 = vrot.lane.b32.xlu1 %v5411_v43, %s7963_s0  ;;  %v5409_v44 = vld.sshfl [vmem:[#allocation3 + $0x1] sm:$0x1 pattern:$0x76325410]  ;;  %v7527_v42 = vpack.c.bf16 %v5535_v40, %v5534_v39 }
 0x40d   :  { %2384 = vrot.lane.b32.xlu0 %v5409_v44, %s7964_s24  ;;  %v5412_v45 = vld.sshfl [vmem:[#allocation3 + $0x4] sm:$0x1 pattern:$0x76325410]  ;;  %v5552_v43 = vld [vmem:[%s9654_s3 + $0x258] sm:$0xff]  ;;  %v5577_v40 = vld [vmem:[%s9654_s3 + $0x280] sm:$0xff] }
 0x40e   :  { %v7567_v44 = vpack.c.bf16 %v5552_v43, %v5551_v41  ;;  %v5576_v39 = vld [vmem:[%s9654_s3 + $0x278] sm:$0xff] }
 0x40f   :  { %v7615_v43 = vpack.c.bf16 %v5577_v40, %v5576_v39  ;;  %v5598_v40 = vld [vmem:[%s9654_s3 + $0x158] sm:$0xf] }
 0x411   :  { %2436 = vrot.lane.b32.xlu0 %v5412_v45, %s7965_s25  ;;  %v5536_v45 = vld [vmem:[%s9654_s3 + $0xa8] sm:$0xf] }
 0x429   :  { %v6729_v46 = vpop.f32.mrb[10].mxu0  ;;  %v6743_v47 = vpop.f32.mrb[10].mxu1 }
 0x42a   :  { %v3442_v48 = vmax.f32 %v6729_v46, %v6743_v47  ;;  %v3325_v49 = vpop.f32.mrb[11].mxu0  ;;  %v3418_v50 = vpop.f32.mrb[11].mxu1  ;;  %v5553_v46 = vld [vmem:[%s9654_s3 + $0x260] sm:$0xf] }
 0x42b   :  { %v3441_v51 = vmax.f32 %v3325_v49, %v3418_v50  ;;  %v3612_v47 = vld [vmem:[%s9654_s3] sm:$0xff]  ;;  %v5515_v49 = vld [vmem:[%s9654_s3 + $0x1b8] sm:$0xff] }
 0x42c   :  { %v3446_v54 = vadd.f32 %v7933_v52, %v3442_v48  ;;  %v3613_v48 = vld [vmem:[%s9654_s3 + $0x8] sm:$0xff] }
 0x42d   :  { %v3445_v55 = vadd.f32 %v7933_v52, %v3441_v51  ;;  %v6732_v57 = vpop.f32.mrb[12].mxu0  ;;  %v6746_v58 = vpop.f32.mrb[12].mxu1  ;;  %v7531_v50 = vpack.c.bf16 %v3613_v48, %v3612_v47  ;;  %v5516_v51 = vld [vmem:[%s9654_s3 + $0x1c0] sm:$0xff]  ;;  %v5578_v47 = vld [vmem:[%s9654_s3 + $0x288] sm:$0xff]  ;;  %v5579_v48 = vld [vmem:[%s9654_s3 + $0x290] sm:$0xff] }
 0x42e   :  { %v3450_v59 = vmax.f32 %v3446_v54, 0.0  ;;  %v3444_v60 = vmax.f32 %v6732_v57, %v6746_v58  ;;  %v3335_v63 = vpop.f32.mrb[13].mxu0  ;;  %v3428_v0 = vpop.f32.mrb[13].mxu1 }
 0x42f   :  { %v3449_v1 = vmax.f32 %v3445_v55, 0.0  ;;  %v3443_v2 = vmax.f32 %v3335_v63, %v3428_v0  ;;  %v3614_v63 = vld [vmem:[%s9654_s3 + $0x10] sm:$0xff]  ;;  %v3615_v0 = vld [vmem:[%s9654_s3 + $0x18] sm:$0xff] }
 0x430   :  { %v3448_v3 = vadd.f32 %v7933_v52, %v3444_v60 }
 0x431   :  { %v7491_v4 = vpack.c.bf16 %v3450_v59, %v3449_v1  ;;  %v3447_v5 = vadd.f32 %v7933_v52, %v3443_v2  ;;  %v7571_v52 = vpack.c.bf16 %v5516_v51, %v5515_v49  ;;  %v5517_v1 = vld [vmem:[%s9654_s3 + $0x1c8] sm:$0xff]  ;;  %v5518_v2 = vld [vmem:[%s9654_s3 + $0x1d0] sm:$0xff]  ;;  %v5566_v51 = vld [vmem:[%s9654_s3 + $0xe0] sm:$0xff] }
 0x432   :  { %v3452_v7 = vmax.f32 %v3448_v3, 0.0  ;;  %v7575_v8 = vpack.c.bf16 %v5518_v2, %v5517_v1 }
 0x433   :  { %v3451_v12 = vmax.f32 %v3447_v5, 0.0  ;;  %7492 = vmatprep.subr.bf16.mxu0 %v7491_v4  ;;  %7502 = vmatprep.subr.bf16.mxu1 %v7491_v4  ;;  %v3617_v5 = vld [vmem:[%s9654_s3 + $0x28] sm:$0xff] }
 0x434   :  { %7494 = vmatpush3.bf16.msra.mxu0 %v7491_v4  ;;  %7504 = vmatpush3.bf16.msra.mxu1 %v7491_v4  ;;  %v3616_v4 = vld [vmem:[%s9654_s3 + $0x20] sm:$0xff] }
 0x435   :  { %v7495_v13 = vpack.c.bf16 %v3452_v7, %v3451_v12  ;;  %v7535_v7 = vpack.c.bf16 %v3615_v0, %v3614_v63  ;;  %v5582_v63 = vld [vmem:[%s9654_s3 + $0x2a8] sm:$0xff]  ;;  %v5583_v0 = vld [vmem:[%s9654_s3 + $0x2b0] sm:$0xff] }
 0x436   :  { %v7627_v2 = vpack.c.bf16 %v5583_v0, %v5582_v63 }
 0x437   :  { %7497 = vmatprep.subr.msk.bf16.mxu0 %vm8280_vm6, %v7495_v13  ;;  %7507 = vmatprep.subr.msk.bf16.mxu1 %vm8280_vm6, %v7495_v13 }
 0x438   :  { %7500 = vmatpush3.bf16.msk.msra.mxu0 %vm8280_vm6, %v7495_v13  ;;  %7510 = vmatpush3.bf16.msk.msra.mxu1 %vm8280_vm6, %v7495_v13  ;;  %vm8964_vm6 = vmor %vm2391_vm3, %vm2390_vm0  ;;  %v7539_v13 = vpack.c.bf16 %v3617_v5, %v3616_v4  ;;  %v5584_v4 = vld [vmem:[%s9654_s3 + $0x2b8] sm:$0xf]  ;;  %v5588_v5 = vld [vmem:[%s9654_s3 + $0x108] sm:$0xff] }
 0x439   :  { %7512 = vmatprep.subr.bf16.mxu0 %v7511_v14  ;;  %7552 = vmatprep.subr.bf16.mxu1 %v7551_v15 }
 0x43b   :  { %6756 = vmatmul.mubr.msk.f32.vlgmr.msra.gmra.mrb[14].mxu0 %vm1084_vm2, %v8305_v61  ;;  %6767 = vmatmul.mubr.msk.f32.vlgmr.msra.gmra.mrb[14].mxu1 %vm1084_vm2, %v8308_v62  ;;  %vm2423_vm2 = vcmask 1041280  }
 0x43c   :  { %7514 = vmatpush3.bf16.msra.mxu0 %v7511_v14  ;;  %7554 = vmatpush3.bf16.msra.mxu1 %v7551_v15  ;;  %v7579_v14 = vpack.c.bf16 %v5520_v11, %v5519_v9  ;;  %v3618_v15 = vld [vmem:[%s9654_s3 + $0x30] sm:$0xff]  ;;  %v5590_v11 = vld [vmem:[%s9654_s3 + $0x118] sm:$0xff] }
 0x43d   :  { %7516 = vmatprep.subr.bf16.mxu0 %v7515_v24  ;;  %7556 = vmatprep.subr.bf16.mxu1 %v7555_v25  ;;  %v7543_v20 = vpack.c.bf16 %v3619_v16, %v3618_v15  ;;  %v5605_v15 = vld [vmem:[%s9654_s3 + $0x2d8] sm:$0xff] }
 0x440   :  { %7518 = vmatpush3.bf16.msra.mxu0 %v7515_v24  ;;  %7558 = vmatpush3.bf16.msra.mxu1 %v7555_v25  ;;  %v7583_v24 = vpack.c.bf16 %v5522_v19, %v5521_v18  ;;  %v3620_v25 = vld [vmem:[%s9654_s3 + $0x40] sm:$0xff]  ;;  %v5592_v19 = vld [vmem:[%s9654_s3 + $0x128] sm:$0xff] }
 0x441   :  { %7520 = vmatprep.subr.bf16.mxu0 %v7519_v29  ;;  %7560 = vmatprep.subr.bf16.mxu1 %v7559_v30  ;;  %v7547_v53 = vpack.c.bf16 %v3621_v26, %v3620_v25  ;;  %v5606_v25 = vld [vmem:[%s9654_s3 + $0x2e0] sm:$0xff]  ;;  %v5607_v26 = vld [vmem:[%s9654_s3 + $0x2e8] sm:$0xff] }
 0x444   :  { %7522 = vmatpush3.bf16.msra.mxu0 %v7519_v29  ;;  %7562 = vmatpush3.bf16.msra.mxu1 %v7559_v30  ;;  %v7587_v29 = vpack.c.bf16 %v5524_v28, %v5523_v27  ;;  %v3622_v30 = vld [vmem:[%s9654_s3 + $0x50] sm:$0xf] }
 0x445   :  { %7524 = vmatprep.subr.bf16.mxu0 %v7523_v36  ;;  %7564 = vmatprep.subr.bf16.mxu1 %v7563_v38 }
 0x448   :  { %7526 = vmatpush3.bf16.msra.mxu0 %v7523_v36  ;;  %7566 = vmatpush3.bf16.msra.mxu1 %v7563_v38  ;;  %v5563_v38 = vld [vmem:[%s9654_s3 + $0xc8] sm:$0xff] }
 0x449   :  { %7528 = vmatprep.subr.bf16.mxu0 %v7527_v42  ;;  %7568 = vmatprep.subr.bf16.mxu1 %v7567_v44 }
 0x44c   :  { %7530 = vmatpush3.bf16.msra.mxu0 %v7527_v42  ;;  %7570 = vmatpush3.bf16.msra.mxu1 %v7567_v44  ;;  %v7595_v42 = vpack.c.bf16 %v5563_v38, %v5562_v35  ;;  %v5564_v44 = vld [vmem:[%s9654_s3 + $0xd0] sm:$0xff] }
 0x44d   :  { %6789 = vmatprep.subr.msk.mxu0 %vm1091_vm4, %v5536_v45  ;;  %6839 = vmatprep.subr.msk.mxu1 %vm1091_vm4, %v5553_v46  ;;  %v5597_v35 = vld [vmem:[%s9654_s3 + $0x150] sm:$0xff] }
 0x44e   :  { %v7647_v38 = vpack.c.bf16 %v5597_v35, %v5596_v34  ;;  %v4765_v35 = vld [vmem:[%s9656_s5 + $0x8] sm:$0xff] }
 0x450   :  { %6790 = vmatpush3.msk.msra.mxu0 %vm1091_vm4, %v5536_v45  ;;  %6840 = vmatpush3.msk.msra.mxu1 %vm1091_vm4, %v5553_v46  ;;  %v5565_v45 = vld [vmem:[%s9654_s3 + $0xd8] sm:$0xff] }
 0x451   :  { %7532 = vmatprep.subr.bf16.mxu0 %v7531_v50  ;;  %7572 = vmatprep.subr.bf16.mxu1 %v7571_v52  ;;  %v7599_v49 = vpack.c.bf16 %v5565_v45, %v5564_v44  ;;  %v5630_v44 = vld [vmem:[%s9654_s3 + $0x318] sm:$0xff]  ;;  %v5631_v45 = vld [vmem:[%s9654_s3 + $0x320] sm:$0xff] }
 0x47f   :  { %v2385_v31 = vpop.permute.xlu0 %2384 }
 0x480   :  { %v2386_v61 = vrot.slane %v2385_v31, 6 }
 0x482   :  { %v2388_v62 = vsel %vm2387_vm5, %v2386_v61, %v2385_v31  ;;  %v5525_v31 = vld [vmem:[%s9654_s3 + $0x208] sm:$0xf]  ;;  %v5560_v61 = vld [vmem:[%s9654_s3 + $0xb0] sm:$0xff] }
 0x483   :  { %2393 = vst.msk [vmem:[#allocation4] sm:$0x5] %vm8964_vm6, %v2388_v62  ;;  %v5561_v62 = vld [vmem:[%s9654_s3 + $0xb8] sm:$0xff] }
 0x484   :  { %v7591_v36 = vpack.c.bf16 %v5561_v62, %v5560_v61  ;;  %v5609_v61 = vld [vmem:[%s9654_s3 + $0x2f8] sm:$0xff] }
 0x50e   :  { %v6757_v54 = vpop.f32.mrb[14].mxu0  ;;  %v6768_v55 = vpop.f32.mrb[14].mxu1 }
 0x50f   :  { %v3607_v57 = vmax.f32 %v6757_v54, %v6768_v55  ;;  %v3522_v58 = vpop.f32.mrb[15].mxu0  ;;  %v3597_v59 = vpop.f32.mrb[15].mxu1  ;;  %v5580_v54 = vld [vmem:[%s9654_s3 + $0x298] sm:$0xff]  ;;  %v5581_v55 = vld [vmem:[%s9654_s3 + $0x2a0] sm:$0xff] }
 0x510   :  { %v3606_v60 = vmax.f32 %v3522_v58, %v3597_v59  ;;  %v7623_v58 = vpack.c.bf16 %v5581_v55, %v5580_v54  ;;  %v5568_v59 = vld [vmem:[%s9654_s3 + $0xf0] sm:$0xff]  ;;  %v5620_v55 = vld [vmem:[%s9654_s3 + $0x180] sm:$0xff] }
 0x511   :  { %3609 = vst.msk [vmem:[#allocation2 + $0x8] sm:$0x3f] %vm1255_vm9, %v3607_v57  ;;  %vm2420_vm9 = vcmask 916480  }
 0x512   :  { %3608 = vst.msk [vmem:[#allocation2] sm:$0xff] %vm1253_vm10, %v3606_v60  ;;  %v5569_v60 = vld [vmem:[%s9654_s3 + $0xf8] sm:$0xff] }
 0x513   :  { %v7607_v1 = vpack.c.bf16 %v5569_v60, %v5568_v59  ;;  %v5634_v59 = vld [vmem:[%s9654_s3 + $0x338] sm:$0xff]  ;;  %v5635_v60 = vld [vmem:[%s9654_s3 + $0x340] sm:$0xff] }
 0x518   :  { %v3635_v6 = vld [vmem:[#allocation2 + $0x9] sm:$0x3] }
 0x519   :  { %v3634_v3 = vld [vmem:[#allocation2 + $0x1] sm:$0xff]  ;;  %v3983_v16 = vld [vmem:[#allocation2 + $0xa] sm:$0x3] }
 0x51a   :  { %6791 = vmatprep.mubr.msk.f32.mxu0 %vm1253_vm10, %v3634_v3  ;;  %6841 = vmatprep.mubr.msk.f32.mxu1 %vm1253_vm10, %v3634_v3  ;;  %v3610_v12 = vld [vmem:[#allocation2] sm:$0xff]  ;;  %v3611_v41 = vld [vmem:[#allocation2 + $0x8] sm:$0x3] }
 0x51b   :  { %6792 = vmatmul.mubr.msk.f32.vlgmr.msra.gmra.mrb[16].mxu0 %vm1253_vm10, %v3635_v6  ;;  %6842 = vmatmul.mubr.msk.f32.vlgmr.msra.gmra.mrb[16].mxu1 %vm1253_vm10, %v3635_v6  ;;  %v3982_v46 = vld [vmem:[#allocation2 + $0x2] sm:$0xff]  ;;  %v5589_v6 = vld [vmem:[%s9654_s3 + $0x110] sm:$0xff] }
 0x51c   :  { %7534 = vmatpush3.bf16.msra.mxu0 %v7531_v50  ;;  %7574 = vmatpush3.bf16.msra.mxu1 %v7571_v52  ;;  %v7619_v50 = vpack.c.bf16 %v5579_v48, %v5578_v47  ;;  %v5567_v52 = vld [vmem:[%s9654_s3 + $0xe8] sm:$0xff]  ;;  %v5570_v3 = vld [vmem:[%s9654_s3 + $0x100] sm:$0xf]  ;;  %v7631_v9 = vpack.c.bf16 %v5589_v6, %v5588_v5  ;;  %v5618_v47 = vld [vmem:[%s9654_s3 + $0x170] sm:$0xff] }
 0x51d   :  { %6816 = vmatprep.mubr.msk.f32.mxu0 %vm1253_vm10, %v3610_v12  ;;  %6866 = vmatprep.mubr.msk.f32.mxu1 %vm1253_vm10, %v3610_v12  ;;  %v7603_v57 = vpack.c.bf16 %v5567_v52, %v5566_v51  ;;  %v5591_v12 = vld [vmem:[%s9654_s3 + $0x120] sm:$0xff]  ;;  %v5619_v48 = vld [vmem:[%s9654_s3 + $0x178] sm:$0xff]  ;;  %v5633_v51 = vld [vmem:[%s9654_s3 + $0x330] sm:$0xff] }
 0x51e   :  { %7536 = vmatprep.subr.bf16.mxu0 %v7535_v7  ;;  %7576 = vmatprep.subr.bf16.mxu1 %v7575_v8  ;;  %v7635_v18 = vpack.c.bf16 %v5591_v12, %v5590_v11  ;;  %v4172_v27 = vld [vmem:[#allocation2 + $0x3] sm:$0xff]  ;;  %v4173_v52 = vld [vmem:[#allocation2 + $0xb] sm:$0x3]  ;;  %v7675_v54 = vpack.c.bf16 %v5619_v48, %v5618_v47  ;;  %v5637_v5 = vld [vmem:[%s9654_s3 + $0x350] sm:$0xff] }
 0x51f   :  { %v4362_v63 = vld [vmem:[#allocation2 + $0x4] sm:$0xff]  ;;  %v5638_v11 = vld [vmem:[%s9654_s3 + $0x358] sm:$0xff] }
 0x520   :  { %7538 = vmatpush3.bf16.msra.mxu0 %v7535_v7  ;;  %7578 = vmatpush3.bf16.msra.mxu1 %v7575_v8  ;;  %v5602_v7 = vld [vmem:[%s9654_s3 + $0x2c0] sm:$0xff]  ;;  %v5603_v8 = vld [vmem:[%s9654_s3 + $0x2c8] sm:$0xff] }
 0x521   :  { %7540 = vmatprep.subr.bf16.mxu0 %v7539_v13  ;;  %7580 = vmatprep.subr.bf16.mxu1 %v7579_v14  ;;  %v5639_v12 = vld [vmem:[%s9654_s3 + $0x360] sm:$0xff]  ;;  %v4801_v47 = vld [vmem:[%s9656_s5 + $0x128] sm:$0xff] }
 0x522   :  { %v4784_v48 = vld [vmem:[%s9656_s5 + $0xa0] sm:$0xff] }
 0x524   :  { %7542 = vmatpush3.bf16.msra.mxu0 %v7539_v13  ;;  %7582 = vmatpush3.bf16.msra.mxu1 %v7579_v14  ;;  %v7651_v13 = vpack.c.bf16 %v5603_v8, %v5602_v7  ;;  %v5604_v14 = vld [vmem:[%s9654_s3 + $0x2d0] sm:$0xff]  ;;  %v5624_v8 = vld [vmem:[%s9654_s3 + $0x1a0] sm:$0xff] }
 0x525   :  { %7544 = vmatprep.subr.bf16.mxu0 %v7543_v20  ;;  %7584 = vmatprep.subr.bf16.mxu1 %v7583_v24 }
 0x528   :  { %7546 = vmatpush3.bf16.msra.mxu0 %v7543_v20  ;;  %7586 = vmatpush3.bf16.msra.mxu1 %v7583_v24  ;;  %v5593_v20 = vld [vmem:[%s9654_s3 + $0x130] sm:$0xff]  ;;  %v7655_v24 = vpack.c.bf16 %v5605_v15, %v5604_v14  ;;  %v7707_v14 = vpack.c.bf16 %v5639_v12, %v5638_v11  ;;  %v4804_v12 = vld [vmem:[%s9656_s5 + $0x140] sm:$0xff] }
 0x529   :  { %7548 = vmatprep.subr.bf16.mxu0 %v7547_v53  ;;  %7588 = vmatprep.subr.bf16.mxu1 %v7587_v29  ;;  %v7639_v28 = vpack.c.bf16 %v5593_v20, %v5592_v19  ;;  %v5626_v15 = vld [vmem:[%s9654_s3 + $0x1b0] sm:$0xf] }
 0x52c   :  { %7550 = vmatpush3.bf16.msra.mxu0 %v7547_v53  ;;  %7590 = vmatpush3.bf16.msra.mxu1 %v7587_v29  ;;  %v7659_v53 = vpack.c.bf16 %v5607_v26, %v5606_v25  ;;  %v5594_v29 = vld [vmem:[%s9654_s3 + $0x138] sm:$0xff] }
 0x52d   :  { %6814 = vmatprep.subr.msk.mxu0 %vm1091_vm4, %v3622_v30  ;;  %6864 = vmatprep.subr.msk.mxu1 %vm1091_vm4, %v5525_v31 }
 0x530   :  { %6815 = vmatpush3.msk.msra.mxu0 %vm1091_vm4, %v3622_v30  ;;  %6865 = vmatpush3.msk.msra.mxu1 %vm1091_vm4, %v5525_v31  ;;  %v5595_v30 = vld [vmem:[%s9654_s3 + $0x140] sm:$0xff]  ;;  %v5608_v31 = vld [vmem:[%s9654_s3 + $0x2f0] sm:$0xff] }
 0x531   :  { %6817 = vmatmul.mubr.msk.f32.vlgmr.msra.gmra.mrb[16].mxu0 %vm1253_vm10, %v3611_v41  ;;  %6867 = vmatmul.mubr.msk.f32.vlgmr.msra.gmra.mrb[16].mxu1 %vm1253_vm10, %v3611_v41  ;;  %v7643_v62 = vpack.c.bf16 %v5595_v30, %v5594_v29  ;;  %v7663_v33 = vpack.c.bf16 %v5609_v61, %v5608_v31  ;;  %v5612_v41 = vld [vmem:[%s9654_s3 + $0x310] sm:$0xf] }
 0x532   :  { %7592 = vmatprep.subr.bf16.mxu0 %v7591_v36  ;;  %7612 = vmatprep.subr.bf16.mxu1 %v7611_v37 }
 0x533   :  { %7594 = vmatpush3.bf16.msra.mxu0 %v7591_v36  ;;  %6891 = vmatprep.mubr.msk.f32.mxu0 %vm1253_vm10, %v3982_v46  ;;  %v5610_v36 = vld [vmem:[%s9654_s3 + $0x300] sm:$0xff] }
 0x534   :  { %7614 = vmatpush3.bf16.msra.mxu1 %v7611_v37  ;;  %6916 = vmatprep.mubr.msk.f32.mxu1 %vm1253_vm10, %v3982_v46  ;;  %v5611_v37 = vld [vmem:[%s9654_s3 + $0x308] sm:$0xff] }
 0x535   :  { %7596 = vmatprep.subr.bf16.mxu0 %v7595_v42  ;;  %7616 = vmatprep.subr.bf16.mxu1 %v7615_v43  ;;  %v7667_v39 = vpack.c.bf16 %v5611_v37, %v5610_v36 }
 0x537   :  { %7598 = vmatpush3.bf16.msra.mxu0 %v7595_v42  ;;  %v5616_v42 = vld [vmem:[%s9654_s3 + $0x160] sm:$0xff] }
 0x538   :  { %7618 = vmatpush3.bf16.msra.mxu1 %v7615_v43  ;;  %7600 = vmatprep.subr.bf16.mxu0 %v7599_v49  ;;  %v5617_v43 = vld [vmem:[%s9654_s3 + $0x168] sm:$0xff] }
 0x539   :  { %7620 = vmatprep.subr.bf16.mxu1 %v7619_v50  ;;  %v7671_v46 = vpack.c.bf16 %v5617_v43, %v5616_v42  ;;  %v4783_v42 = vld [vmem:[%s9656_s5 + $0x98] sm:$0xff]  ;;  %v4766_v43 = vld [vmem:[%s9656_s5 + $0x10] sm:$0xff] }
 0x53b   :  { %7602 = vmatpush3.bf16.msra.mxu0 %v7599_v49  ;;  %v7691_v49 = vpack.c.bf16 %v5631_v45, %v5630_v44  ;;  %v4767_v44 = vld [vmem:[%s9656_s5 + $0x18] sm:$0xff] }
 0x53c   :  { %7622 = vmatpush3.bf16.msra.mxu1 %v7619_v50  ;;  %7604 = vmatprep.subr.bf16.mxu0 %v7603_v57  ;;  %v5632_v50 = vld [vmem:[%s9654_s3 + $0x328] sm:$0xff] }
 0x53d   :  { %7624 = vmatprep.subr.bf16.mxu1 %v7623_v58 }
 0x53f   :  { %7606 = vmatpush3.bf16.msra.mxu0 %v7603_v57  ;;  %v5621_v57 = vld [vmem:[%s9654_s3 + $0x188] sm:$0xff] }
 0x540   :  { %7626 = vmatpush3.bf16.msra.mxu1 %v7623_v58  ;;  %7608 = vmatprep.subr.bf16.mxu0 %v7607_v1  ;;  %v7695_v58 = vpack.c.bf16 %v5633_v51, %v5632_v50  ;;  %v7679_v0 = vpack.c.bf16 %v5621_v57, %v5620_v55  ;;  %v4785_v50 = vld [vmem:[%s9656_s5 + $0xa8] sm:$0xff] }
 0x541   :  { %7628 = vmatprep.subr.bf16.mxu1 %v7627_v2  ;;  %v7727_v51 = vpack.c.bf16 %v4785_v50, %v4784_v48  ;;  %v4769_v55 = vld [vmem:[%s9656_s5 + $0x28] sm:$0xff]  ;;  %v4779_v48 = vld [vmem:[%s9656_s5 + $0x78] sm:$0xff] }
 0x543   :  { %7610 = vmatpush3.bf16.msra.mxu0 %v7607_v1  ;;  %v7699_v1 = vpack.c.bf16 %v5635_v60, %v5634_v59  ;;  %v4802_v60 = vld [vmem:[%s9656_s5 + $0x130] sm:$0xff] }
 0x544   :  { %7630 = vmatpush3.bf16.msra.mxu1 %v7627_v2  ;;  %6889 = vmatprep.subr.msk.mxu0 %vm1091_vm4, %v5570_v3  ;;  %v5622_v2 = vld [vmem:[%s9654_s3 + $0x190] sm:$0xff] }
 0x545   :  { %6914 = vmatprep.subr.msk.mxu1 %vm1091_vm4, %v5584_v4 }
 0x547   :  { %6890 = vmatpush3.msk.msra.mxu0 %vm1091_vm4, %v5570_v3  ;;  %v5623_v3 = vld [vmem:[%s9654_s3 + $0x198] sm:$0xff] }
 0x548   :  { %6915 = vmatpush3.msk.msra.mxu1 %vm1091_vm4, %v5584_v4  ;;  %6892 = vmatmul.mubr.msk.f32.vlgmr.msra.gmra.mrb[16].mxu0 %vm1253_vm10, %v3983_v16  ;;  %v5636_v4 = vld [vmem:[%s9654_s3 + $0x348] sm:$0xff]  ;;  %v7683_v6 = vpack.c.bf16 %v5623_v3, %v5622_v2 }
 0x549   :  { %6917 = vmatmul.mubr.msk.f32.vlgmr.msra.gmra.mrb[16].mxu1 %vm1253_vm10, %v3983_v16  ;;  %7632 = vmatprep.subr.bf16.mxu0 %v7631_v9  ;;  %v7703_v7 = vpack.c.bf16 %v5637_v5, %v5636_v4  ;;  %v5640_v16 = vld [vmem:[%s9654_s3 + $0x368] sm:$0xf]  ;;  %v4786_v4 = vld [vmem:[%s9656_s5 + $0xb0] sm:$0xff]  ;;  %v4787_v5 = vld [vmem:[%s9656_s5 + $0xb8] sm:$0xff] }
 0x54a   :  { %7652 = vmatprep.subr.bf16.mxu1 %v7651_v13  ;;  %7634 = vmatpush3.bf16.msra.mxu0 %v7631_v9  ;;  %v5625_v9 = vld [vmem:[%s9654_s3 + $0x1a8] sm:$0xff] }
 0x54b   :  { %6941 = vmatprep.mubr.msk.f32.mxu0 %vm1253_vm10, %v4172_v27  ;;  %7654 = vmatpush3.bf16.msra.mxu1 %v7651_v13  ;;  %v7687_v13 = vpack.c.bf16 %v5625_v9, %v5624_v8  ;;  %v4770_v8 = vld [vmem:[%s9656_s5 + $0x30] sm:$0xff]  ;;  %v4771_v9 = vld [vmem:[%s9656_s5 + $0x38] sm:$0xff] }
 0x54c   :  { %6966 = vmatprep.mubr.msk.f32.mxu1 %vm1253_vm10, %v4172_v27  ;;  %7636 = vmatprep.subr.bf16.mxu0 %v7635_v18  ;;  %v7733_v11 = vpack.c.bf16 %v4771_v9, %v4770_v8 }
 0x54d   :  { %7656 = vmatprep.subr.bf16.mxu1 %v7655_v24 }
 0x54e   :  { %7638 = vmatpush3.bf16.msra.mxu0 %v7635_v18  ;;  %v4363_v18 = vld [vmem:[#allocation2 + $0xc] sm:$0x3] }
 0x54f   :  { %7658 = vmatpush3.bf16.msra.mxu1 %v7655_v24  ;;  %7640 = vmatprep.subr.bf16.mxu0 %v7639_v28 }
 0x550   :  { %7660 = vmatprep.subr.bf16.mxu1 %v7659_v53 }
 0x552   :  { %7642 = vmatpush3.bf16.msra.mxu0 %v7639_v28  ;;  %v7934_v28 = vld [vmem:[%s9655_s4] ss:$0 sm:$0xff] }
 0x553   :  { %7662 = vmatpush3.bf16.msra.mxu1 %v7659_v53  ;;  %7644 = vmatprep.subr.bf16.mxu0 %v7643_v62 }
 0x554   :  { %7664 = vmatprep.subr.bf16.mxu1 %v7663_v33 }
 0x556   :  { %7646 = vmatpush3.bf16.msra.mxu0 %v7643_v62  ;;  %v4796_v62 = vld [vmem:[%s9656_s5 + $0x100] sm:$0xff] }
 0x557   :  { %7666 = vmatpush3.bf16.msra.mxu1 %v7663_v33  ;;  %7648 = vmatprep.subr.bf16.mxu0 %v7647_v38  ;;  %v4797_v33 = vld [vmem:[%s9656_s5 + $0x108] sm:$0xff] }
 0x558   :  { %7668 = vmatprep.subr.bf16.mxu1 %v7667_v39  ;;  %v7752_v34 = vpack.c.bf16 %v4797_v33, %v4796_v62 }
 0x55a   :  { %7650 = vmatpush3.bf16.msra.mxu0 %v7647_v38  ;;  %v4798_v38 = vld [vmem:[%s9656_s5 + $0x110] sm:$0xff] }
 0x55b   :  { %7670 = vmatpush3.bf16.msra.mxu1 %v7667_v39  ;;  %6939 = vmatprep.subr.msk.mxu0 %vm1091_vm4, %v5598_v40  ;;  %v4799_v39 = vld [vmem:[%s9656_s5 + $0x118] sm:$0xff] }
 0x55c   :  { %6964 = vmatprep.subr.msk.mxu1 %vm1091_vm4, %v5612_v41 }
 0x55e   :  { %6940 = vmatpush3.msk.msra.mxu0 %vm1091_vm4, %v5598_v40  ;;  %v4782_v40 = vld [vmem:[%s9656_s5 + $0x90] sm:$0xff] }
 0x55f   :  { %6965 = vmatpush3.msk.msra.mxu1 %vm1091_vm4, %v5612_v41  ;;  %6942 = vmatmul.mubr.msk.f32.vlgmr.msra.gmra.mrb[16].mxu0 %vm1253_vm10, %v4173_v52  ;;  %v7755_v41 = vpack.c.bf16 %v4799_v39, %v4798_v38  ;;  %v7723_v45 = vpack.c.bf16 %v4783_v42, %v4782_v40  ;;  %v4776_v39 = vld [vmem:[%s9656_s5 + $0x60] sm:$0xff]  ;;  %v4777_v40 = vld [vmem:[%s9656_s5 + $0x68] sm:$0xff]  ;;  %v4810_v42 = vld [vmem:[%s9656_s5 + $0x170] sm:$0xff] }
 0x560   :  { %6967 = vmatmul.mubr.msk.f32.vlgmr.msra.gmra.mrb[16].mxu1 %vm1253_vm10, %v4173_v52  ;;  %7672 = vmatprep.subr.bf16.mxu0 %v7671_v46 }
 0x561   :  { %7692 = vmatprep.subr.bf16.mxu1 %v7691_v49  ;;  %7674 = vmatpush3.bf16.msra.mxu0 %v7671_v46  ;;  %v4800_v46 = vld [vmem:[%s9656_s5 + $0x120] sm:$0xff] }
 0x562   :  { %6991 = vmatprep.mubr.msk.f32.mxu0 %vm1253_vm10, %v4362_v63  ;;  %7694 = vmatpush3.bf16.msra.mxu1 %v7691_v49  ;;  %v7725_v49 = vpack.c.bf16 %v4767_v44, %v4766_v43  ;;  %v7758_v52 = vpack.c.bf16 %v4801_v47, %v4800_v46  ;;  %v4811_v43 = vld [vmem:[%s9656_s5 + $0x178] sm:$0xff]  ;;  %v4794_v44 = vld [vmem:[%s9656_s5 + $0xf0] sm:$0xff] }
 0x563   :  { %7016 = vmatprep.mubr.msk.f32.mxu1 %vm1253_vm10, %v4362_v63  ;;  %7676 = vmatprep.subr.bf16.mxu0 %v7675_v54  ;;  %v4803_v63 = vld [vmem:[%s9656_s5 + $0x138] sm:$0xff]  ;;  %v4778_v47 = vld [vmem:[%s9656_s5 + $0x70] sm:$0xff] }
 0x564   :  { %7696 = vmatprep.subr.bf16.mxu1 %v7695_v58  ;;  %v7761_v3 = vpack.c.bf16 %v4803_v63, %v4802_v60  ;;  %v4795_v46 = vld [vmem:[%s9656_s5 + $0xf8] sm:$0xff]  ;;  %v7749_v50 = vpack.c.bf16 %v4779_v48, %v4778_v47  ;;  %v5082_v47 = vld [vmem:[%s9660_s9 + $0x10] sm:$0xff] }
 0x565   :  { %7678 = vmatpush3.bf16.msra.mxu0 %v7675_v54  ;;  %v4768_v54 = vld [vmem:[%s9656_s5 + $0x20] sm:$0xff] }
 0x566   :  { %7698 = vmatpush3.bf16.msra.mxu1 %v7695_v58  ;;  %7680 = vmatprep.subr.bf16.mxu0 %v7679_v0  ;;  %v7729_v57 = vpack.c.bf16 %v4769_v55, %v4768_v54  ;;  %v4813_v54 = vld [vmem:[%s9656_s5 + $0x188] sm:$0xff] }
 0x567   :  { %7700 = vmatprep.subr.bf16.mxu1 %v7699_v1 }
 0x569   :  { %7682 = vmatpush3.bf16.msra.mxu0 %v7679_v0 }
 0x56a   :  { %7702 = vmatpush3.bf16.msra.mxu1 %v7699_v1  ;;  %7684 = vmatprep.subr.bf16.mxu0 %v7683_v6 }
 0x56b   :  { %7704 = vmatprep.subr.bf16.mxu1 %v7703_v7 }
 0x56d   :  { %7686 = vmatpush3.bf16.msra.mxu0 %v7683_v6  ;;  %v5410_v6 = vld.sshfl [vmem:[#allocation3 + $0x2] sm:$0x1 pattern:$0x76325410] }
 0x56e   :  { %7706 = vmatpush3.bf16.msra.mxu1 %v7703_v7  ;;  %7688 = vmatprep.subr.bf16.mxu0 %v7687_v13  ;;  %v7731_v7 = vpack.c.bf16 %v4787_v5, %v4786_v4  ;;  %v5093_v4 = vld [vmem:[%s9660_s9 + $0x68] sm:$0xff] }
 0x56f   :  { %7708 = vmatprep.subr.bf16.mxu1 %v7707_v14 }
 0x571   :  { %7690 = vmatpush3.bf16.msra.mxu0 %v7687_v13  ;;  %v4805_v13 = vld [vmem:[%s9656_s5 + $0x148] sm:$0xff] }
 0x572   :  { %7710 = vmatpush3.bf16.msra.mxu1 %v7707_v14  ;;  %6989 = vmatprep.subr.msk.mxu0 %vm1091_vm4, %v5626_v15  ;;  %v7764_v14 = vpack.c.bf16 %v4805_v13, %v4804_v12  ;;  %v7967_v12 = vmov 1983009808  }
 0x573   :  { %7014 = vmatprep.subr.msk.mxu1 %vm1091_vm4, %v5640_v16  ;;  %v4824_v13 = vunpack.c.l.s4 %v7967_v12 }
 0x575   :  { %6990 = vmatpush3.msk.msra.mxu0 %vm1091_vm4, %v5626_v15  ;;  %v4788_v15 = vld [vmem:[%s9656_s5 + $0xc0] sm:$0xff] }
 0x576   :  { %7015 = vmatpush3.msk.msra.mxu1 %vm1091_vm4, %v5640_v16  ;;  %6992 = vmatmul.mubr.msk.f32.vlgmr.msra.gmra.mrb[16].mxu0 %vm1253_vm10, %v4363_v18  ;;  %v4789_v16 = vld [vmem:[%s9656_s5 + $0xc8] sm:$0xff]  ;;  %vm2424_vm4 = vcmask 518146  }
 0x577   :  { %7017 = vmatmul.mubr.msk.f32.vlgmr.msra.gmra.mrb[16].mxu1 %vm1253_vm10, %v4363_v18  ;;  %7711 = vmatprep.subr.bf16.mxu0 %v7961_v56  ;;  %v7735_v18 = vpack.c.bf16 %v4789_v16, %v4788_v15  ;;  %vm2406_vm10 = vcmask 909568   ;;  %v4825_v16 = vunpack.c.0.s8 %v4824_v13 }
 0x578   :  { %7715 = vmatprep.subr.bf16.mxu1 %v7961_v56  ;;  %7023 = vmatprep.mubr.msk.f32.mxu0 %vm7962_vm11, %v7959_v21 }
 0x579   :  { %7030 = vmatprep.mubr.msk.f32.mxu1 %vm7962_vm11, %v7959_v21 }
 0x649   :  { %v6993_v19 = vpop.f32.mrb[16].mxu0 }
 0x64a   :  { %v7018_v20 = vpop.f32.mrb[16].mxu1  ;;  %v4450_v24 = vpop.f32.mrb[17].mxu0 }
 0x64b   :  { %v4553_v25 = vmax.f32 %v6993_v19, %v7018_v20  ;;  %v4541_v26 = vpop.f32.mrb[17].mxu1  ;;  %v4772_v19 = vld [vmem:[%s9656_s5 + $0x40] sm:$0xff]  ;;  %v4773_v20 = vld [vmem:[%s9656_s5 + $0x48] sm:$0xff] }
 0x64c   :  { %v4552_v27 = vmax.f32 %v4450_v24, %v4541_v26  ;;  %v7737_v24 = vpack.c.bf16 %v4773_v20, %v4772_v19  ;;  %v4807_v26 = vld [vmem:[%s9656_s5 + $0x158] sm:$0xff]  ;;  %v4986_v20 = vld [vmem:[%s9658_s7] sm:$0xff] }
 0x64d   :  { %v4555_v53 = vadd.f32 %v7934_v28, %v4553_v25  ;;  %v4806_v25 = vld [vmem:[%s9656_s5 + $0x150] sm:$0xff] }
 0x64e   :  { %v4554_v29 = vadd.f32 %v7934_v28, %v4552_v27  ;;  %v4790_v27 = vld [vmem:[%s9656_s5 + $0xd0] sm:$0xff]  ;;  %v7767_v28 = vpack.c.bf16 %v4807_v26, %v4806_v25 }
 0x64f   :  { %v4557_v30 = vmax.f32 %v4555_v53, 0.0  ;;  %v4791_v53 = vld [vmem:[%s9656_s5 + $0xd8] sm:$0xff] }
 0x650   :  { %v4556_v31 = vmax.f32 %v4554_v29, 0.0  ;;  %v4774_v29 = vld [vmem:[%s9656_s5 + $0x50] sm:$0xff]  ;;  %v7739_v62 = vpack.c.bf16 %v4791_v53, %v4790_v27 }
 0x652   :  { %v7712_v61 = vpack.c.bf16 %v4557_v30, %v4556_v31  ;;  %v4775_v30 = vld [vmem:[%s9656_s5 + $0x58] sm:$0xff] }
 0x653   :  { %v7741_v33 = vpack.c.bf16 %v4775_v30, %v4774_v29  ;;  %v4988_v29 = vld [vmem:[%s9658_s7 + $0x10] sm:$0xff] }
 0x654   :  { %7714 = vmatpush3.bf16.msk.msra.mxu0 %vm8684_vm13, %v7712_v61  ;;  %7718 = vmatpush3.bf16.msk.msra.mxu1 %vm8684_vm13, %v7712_v61  ;;  %vm9491_vm13 = vmor %vm2424_vm4, %vm2423_vm2 }
 0x655   :  { %7751 = vmatprep.subr.bf16.mxu1 %v7961_v56 }
 0x657   :  { %7024 = vmatmul.mubr.msk.f32.vlgmr.msra.gmra.mrb[18].mxu0 %vm2220_vm14, %v8253_v22  ;;  %7031 = vmatmul.mubr.msk.f32.vlgmr.msra.gmra.mrb[18].mxu1 %vm2220_vm14, %v8256_v23  ;;  %v4781_v22 = vld [vmem:[%s9656_s5 + $0x88] sm:$0xff]  ;;  %v4764_v23 = vld [vmem:[%s9656_s5] sm:$0xff]  ;;  %vm9495_vm14 = vmor %vm2443_vm8, %vm2442_vm7 }
 0x658   :  { %v7719_v36 = vpack.c.bf16 %v4781_v22, %v4780_v10  ;;  %v7721_v37 = vpack.c.bf16 %v4765_v35, %v4764_v23  ;;  %7753 = vmatpush1.bf16.msra.mxu1 %v7752_v34  ;;  %v4808_v34 = vld [vmem:[%s9656_s5 + $0x160] sm:$0xff]  ;;  %v4809_v22 = vld [vmem:[%s9656_s5 + $0x168] sm:$0xff] }
 0x659   :  { %7754 = vmatprep.subr.bf16.mxu1 %v7961_v56  ;;  %v7770_v23 = vpack.c.bf16 %v4809_v22, %v4808_v34  ;;  %v4792_v35 = vld [vmem:[%s9656_s5 + $0xe0] sm:$0xff]  ;;  %v4993_v34 = vld [vmem:[%s9658_s7 + $0x38] sm:$0xff] }
 0x65a   :  { %7720 = vmatprep.subr.bf16.mxu0 %v7719_v36  ;;  %v4793_v36 = vld [vmem:[%s9656_s5 + $0xe8] sm:$0xff] }
 0x65b   :  { %7722 = vmatpush3.bf16.msra.mxu0 %v7721_v37  ;;  %v7743_v38 = vpack.c.bf16 %v4793_v36, %v4792_v35  ;;  %v4996_v36 = vld [vmem:[%s9658_s7 + $0x50] sm:$0xff] }
 0x65c   :  { %7724 = vmatprep.subr.bf16.mxu0 %v7723_v45  ;;  %7756 = vmatpush1.bf16.msra.mxu1 %v7755_v41  ;;  %v7745_v41 = vpack.c.bf16 %v4777_v40, %v4776_v39  ;;  %v7773_v45 = vpack.c.bf16 %v4811_v43, %v4810_v42  ;;  %v4998_v39 = vld [vmem:[%s9658_s7 + $0x60] sm:$0xff]  ;;  %v4999_v40 = vld [vmem:[%s9658_s7 + $0x68] sm:$0xff]  ;;  %v5000_v42 = vld [vmem:[%s9658_s7 + $0x70] sm:$0xff] }
 0x65d   :  { %7757 = vmatprep.subr.bf16.mxu1 %v7961_v56  ;;  %v5001_v43 = vld [vmem:[%s9658_s7 + $0x78] sm:$0xff] }
 0x65f   :  { %7726 = vmatpush3.bf16.msra.mxu0 %v7725_v49  ;;  %v7747_v49 = vpack.c.bf16 %v4795_v46, %v4794_v44  ;;  %v7800_v44 = vpack.c.bf16 %v5001_v43, %v5000_v42  ;;  %v5081_v46 = vld [vmem:[%s9660_s9 + $0x8] sm:$0xff] }
 0x660   :  { %7728 = vmatprep.subr.bf16.mxu0 %v7727_v51  ;;  %7759 = vmatpush1.bf16.msra.mxu1 %v7758_v52  ;;  %v4812_v52 = vld [vmem:[%s9656_s5 + $0x180] sm:$0xff] }
 0x661   :  { %7760 = vmatprep.subr.bf16.mxu1 %v7961_v56  ;;  %v7776_v55 = vpack.c.bf16 %v4813_v54, %v4812_v52  ;;  %v5085_v52 = vld [vmem:[%s9660_s9 + $0x28] sm:$0xff] }
 0x663   :  { %7730 = vmatpush3.bf16.msra.mxu0 %v7729_v57  ;;  %v2418_v57 = vpop.permute.xlu1 %2417 }
 0x664   :  { %7762 = vmatpush1.bf16.msra.mxu1 %v7761_v3  ;;  %7732 = vmatprep.subr.bf16.mxu0 %v7731_v7  ;;  %v2419_v63 = vrot.slane %v2418_v57, 6 }
 0x665   :  { %7763 = vmatprep.subr.bf16.mxu1 %v7961_v56 }
 0x666   :  { %v2421_v8 = vsel %vm2420_vm9, %v2419_v63, %v2418_v57  ;;  %v5087_v57 = vld [vmem:[%s9660_s9 + $0x38] sm:$0xff] }
 0x667   :  { %7734 = vmatpush3.bf16.msra.mxu0 %v7733_v11 }
 0x668   :  { %7765 = vmatpush1.bf16.msra.mxu1 %v7764_v14  ;;  %7736 = vmatprep.subr.bf16.mxu0 %v7735_v18  ;;  %v4828_v18 = vsub.s32 %v4825_v16, %v8249_v17  ;;  %v4989_v17 = vld [vmem:[%s9658_s7 + $0x18] sm:$0xff] }
 0x669   :  { %7766 = vmatprep.subr.bf16.mxu1 %v7961_v56 }
 0x66b   :  { %7738 = vmatpush3.bf16.msra.mxu0 %v7737_v24  ;;  %v4987_v24 = vld [vmem:[%s9658_s7 + $0x8] sm:$0xff] }
 0x66c   :  { %7768 = vmatpush1.bf16.msra.mxu1 %v7767_v28  ;;  %7740 = vmatprep.subr.bf16.mxu0 %v7739_v62  ;;  %v7779_v53 = vpack.c.bf16 %v4987_v24, %v4986_v20  ;;  %v4991_v62 = vld [vmem:[%s9658_s7 + $0x28] sm:$0xff] }
 0x66d   :  { %7769 = vmatprep.subr.bf16.mxu1 %v7961_v56 }
 0x66f   :  { %7742 = vmatpush3.bf16.msra.mxu0 %v7741_v33 }
 0x670   :  { %7771 = vmatpush1.bf16.msra.mxu1 %v7770_v23  ;;  %7744 = vmatprep.subr.bf16.mxu0 %v7743_v38  ;;  %v4995_v23 = vld [vmem:[%s9658_s7 + $0x48] sm:$0xff] }
 0x671   :  { %7772 = vmatprep.subr.bf16.mxu1 %v7961_v56 }
 0x673   :  { %7746 = vmatpush3.bf16.msra.mxu0 %v7745_v41  ;;  %v7797_v41 = vpack.c.bf16 %v4999_v40, %v4998_v39 }
 0x674   :  { %7748 = vmatprep.subr.bf16.mxu0 %v7747_v49  ;;  %7774 = vmatpush1.bf16.msra.mxu1 %v7773_v45  ;;  %v5080_v45 = vld [vmem:[%s9660_s9] sm:$0xff]  ;;  %v5083_v49 = vld [vmem:[%s9660_s9 + $0x18] sm:$0xff] }
 0x675   :  { %7775 = vmatprep.subr.bf16.mxu1 %v7961_v56  ;;  %v7803_v48 = vpack.c.bf16 %v5081_v46, %v5080_v45 }
 0x677   :  { %7750 = vmatpush3.bf16.msra.mxu0 %v7749_v50  ;;  %v7806_v50 = vpack.c.bf16 %v5083_v49, %v5082_v47 }
 0x678   :  { %7778 = vmatprep.subr.bf16.mxu0 %v7961_v56  ;;  %7777 = vmatpush1.bf16.msra.mxu1 %v7776_v55  ;;  %v5086_v55 = vld [vmem:[%s9660_s9 + $0x30] sm:$0xff] }
 0x679   :  { %7802 = vmatprep.subr.bf16.mxu1 %v7961_v56 }
 0x72a   :  { %v4627_v58 = vpop.f32.mrb[18].mxu0  ;;  %v4697_v59 = vpop.f32.mrb[18].mxu1 }
 0x72b   :  { %v4701_v0 = vmax.f32 %v4627_v58, %v4697_v59  ;;  %v7025_v1 = vpop.f32.mrb[19].mxu0  ;;  %v7032_v2 = vpop.f32.mrb[19].mxu1 }
 0x72c   :  { %v2437_v58 = vpop.permute.xlu0 %2436 }
 0x72d   :  { %4702 = vst.msk [vmem:[#allocation3] sm:$0x1f] %vm2370_vm15, %v4701_v0  ;;  %v2438_v1 = vrot.slane %v2437_v58, 6  ;;  %vm4842_vm15 = vcmask 130048  }
 0x72f   :  { %v2440_v11 = vsel %vm2439_vm12, %v2438_v1, %v2437_v58  ;;  %v7812_v58 = vpack.c.bf16 %v5087_v57, %v5086_v55  ;;  %v5091_v1 = vld [vmem:[%s9660_s9 + $0x58] sm:$0xff] }
 0x734   :  { %v5650_v31 = vld.sshfl [vmem:[#allocation3 + $0x3] sm:$0x1 pattern:$0x76325410]  ;;  %v4703_v61 = vld [vmem:[#allocation3] sm:$0x1] }
 0x735   :  { %4742 = vrot.lane.b32.xlu1 %v5650_v31, %s7963_s0  ;;  %v5648_v10 = vld.sshfl [vmem:[#allocation3 + $0x1] sm:$0x1 pattern:$0x76325410]  ;;  %4704 = vst.msk [vmem:[#allocation4 + $0x1] sm:$0x1] %vm2373_vm1, %v4703_v61  ;;  %v7782_v31 = vpack.c.bf16 %v4989_v17, %v4988_v29 }
 0x736   :  { %4714 = vrot.lane.b32.xlu0 %v5648_v10, %s7964_s24  ;;  %v5651_v37 = vld.sshfl [vmem:[#allocation3 + $0x4] sm:$0x1 pattern:$0x76325410]  ;;  %v4990_v61 = vld [vmem:[%s9658_s7 + $0x20] sm:$0xff] }
 0x737   :  { %v5649_v51 = vld.sshfl [vmem:[#allocation3 + $0x2] sm:$0x1 pattern:$0x76325410]  ;;  %v7785_v33 = vpack.c.bf16 %v4991_v62, %v4990_v61 }
 0x738   :  { %v4992_v10 = vld [vmem:[%s9658_s7 + $0x30] sm:$0xff] }
 0x739   :  { %4757 = vrot.lane.b32.xlu1 %v5651_v37, %s7965_s25  ;;  %v7788_v22 = vpack.c.bf16 %v4993_v34, %v4992_v10  ;;  %v4997_v37 = vld [vmem:[%s9658_s7 + $0x58] sm:$0xff] }
 0x73a   :  { %2403 = vrot.lane.b32.xlu0 %v5410_v6, %s7966_s30  ;;  %v7794_v38 = vpack.c.bf16 %v4997_v37, %v4996_v36 }
 0x73d   :  { %4729 = vrot.lane.b32.xlu1 %v5649_v51, %s7966_s30  ;;  %v5084_v51 = vld [vmem:[%s9660_s9 + $0x20] sm:$0xff] }
 0x73e   :  { %v7809_v54 = vpack.c.bf16 %v5085_v52, %v5084_v51 }
 0x7a7   :  { %v4743_v59 = vpop.permute.xlu1 %4742 }
 0x7a8   :  { %v4715_v60 = vpop.permute.xlu0 %4714  ;;  %v4744_v5 = vrot.slane %v4743_v59, 6 }
 0x7a9   :  { %v4716_v0 = vrot.slane %v4715_v60, 6 }
 0x7aa   :  { %v4745_v15 = vsel %vm2420_vm9, %v4744_v5, %v4743_v59  ;;  %v5088_v59 = vld [vmem:[%s9660_s9 + $0x40] sm:$0xff] }
 0x7ab   :  { %v4717_v2 = vsel %vm2387_vm5, %v4716_v0, %v4715_v60  ;;  %v4758_v3 = vpop.permute.xlu1 %4757  ;;  %v5089_v60 = vld [vmem:[%s9660_s9 + $0x48] sm:$0xff]  ;;  %v5090_v0 = vld [vmem:[%s9660_s9 + $0x50] sm:$0xff] }
 0x7ac   :  { %v2404_v7 = vpop.permute.xlu0 %2403  ;;  %4719 = vst.msk [vmem:[#allocation4 + $0x1] sm:$0x5] %vm8964_vm6, %v4717_v2  ;;  %v4759_v9 = vrot.slane %v4758_v3, 6  ;;  %v7815_v63 = vpack.c.bf16 %v5089_v60, %v5088_v59  ;;  %v7818_v2 = vpack.c.bf16 %v5091_v1, %v5090_v0 }
 0x7ad   :  { %2407 = vst.msk [vmem:[#allocation4 + $0x2] sm:$0x1] %vm2406_vm10, %v2404_v7 }
 0x7ae   :  { %2426 = vst.msk [vmem:[#allocation4 + $0x2] sm:$0x5] %vm9491_vm13, %v2421_v8  ;;  %v4760_v32 = vsel %vm2439_vm12, %v4759_v9, %v4758_v3  ;;  %v5092_v3 = vld [vmem:[%s9660_s9 + $0x60] sm:$0xff] }
 0x7af   :  { %2445 = vst.msk [vmem:[#allocation4 + $0x4] sm:$0x5] %vm9495_vm14, %v2440_v11  ;;  %v4730_v14 = vpop.permute.xlu1 %4729  ;;  %v7821_v5 = vpack.c.bf16 %v5093_v4, %v5092_v3  ;;  %v5652_v8 = vld [vmem:[%s9657_s6] ss:$0 sm:$0xff] }
 0x7b0   :  { %4732 = vst.msk [vmem:[#allocation4 + $0x3] sm:$0x1] %vm2406_vm10, %v4730_v14 }
 0x7b1   :  { %4747 = vst.msk [vmem:[#allocation4 + $0x3] sm:$0x5] %vm9491_vm13, %v4745_v15 }
 0x7b2   :  { %4762 = vst.msk [vmem:[#allocation4 + $0x5] sm:$0x5] %vm9495_vm14, %v4760_v32  ;;  %v5094_v32 = vld [vmem:[%s9660_s9 + $0x70] sm:$0xff] }
 0x7b9   :  { %v4763_v19 = vld [vmem:[#allocation4] sm:$0xff] }
 0x7ba   :  { %v4822_v25 = vcombine.high %v4763_v19, %v4763_v19  ;;  %v4829_v26 = vrot.slane %v4763_v19, %v4828_v18 }
 0x7bc   :  { %v4837_v27 = vcombine.high %v4829_v26, %v4829_v26  ;;  %v4836_v28 = vrot.slane %v4822_v25, %v4828_v18  ;;  %v5654_v18 = vld [vmem:[%s9659_s8] ss:$0 sm:$0xff] }
 0x7be   :  { %4909 = vmatprep.mubr.f32.mxu0 %v4837_v27  ;;  %v4838_v30 = vcombine.high %v4836_v28, %v4836_v28 }
 0x7bf   :  { %4910 = vmatmul.mubr.f32.vlgmr.msra.gmra.mrb[20].mxu0 %v4829_v26  ;;  %v5655_v26 = vld [vmem:[%s9661_s10] ss:$0 sm:$0xff] }
 0x7c0   :  { %5653 = vmatprep.mubr.msk.f32.mxu1 %vm4842_vm15, %v4838_v30  ;;  %7780 = vmatpush3.bf16.msra.mxu0 %v7779_v53 }
 0x7c1   :  { %4980 = vmatmul.mubr.f32.vlgmr.msra.gmra.mrb[20].mxu1 %v4836_v28  ;;  %7781 = vmatprep.subr.bf16.mxu0 %v7961_v56 }
 0x7c2   :  { %7065 = vmatprep.mubr.msk.f32.mxu0 %vm7962_vm11, %v7959_v21  ;;  %7100 = vmatprep.mubr.msk.f32.mxu1 %vm7962_vm11, %v7959_v21  ;;  %v4994_v21 = vld [vmem:[%s9658_s7 + $0x40] sm:$0xff] }
 0x7c3   :  { %v7791_v35 = vpack.c.bf16 %v4995_v23, %v4994_v21  ;;  %7804 = vmatpush3.bf16.msra.mxu1 %v7803_v48 }
 0x7c4   :  { %7783 = vmatpush3.bf16.msra.mxu0 %v7782_v31  ;;  %7805 = vmatprep.subr.bf16.mxu1 %v7961_v56 }
 0x7c5   :  { %7784 = vmatprep.subr.bf16.mxu0 %v7961_v56 }
 0x7c7   :  { %7807 = vmatpush3.bf16.msra.mxu1 %v7806_v50 }
 0x7c8   :  { %7786 = vmatpush3.bf16.msra.mxu0 %v7785_v33  ;;  %7808 = vmatprep.subr.bf16.mxu1 %v7961_v56 }
 0x7c9   :  { %7787 = vmatprep.subr.bf16.mxu0 %v7961_v56 }
 0x7cb   :  { %7810 = vmatpush3.bf16.msra.mxu1 %v7809_v54 }
 0x7cc   :  { %7789 = vmatpush3.bf16.msra.mxu0 %v7788_v22  ;;  %7811 = vmatprep.subr.bf16.mxu1 %v7961_v56 }
 0x7cd   :  { %7790 = vmatprep.subr.bf16.mxu0 %v7961_v56 }
 0x7cf   :  { %7813 = vmatpush3.bf16.msra.mxu1 %v7812_v58 }
 0x7d0   :  { %7792 = vmatpush3.bf16.msra.mxu0 %v7791_v35  ;;  %7814 = vmatprep.subr.bf16.mxu1 %v7961_v56 }
 0x7d1   :  { %7793 = vmatprep.subr.bf16.mxu0 %v7961_v56 }
 0x7d3   :  { %7816 = vmatpush3.bf16.msra.mxu1 %v7815_v63 }
 0x7d4   :  { %7795 = vmatpush3.bf16.msra.mxu0 %v7794_v38  ;;  %7817 = vmatprep.subr.bf16.mxu1 %v7961_v56 }
 0x7d5   :  { %7796 = vmatprep.subr.bf16.mxu0 %v7961_v56 }
 0x7d7   :  { %7819 = vmatpush3.bf16.msra.mxu1 %v7818_v2 }
 0x7d8   :  { %7798 = vmatpush3.bf16.msra.mxu0 %v7797_v41  ;;  %7820 = vmatprep.subr.bf16.mxu1 %v7961_v56 }
 0x7d9   :  { %7799 = vmatprep.subr.bf16.mxu0 %v7961_v56 }
 0x7db   :  { %7822 = vmatpush3.bf16.msra.mxu1 %v7821_v5 }
 0x7dc   :  { %7801 = vmatpush3.bf16.msra.mxu0 %v7800_v44  ;;  %7823 = vmatprep.subr.bf16.mxu1 %v7961_v56  ;;  %v5095_v56 = vld [vmem:[%s9660_s9 + $0x78] sm:$0xff]  ;;  %s7935_s9 = scalar_lea.vmem %s5181_s28, 32 }
 0x7dd   :  { %v7824_v16 = vpack.c.bf16 %v5095_v56, %v5094_v32  ;;  %p7936_p0 = scmp.ne.s32.totalorder %s5181_s28, %s7935_s9  ;;  %p7941_p2 = scmp.lt.s32.totalorder %s7935_s9, %s7935_s9 }
 0x7df   :  { %7825 = vmatpush3.bf16.msra.mxu1 %v7824_v16  ;;  %p7942_p3 = por %p7941_p2, %p7940_p1 }
 0x7e1   :  { %p7943_p4 = pnand %p7942_p3, %p7936_p0 }
 0x892   :  { %v6144_v6 = vpop.f32.mrb[20].mxu0 }
 0x893   :  { %v6145_v7 = vpop.f32.mrb[21].mxu0 }
 0x894   :  { %v6146_v9 = vadd.f32 %v6145_v7, %v6144_v6  ;;  %v4981_v11 = vpop.f32.mrb[20].mxu1 }
 0x895   :  { %v4983_v12 = vpop.f32.mrb[21].mxu1 }
 0x896   :  { %v4912_v13 = vadd.f32 %v6146_v9, %v5652_v8 }
 0x898   :  { %v4982_v14 = vadd.f32 %v4981_v11, %v4912_v13 }
 0x89a   :  { %v4985_v15 = vmax.f32 %v4982_v14, 0.0 }
 0x89c   :  { %7066 = vmatmul.mubr.f32.vlgmr.msra.gmra.mrb[22].mxu0 %v4985_v15 }
 0x96f   :  { %v5075_v19 = vpop.f32.mrb[22].mxu0 }
 0x970   :  { %v5076_v20 = vadd.f32 %v5654_v18, %v5075_v19  ;;  %v7067_v24 = vpop.f32.mrb[23].mxu0 }
 0x972   :  { %v5079_v25 = vmax.f32 %v5076_v20, 0.0 }
 0x974   :  { %7101 = vmatmul.mubr.f32.vlgmr.msra.gmra.mrb[22].mxu1 %v5079_v25 }
 0xa47   :  { %v5169_v27 = vpop.f32.mrb[22].mxu1 }
 0xa48   :  { %v5170_v28 = vadd.f32 %v5655_v26, %v5169_v27  ;;  %v7102_v53 = vpop.f32.mrb[23].mxu1 }
 0xa4a   :  { %5173 = vst [vmem:[#allocation5] sm:$0x3] %v5170_v28 }
 0xa4b   :  { %7946 = shalt.err (!%p7943_p4)
}
 0xa4c   :  { %s7947_s30 = scalar_lea.hbm %s9662_s11, 32 }
 0xa4d   :  { %p7948_p5 = scmp.ne.s32.totalorder %s9662_s11, %s7947_s30  ;;  %p7951_p6 = scmp.lt.u32.totalorder %s7947_s30, %s9662_s11 }
 0xa4f   :  { %p7953_p7 = pnand %p7951_p6, %p7948_p5 }
 0xa51   :  { %7956 = shalt.err (!%p7953_p7)
}
 0xa52   :  { %5183 = dma.vmem_to_hbm [thread:$0]  %s5181_s28, 32, %s9662_s11, [#allocation6]  }
 0xa53   :  { %7957 = dma.done.wait [#allocation6], 32  }
 0xa54   :  { %7958 = vsyncadd [#allocation6], 4294967264 }
 0xa55   :  { %5187 = vsyncpa [#allocation6], 1 }

</bundles_post_ra>
